<compile_context>
chip_gen: v7x
topology: tpu7x:2x2x1
jax: 0.10.0
libtpu: 0.0.40
codegen_flags: <defaults>
</compile_context>

<pallas_src>
import math
from functools import partial

import jax
import jax.numpy as jnp
from jax.experimental import pallas as pl
from jax.experimental.pallas import tpu as pltpu

LANE = 128                      # channel dims padded to the 128-lane vreg width

# ----------------------------------------------------------------------------
# Chip-aware knobs and one-time capability probes (cached).
# ----------------------------------------------------------------------------
_VMEM_CAP_CACHE = None
_BUFFERED1_OK = None
_STRIDED_OK = None


def _vmem_cap():
    """Physical VMEM per core; conservative (v7x-sized) fallback if unknown."""
    global _VMEM_CAP_CACHE
    if _VMEM_CAP_CACHE is None:
        try:
            _VMEM_CAP_CACHE = int(pltpu.get_tpu_info().vmem_capacity_bytes)
        except Exception:
            _VMEM_CAP_CACHE = 64 * 1024 * 1024
    return _VMEM_CAP_CACHE


def _vmem_limit():
    # ~96 MiB on the 128 MiB chips (v5e/v6e), ~48 MiB on v7x (64 MiB/TC).
    return max(32 << 20, min(int(_vmem_cap() * 3 // 4), 96 << 20))


def _row_tile():
    # 512-row tail tiles on 128 MiB-VMEM chips, 256 on v7x.
    return 512 if _vmem_cap() >= (100 << 20) else 256


def _buffered1_supported():
    """Probe whether constant operands can be single-buffered
    (pipeline_mode=pl.Buffered(1)); fall back to default double-buffering."""
    global _BUFFERED1_OK
    if _BUFFERED1_OK is not None:
        return _BUFFERED1_OK
    try:
        def k(x_ref, w_ref, o_ref):
            o_ref[...] = x_ref[...] + w_ref[...]
        x = jnp.arange(16 * 128, dtype=jnp.float32).reshape(16, 128)
        w = jnp.ones((8, 128), jnp.float32)
        out = pl.pallas_call(
            k, grid=(2,),
            out_shape=jax.ShapeDtypeStruct((16, 128), jnp.float32),
            in_specs=[pl.BlockSpec((8, 128), lambda i: (i, 0)),
                      pl.BlockSpec((8, 128), lambda i: (0, 0),
                                   pipeline_mode=pl.Buffered(1))],
            out_specs=pl.BlockSpec((8, 128), lambda i: (i, 0)),
        )(x, w)
        jax.block_until_ready(out)
        _BUFFERED1_OK = bool(jnp.allclose(out, x + 1.0))
    except Exception:
        _BUFFERED1_OK = False
    return _BUFFERED1_OK


def _strided_ds_supported():
    """Probe stride-s ref slicing (used to fold the W-avgpool into stage 1)."""
    global _STRIDED_OK
    if _STRIDED_OK is not None:
        return _STRIDED_OK
    try:
        def k(x_ref, o_ref):
            o_ref[...] = x_ref[pl.ds(0, 8, stride=2), :]
        x = jnp.arange(16 * 128, dtype=jnp.float32).reshape(16, 128)
        out = pl.pallas_call(
            k, out_shape=jax.ShapeDtypeStruct((8, 128), jnp.float32),
        )(x)
        jax.block_until_ready(out)
        _STRIDED_OK = bool(jnp.allclose(out, x[::2]))
    except Exception:
        _STRIDED_OK = False
    return _STRIDED_OK


def _const_spec(shape):
    """BlockSpec for an operand fully resident across the grid (weights /
    folded-BN vectors): constant index_map, single-buffered when supported."""
    zeros = (0,) * len(shape)
    imap = lambda *_: zeros
    if _buffered1_supported():
        return pl.BlockSpec(shape, imap, pipeline_mode=pl.Buffered(1))
    return pl.BlockSpec(shape, imap)


# ----------------------------------------------------------------------------
# Small helpers.
# ----------------------------------------------------------------------------
def _rup(n, m):
    return ((n + m - 1) // m) * m


def _tile_rows(m):
    tm = min(_row_tile(), _rup(m, 16))   # multiple of 16: bf16 sublane packing
    return tm, _rup(m, tm)


def _bn_fold(gamma, beta, mean, var, eps=1e-5):
    scale = gamma / jnp.sqrt(var + eps)
    bias = beta - mean * scale
    return scale.reshape(1, -1), bias.reshape(1, -1)


def _pad2(a, rows, cols):
    return jnp.pad(a, ((0, rows - a.shape[0]), (0, cols - a.shape[1])))


def _pad_rows(a, rows):
    if rows == a.shape[0]:
        return a
    return jnp.pad(a, ((0, rows - a.shape[0]), (0, 0)))


def _pool_im2col(x_nhwc, s):
    # (N,H,W,C) -> (N*(H/s)*(W/s), s*s*C): pool phases stacked along channels
    # (downsample branch only; the main branch pools inside the kernels).
    N, H, W, C = x_nhwc.shape
    Ho, Wo = H // s, W // s
    cols = []
    for i in range(s):
        for j in range(s):
            cols.append(x_nhwc[:, i::s, j::s, :].reshape(N * Ho * Wo, C))
    return jnp.concatenate(cols, axis=-1)


# ----------------------------------------------------------------------------
# Stage 1: per-image fused conv1(1x1)+bn1+relu -> conv2(3x3)+bn2+relu
#          -> (optionally) avgpool over W.  Grid iterates over images.
# ----------------------------------------------------------------------------
def _make_stage1_kernel(H, W, s, Cpl, padr, pool_w):
    HW = H * W
    Wo = W // s

    def kernel(x_ref, w1_ref, s1_ref, b1_ref, w2_ref, s2_ref, b2_ref,
               o_ref, pad_ref):
        # ---- conv1 (1x1) + bn1 + relu -------------------------------------
        y1 = jnp.dot(x_ref[0], w1_ref[...], preferred_element_type=jnp.float32)
        y1 = jnp.maximum(y1 * s1_ref[...] + b1_ref[...], 0.0)

        # Stash out1 in a flat, spatially padded f32 scratch: rows
        # [padr, padr+HW) hold pixel m = h*W + w; >= W+1 zero rows on each
        # side supply the 3x3 halo in H; the W wrap-around is masked below.
        zeros_pad = jnp.zeros((padr, Cpl), pad_ref.dtype)
        pad_ref[pl.ds(0, padr), :] = zeros_pad
        pad_ref[pl.ds(padr + HW, padr), :] = zeros_pad
        pad_ref[pl.ds(padr, HW), :] = y1

        # ---- conv2 (3x3, pad=1) + bn2 + relu ------------------------------
        # 9 row-shifted tap matmuls (bf16 operands, f32 accumulation); no
        # HBM im2col slab is ever created.
        wmod = jax.lax.broadcasted_iota(jnp.int32, (HW, 1), 0) % W
        acc = jnp.zeros((HW, Cpl), jnp.float32)
        for kh in range(3):
            for kw in range(3):
                off = padr + (kh - 1) * W + (kw - 1)       # static, >= 0
                tap = pad_ref[pl.ds(off, HW), :].astype(jnp.bfloat16)
                if kw == 0:      # pixel (h+kh-1, w-1): invalid at w == 0
                    tap = jnp.where(wmod != 0, tap, jnp.zeros_like(tap))
                elif kw == 2:    # pixel (h+kh-1, w+1): invalid at w == W-1
                    tap = jnp.where(wmod != W - 1, tap, jnp.zeros_like(tap))
                acc = acc + jnp.dot(tap, w2_ref[kh * 3 + kw],
                                    preferred_element_type=jnp.float32)
        y2 = jnp.maximum(acc * s2_ref[...] + b2_ref[...], 0.0)

        if s == 1 or not pool_w:
            o_ref[0] = y2.astype(o_ref.dtype)
        else:
            # ---- avgpool over W (fused) -----------------------------------
            # With s | W, flat row m = h*W + w has m % s == w % s, so pool
            # phase j over w is a single stride-s row window.  (The H
            # direction is pooled in the tail matmul via K-stacking; the
            # 1/(s*s) factor is folded into the conv3 weight.)
            pad_ref[pl.ds(padr, HW), :] = y2
            acc_w = pad_ref[pl.ds(padr, H * Wo, stride=s), :]
            for j in range(1, s):
                acc_w = acc_w + pad_ref[pl.ds(padr + j, H * Wo, stride=s), :]
            o_ref[0] = acc_w.astype(o_ref.dtype)

    return kernel


def _stage1(x3, w1, s1, b1, w2, s2, b2, H, W, s, pool_w):
    N, HW, Cin_p = x3.shape
    Cpl = w1.shape[1]
    padr = _rup(W + 1, 16)
    rows_out = H * (W // s) if (s > 1 and pool_w) else HW
    kernel = _make_stage1_kernel(H, W, s, Cpl, padr, pool_w)
    return pl.pallas_call(
        kernel,
        grid=(N,),
        out_shape=jax.ShapeDtypeStruct((N, rows_out, Cpl), jnp.bfloat16),
        in_specs=[
            pl.BlockSpec((1, HW, Cin_p), lambda n: (n, 0, 0)),
            _const_spec(w1.shape),
            _const_spec(s1.shape),
            _const_spec(b1.shape),
            _const_spec(w2.shape),
            _const_spec(s2.shape),
            _const_spec(b2.shape),
        ],
        out_specs=pl.BlockSpec((1, rows_out, Cpl), lambda n: (n, 0, 0)),
        scratch_shapes=[pltpu.VMEM((HW + 2 * padr, Cpl), jnp.float32)],
        compiler_params=pltpu.CompilerParams(
            dimension_semantics=("parallel",),
            vmem_limit_bytes=_vmem_limit()),
    )(x3, w1, s1, b1, w2, s2, b2)


# ----------------------------------------------------------------------------
# Tail: (pool phases stacked along K) @ conv3 + bn3 + residual + relu,
# with the downsample branch fused in.  Row-tiled over flattened pixels.
# ----------------------------------------------------------------------------
def _tail_dual_kernel(xs_ref, w3_ref, s3_ref, xd_ref, wd_ref, sd_ref, b_ref,
                      o_ref):
    # relu( BN3(conv3(pool(out2))) + BNd(convd(pool(x))) ); biases pre-summed.
    y = jnp.dot(xs_ref[...], w3_ref[...], preferred_element_type=jnp.float32)
    yd = jnp.dot(xd_ref[...], wd_ref[...], preferred_element_type=jnp.float32)
    out = y * s3_ref[...] + yd * sd_ref[...] + b_ref[...]
    o_ref[...] = jnp.maximum(out, 0.0).astype(o_ref.dtype)


def _tail_identity_kernel(xs_ref, w3_ref, s3_ref, b3_ref, id_ref, o_ref):
    # relu( BN3(conv3(out2)) + x )   (stride == 1 and Cin == 4*planes)
    y = jnp.dot(xs_ref[...], w3_ref[...], preferred_element_type=jnp.float32)
    y = y * s3_ref[...] + b3_ref[...] + id_ref[...].astype(jnp.float32)
    o_ref[...] = jnp.maximum(y, 0.0).astype(o_ref.dtype)


def _row_tiled_call(kernel, args, out_cols, out_dtype, tm):
    """args: list of (kind, array); 'row' -> tiled over rows, 'const' ->
    whole array resident across the grid (weights / folded-BN vectors)."""
    m = None
    in_specs, arrays = [], []
    for kind, a in args:
        arrays.append(a)
        if kind == 'row':
            m = a.shape[0]
            in_specs.append(pl.BlockSpec((tm, a.shape[1]), lambda i: (i, 0)))
        else:
            in_specs.append(_const_spec(a.shape))
    assert m is not None and m % tm == 0
    return pl.pallas_call(
        kernel,
        grid=(m // tm,),
        out_shape=jax.ShapeDtypeStruct((m, out_cols), out_dtype),
        in_specs=in_specs,
        out_specs=pl.BlockSpec((tm, out_cols), lambda i: (i, 0)),
        compiler_params=pltpu.CompilerParams(
            dimension_semantics=("parallel",),
            vmem_limit_bytes=_vmem_limit()),
    )(*arrays)


# ----------------------------------------------------------------------------
# Forward pass.
# ----------------------------------------------------------------------------
@partial(jax.jit, static_argnums=(2,))
def bottleneck_forward(x_nchw, p, stride):
    """Pallas implementation of Bottleneck.forward (inference-mode BN).
    Input is NCHW f32; output is NCHW bf16 (activations kept in bf16)."""
    N, Cin, H, W = x_nchw.shape
    planes = p['w1'].shape[0]
    exp4 = p['w3'].shape[0]
    s = stride
    assert H % s == 0 and W % s == 0, "spatial dims must divide the stride"
    Ho, Wo = H // s, W // s
    HW = H * W
    M2 = N * Ho * Wo
    Cp_in, Cp_pl, Cp_ex = _rup(Cin, LANE), _rup(planes, LANE), _rup(exp4, LANE)

    # NHWC, cast to bf16 before the lane pad, channels padded to 128.
    x_nhwc = jnp.transpose(x_nchw, (0, 2, 3, 1)).astype(jnp.bfloat16)
    x_nhwc = jnp.pad(x_nhwc, ((0, 0), (0, 0), (0, 0), (0, Cp_in - Cin)))
    x3 = x_nhwc.reshape(N, HW, Cp_in)

    # conv1 / conv2 weights + folded BN.
    w1 = _pad2(p['w1'][:, :, 0, 0].T, Cp_in, Cp_pl).astype(jnp.bfloat16)
    s1, b1 = (_pad2(v, 1, Cp_pl) for v in _bn_fold(*p['bn1']))
    w2 = jnp.transpose(p['w2'], (2, 3, 1, 0))                    # (3,3,Ci,Co)
    w2 = jnp.pad(w2, ((0, 0), (0, 0),
                      (0, Cp_pl - planes), (0, Cp_pl - planes)))
    w2 = w2.reshape(9, Cp_pl, Cp_pl).astype(jnp.bfloat16)
    s2, b2 = (_pad2(v, 1, Cp_pl) for v in _bn_fold(*p['bn2']))

    # Stage 1: conv1+bn1+relu -> conv2(3x3, in-kernel taps, no HBM im2col)
    # + bn2 + relu -> avgpool over W (when strided ref loads are available).
    pool_w = (s > 1) and _strided_ds_supported()
    b_w = _stage1(x3, w1, s1, b1, w2, s2, b2, H, W, s, pool_w)

    # Remaining pool phases stacked along K for the tail matmul.
    if s == 1:
        xs3 = b_w.reshape(M2, Cp_pl)
        kphases = 1
    elif pool_w:
        # W already pooled in-kernel: stack the s H-phases (free reshape +
        # one transpose of the half-size tensor).
        b5 = b_w.reshape(N, Ho, s, Wo, Cp_pl)
        xs3 = jnp.transpose(b5, (0, 1, 3, 2, 4)).reshape(M2, s * Cp_pl)
        kphases = s
    else:
        # Fallback: stack all s*s phases (free reshape + one transpose).
        b5 = b_w.reshape(N, Ho, s, Wo, s * Cp_pl)
        xs3 = jnp.transpose(b5, (0, 1, 3, 2, 4)).reshape(M2, s * s * Cp_pl)
        kphases = s * s

    tm, Mp2 = _tile_rows(M2)
    xs3 = _pad_rows(xs3, Mp2)

    # conv3 weight: pool phases stacked along K, 1/(s*s) folded in.
    w3 = _pad2(p['w3'][:, :, 0, 0].T, Cp_pl, Cp_ex)
    w3 = (jnp.tile(w3, (kphases, 1)) / (s * s)).astype(jnp.bfloat16)
    s3, b3 = (_pad2(v, 1, Cp_ex) for v in _bn_fold(*p['bn3']))

    if s > 1 or Cin != exp4:
        # Downsample branch fused into the same kernel as the main tail.
        wd = _pad2(p['wd'][:, :, 0, 0].T, Cp_in, Cp_ex)
        wd = (jnp.tile(wd, (s * s, 1)) / (s * s)).astype(jnp.bfloat16)
        sd, bd = (_pad2(v, 1, Cp_ex) for v in _bn_fold(*p['bnd']))
        xsd = _pad_rows(_pool_im2col(x_nhwc, s), Mp2)             # bf16
        out3 = _row_tiled_call(
            _tail_dual_kernel,
            [('row', xs3), ('const', w3), ('const', s3),
             ('row', xsd), ('const', wd), ('const', sd),
             ('const', b3 + bd)],
            Cp_ex, jnp.bfloat16, tm)
    else:
        # stride == 1 and Cin == exp4: identity is the (padded, bf16) input.
        identity = _pad_rows(x3.reshape(N * HW, Cp_in), Mp2)
        out3 = _row_tiled_call(
            _tail_identity_kernel,
            [('row', xs3), ('const', w3), ('const', s3), ('const', b3),
             ('row', identity)],
            Cp_ex, jnp.bfloat16, tm)

    out3 = out3[:M2, :exp4].reshape(N, Ho, Wo, exp4)
    return jnp.transpose(out3, (0, 3, 1, 2))                      # NCHW, bf16


# ----------------------------------------------------------------------------
# Pure-JAX f32 reference (NCHW, PyTorch semantics) for correctness checking.
# ----------------------------------------------------------------------------
def bottleneck_reference(x, p, stride):
    def conv(x, w, pad=0):
        return jax.lax.conv_general_dilated(
            x, w, (1, 1), [(pad, pad), (pad, pad)],
            dimension_numbers=('NCHW', 'OIHW', 'NCHW'))

    def bn(x, gm, bt, mu, vr, eps=1e-5):
        sc = gm / jnp.sqrt(vr + eps)
        bs = bt - mu * sc
        return x * sc[None, :, None, None] + bs[None, :, None, None]

    def avgpool(x, s):
        if s == 1:
            return x
        N, C, H, W = x.shape
        return x.reshape(N, C, H // s, s, W // s, s).mean(axis=(3, 5))

    relu = lambda v: jnp.maximum(v, 0.0)
    out = relu(bn(conv(x, p['w1']), *p['bn1']))
    out = relu(bn(conv(out, p['w2'], pad=1), *p['bn2']))
    out = avgpool(out, stride)
    out = bn(conv(out, p['w3']), *p['bn3'])
    Cin, exp4 = x.shape[1], p['w3'].shape[0]
    if stride > 1 or Cin != exp4:
        identity = bn(conv(avgpool(x, stride), p['wd']), *p['bnd'])
    else:
        identity = x
    return relu(out + identity)


# ----------------------------------------------------------------------------
# Deterministic parameter init (PyTorch OIHW layouts, BN per-channel params).
# ----------------------------------------------------------------------------
def init_params(key, inplanes, planes):
    exp4 = planes * 4
    ks = jax.random.split(key, 8)

    def conv_w(k, co, ci, kh, kw):
        bound = 1.0 / math.sqrt(ci * kh * kw)
        return jax.random.uniform(k, (co, ci, kh, kw), jnp.float32,
                                  -bound, bound)

    def bn_p(k, c):
        k1, k2, k3, k4 = jax.random.split(k, 4)
        gamma = jax.random.uniform(k1, (c,), jnp.float32, 0.5, 1.5)
        beta = 0.1 * jax.random.normal(k2, (c,), jnp.float32)
        mean = 0.1 * jax.random.normal(k3, (c,), jnp.float32)
        var = jax.random.uniform(k4, (c,), jnp.float32, 0.5, 1.5)
        return (gamma, beta, mean, var)

    return {
        'w1': conv_w(ks[0], planes, inplanes, 1, 1), 'bn1': bn_p(ks[1], planes),
        'w2': conv_w(ks[2], planes, planes, 3, 3),   'bn2': bn_p(ks[3], planes),
        'w3': conv_w(ks[4], exp4, planes, 1, 1),     'bn3': bn_p(ks[5], exp4),
        'wd': conv_w(ks[6], exp4, inplanes, 1, 1),   'bnd': bn_p(ks[7], exp4),
    }


def _check(x, params, stride, label):
    out = jax.block_until_ready(bottleneck_forward(x, params, stride))
    ref = bottleneck_reference(x, params, stride)
    N, Cin, H, W = x.shape
    exp4 = params['w3'].shape[0]
    assert out.shape == ref.shape == (N, exp4, H // stride, W // stride)
    # bf16 matmul operands / activations (f32 MXU accumulation) -> relaxed
    # tolerance vs the pure-f32 reference.
    ok = bool(jnp.allclose(out.astype(jnp.float32), ref, rtol=5e-2, atol=5e-2))
    max_err = float(jnp.max(jnp.abs(out.astype(jnp.float32) - ref)))
    assert ok, f"{label}: mismatch vs f32 reference (max abs err {max_err})"


if __name__ == "__main__":
    # Warm the chip-introspection / capability probes outside of tracing.
    _vmem_cap()
    _buffered1_supported()
    _strided_ds_supported()

    key = jax.random.PRNGKey(0)
    k1, k2, k3, k4 = jax.random.split(key, 4)

    # Config 1: stride=2 -> avgpool + fused downsample branch.
    x = jax.random.normal(k1, (2, 16, 16, 16), jnp.float32)
    params = init_params(k2, 16, 8)
    _check(x, params, stride=2, label="stride2_downsample")

    # Config 2: stride=1, inplanes == planes*4 -> identity fast path.
    x2 = jax.random.normal(k3, (2, 32, 16, 16), jnp.float32)
    params2 = init_params(k4, 32, 8)
    _check(x2, params2, stride=1, label="stride1_identity")

    print("KERNEL_OK")
</pallas_src>

<mosaic_0001>
module attributes {stable_mosaic.version = 11 : i64} {
  func.func @k(%arg0: i32, %arg1: memref<8x128xf32, #tpu.memory_space<vmem>>, %arg2: memref<8x128xf32, #tpu.memory_space<vmem>>, %arg3: memref<8x128xf32, #tpu.memory_space<vmem>>) attributes {dimension_semantics = [#tpu.dimension_semantics<arbitrary>], iteration_bounds = array<i64: 2>, scalar_prefetch = 0 : i64, scratch_operands = 0 : i64, tpu.core_type = #tpu.core_type<tc>, window_params = [{transform_indices = @transform_0, window_bounds = array<i64: 8, 128>}, {pipeline_mode = #tpu.pipeline_mode<synchronous>, transform_indices = @transform_1, window_bounds = array<i64: 8, 128>}, {transform_indices = @transform_2, window_bounds = array<i64: 8, 128>}]} {
    %c0 = arith.constant 0 : index
    %c0_0 = arith.constant 0 : index
    %0 = vector.load %arg1[%c0, %c0_0] : memref<8x128xf32, #tpu.memory_space<vmem>>, vector<8x128xf32>
    %c0_1 = arith.constant 0 : index
    %c0_2 = arith.constant 0 : index
    %1 = vector.load %arg2[%c0_1, %c0_2] : memref<8x128xf32, #tpu.memory_space<vmem>>, vector<8x128xf32>
    %2 = arith.addf %0, %1 : vector<8x128xf32>
    %c0_3 = arith.constant 0 : index
    %c0_4 = arith.constant 0 : index
    %3 = vector.load %arg3[%c0_3, %c0_4] : memref<8x128xf32, #tpu.memory_space<vmem>>, vector<8x128xf32>
    tpu.vector_store %arg3[%c0_3, %c0_4], %2 {strides = array<i32>} : memref<8x128xf32, #tpu.memory_space<vmem>>, vector<8x128xf32>,
    return
  }
  func.func @transform_0(%arg0: i32) -> (i32, i32) {
    %c0_i32 = arith.constant 0 : i32
    %c0_i32_0 = arith.constant 0 : i32
    return %arg0, %c0_i32 : i32, i32
  }
  func.func @transform_1(%arg0: i32) -> (i32, i32) {
    %c0_i32 = arith.constant 0 : i32
    %c0_i32_0 = arith.constant 0 : i32
    %c0_i32_1 = arith.constant 0 : i32
    return %c0_i32, %c0_i32_0 : i32, i32
  }
  func.func @transform_2(%arg0: i32) -> (i32, i32) {
    %c0_i32 = arith.constant 0 : i32
    %c0_i32_0 = arith.constant 0 : i32
    return %arg0, %c0_i32 : i32, i32
  }
}

module attributes {stable_mosaic.version = 11 : i64} {
  func.func @k(%arg0: memref<16x128xf32, #tpu.memory_space<vmem>>, %arg1: memref<8x128xf32, #tpu.memory_space<vmem>>) attributes {dimension_semantics = [], scalar_prefetch = 0 : i64, scratch_operands = 0 : i64, tpu.core_type = #tpu.core_type<tc>} {
    %c0 = arith.constant 0 : index
    %c0_0 = arith.constant 0 : index
    %0 = tpu.strided_load %arg0[%c0, %c0_0] {strides = array<i32: 2, 1>} : memref<16x128xf32, #tpu.memory_space<vmem>>, vector<8x128xf32>
    %c0_1 = arith.constant 0 : index
    %c0_2 = arith.constant 0 : index
    %1 = vector.load %arg1[%c0_1, %c0_2] : memref<8x128xf32, #tpu.memory_space<vmem>>, vector<8x128xf32>
    tpu.vector_store %arg1[%c0_1, %c0_2], %0 {strides = array<i32>} : memref<8x128xf32, #tpu.memory_space<vmem>>, vector<8x128xf32>,
    return
  }
}

module attributes {stable_mosaic.version = 11 : i64} {
  func.func @kernel(%arg0: i32, %arg1: memref<1x256x128xbf16, #tpu.memory_space<vmem>>, %arg2: memref<128x128xbf16, #tpu.memory_space<vmem>>, %arg3: memref<1x128xf32, #tpu.memory_space<vmem>>, %arg4: memref<1x128xf32, #tpu.memory_space<vmem>>, %arg5: memref<9x128x128xbf16, #tpu.memory_space<vmem>>, %arg6: memref<1x128xf32, #tpu.memory_space<vmem>>, %arg7: memref<1x128xf32, #tpu.memory_space<vmem>>, %arg8: memref<1x256x128xbf16, #tpu.memory_space<vmem>>, %arg9: memref<320x128xf32, #tpu.memory_space<vmem>>) attributes {dimension_semantics = [#tpu.dimension_semantics<parallel>], iteration_bounds = array<i64: 2>, scalar_prefetch = 0 : i64, scratch_operands = 1 : i64, tpu.core_type = #tpu.core_type<tc>, window_params = [{transform_indices = @transform_0, window_bounds = array<i64: 1, 256, 128>}, {pipeline_mode = #tpu.pipeline_mode<synchronous>, transform_indices = @transform_1, window_bounds = array<i64: 128, 128>}, {pipeline_mode = #tpu.pipeline_mode<synchronous>, transform_indices = @transform_2, window_bounds = array<i64: 1, 128>}, {pipeline_mode = #tpu.pipeline_mode<synchronous>, transform_indices = @transform_3, window_bounds = array<i64: 1, 128>}, {pipeline_mode = #tpu.pipeline_mode<synchronous>, transform_indices = @transform_4, window_bounds = array<i64: 9, 128, 128>}, {pipeline_mode = #tpu.pipeline_mode<synchronous>, transform_indices = @transform_5, window_bounds = array<i64: 1, 128>}, {pipeline_mode = #tpu.pipeline_mode<synchronous>, transform_indices = @transform_6, window_bounds = array<i64: 1, 128>}, {transform_indices = @transform_7, window_bounds = array<i64: 1, 256, 128>}]} {
    %c0 = arith.constant 0 : index
    %c0_0 = arith.constant 0 : index
    %c0_1 = arith.constant 0 : index
    %0 = vector.load %arg1[%c0, %c0_0, %c0_1] : memref<1x256x128xbf16, #tpu.memory_space<vmem>>, vector<1x256x128xbf16>
    %1 = vector.shape_cast %0 : vector<1x256x128xbf16> to vector<256x128xbf16>
    %c0_2 = arith.constant 0 : index
    %c0_3 = arith.constant 0 : index
    %2 = vector.load %arg2[%c0_2, %c0_3] : memref<128x128xbf16, #tpu.memory_space<vmem>>, vector<128x128xbf16>
    %cst = arith.constant dense<0.000000e+00> : vector<256x128xf32>
    %3 = tpu.matmul %1, %2, %cst {dimension_numbers = #tpu.dot_dimension_numbers<[1], [0], [0], [1], [0, 0, 1, 1], [], []>} : vector<256x128xbf16>, vector<128x128xbf16>, vector<256x128xf32> -> vector<256x128xf32>
    %c0_4 = arith.constant 0 : index
    %c0_5 = arith.constant 0 : index
    %4 = vector.load %arg3[%c0_4, %c0_5] : memref<1x128xf32, #tpu.memory_space<vmem>>, vector<1x128xf32>
    %5 = vector.broadcast %4 : vector<1x128xf32> to vector<256x128xf32>
    %6 = arith.mulf %3, %5 : vector<256x128xf32>
    %c0_6 = arith.constant 0 : index
    %c0_7 = arith.constant 0 : index
    %7 = vector.load %arg4[%c0_6, %c0_7] : memref<1x128xf32, #tpu.memory_space<vmem>>, vector<1x128xf32>
    %8 = vector.broadcast %7 : vector<1x128xf32> to vector<256x128xf32>
    %9 = arith.addf %6, %8 : vector<256x128xf32>
    %cst_8 = arith.constant 0.000000e+00 : f32
    %10 = vector.broadcast %cst_8 : f32 to vector<256x128xf32>
    %11 = arith.maximumf %9, %10 : vector<256x128xf32>
    %cst_9 = arith.constant 0.000000e+00 : f32
    %12 = vector.broadcast %cst_9 : f32 to vector<32x128xf32>
    %c0_10 = arith.constant 0 : index
    %c0_11 = arith.constant 0 : index
    %13 = vector.load %arg9[%c0_10, %c0_11] : memref<320x128xf32, #tpu.memory_space<vmem>>, vector<32x128xf32>
    tpu.vector_store %arg9[%c0_10, %c0_11], %12 {strides = array<i32>} : memref<320x128xf32, #tpu.memory_space<vmem>>, vector<32x128xf32>,
    %c288 = arith.constant 288 : index
    %c0_12 = arith.constant 0 : index
    %14 = vector.load %arg9[%c288, %c0_12] : memref<320x128xf32, #tpu.memory_space<vmem>>, vector<32x128xf32>
    tpu.vector_store %arg9[%c288, %c0_12], %12 {strides = array<i32>} : memref<320x128xf32, #tpu.memory_space<vmem>>, vector<32x128xf32>,
    %c32 = arith.constant 32 : index
    %c0_13 = arith.constant 0 : index
    %15 = vector.load %arg9[%c32, %c0_13] : memref<320x128xf32, #tpu.memory_space<vmem>>, vector<256x128xf32>
    tpu.vector_store %arg9[%c32, %c0_13], %11 {strides = array<i32>} : memref<320x128xf32, #tpu.memory_space<vmem>>, vector<256x128xf32>,
    %16 = tpu.iota {dimensions = array<i32: 0>} : vector<256x1xi32>
    %c16_i32 = arith.constant 16 : i32
    %c0_i32 = arith.constant 0 : i32
    %17 = arith.cmpi eq, %c16_i32, %c0_i32 : i32
    %c1_i32 = arith.constant 1 : i32
    %18 = arith.select %17, %c1_i32, %c16_i32 : i32
    %19 = vector.broadcast %18 : i32 to vector<256x1xi32>
    %20 = arith.remsi %16, %19 : vector<256x1xi32>
    %c0_i32_14 = arith.constant 0 : i32
    %21 = vector.broadcast %c0_i32_14 : i32 to vector<256x1xi32>
    %22 = arith.cmpi ne, %20, %21 : vector<256x1xi32>
    %c0_i32_15 = arith.constant 0 : i32
    %23 = vector.broadcast %c0_i32_15 : i32 to vector<256x1xi32>
    %24 = arith.cmpi slt, %20, %23 : vector<256x1xi32>
    %c0_i32_16 = arith.constant 0 : i32
    %25 = arith.cmpi slt, %18, %c0_i32_16 : i32
    %26 = vector.broadcast %25 : i1 to vector<256x1xi1>
    %27 = vector.broadcast %26 : vector<256x1xi1> to vector<256x1xi1>
    %28 = arith.xori %24, %27 : vector<256x1xi1>
    %29 = arith.andi %28, %22 : vector<256x1xi1>
    %30 = vector.broadcast %18 : i32 to vector<256x1xi32>
    %31 = arith.addi %20, %30 : vector<256x1xi32>
    %32 = arith.select %29, %31, %20 : vector<256x1xi1>, vector<256x1xi32>
    %cst_17 = arith.constant 0.000000e+00 : f32
    %33 = vector.broadcast %cst_17 : f32 to vector<256x128xf32>
    %c15 = arith.constant 15 : index
    %c0_18 = arith.constant 0 : index
    %34 = vector.load %arg9[%c15, %c0_18] : memref<320x128xf32, #tpu.memory_space<vmem>>, vector<256x128xf32>
    %35 = arith.truncf %34 : vector<256x128xf32> to vector<256x128xbf16>
    %c0_i32_19 = arith.constant 0 : i32
    %36 = vector.broadcast %c0_i32_19 : i32 to vector<256x1xi32>
    %37 = arith.cmpi ne, %32, %36 : vector<256x1xi32>
    %cst_20 = arith.constant 0.000000e+00 : bf16
    %38 = vector.broadcast %cst_20 : bf16 to vector<256x128xbf16>
    %39 = vector.shape_cast %37 : vector<256x1xi1> to vector<256x1xi1>
    %40 = vector.broadcast %39 : vector<256x1xi1> to vector<256x128xi1>
    %41 = arith.select %40, %35, %38 : vector<256x128xi1>, vector<256x128xbf16>
    %c0_21 = arith.constant 0 : index
    %c0_22 = arith.constant 0 : index
    %c0_23 = arith.constant 0 : index
    %42 = vector.load %arg5[%c0_21, %c0_22, %c0_23] : memref<9x128x128xbf16, #tpu.memory_space<vmem>>, vector<1x128x128xbf16>
    %43 = vector.shape_cast %42 : vector<1x128x128xbf16> to vector<128x128xbf16>
    %cst_24 = arith.constant dense<0.000000e+00> : vector<256x128xf32>
    %44 = tpu.matmul %41, %43, %cst_24 {dimension_numbers = #tpu.dot_dimension_numbers<[1], [0], [0], [1], [0, 0, 1, 1], [], []>} : vector<256x128xbf16>, vector<128x128xbf16>, vector<256x128xf32> -> vector<256x128xf32>
    %45 = arith.addf %33, %44 : vector<256x128xf32>
    %c16 = arith.constant 16 : index
    %c0_25 = arith.constant 0 : index
    %46 = vector.load %arg9[%c16, %c0_25] : memref<320x128xf32, #tpu.memory_space<vmem>>, vector<256x128xf32>
    %47 = arith.truncf %46 : vector<256x128xf32> to vector<256x128xbf16>
    %c1 = arith.constant 1 : index
    %c0_26 = arith.constant 0 : index
    %c0_27 = arith.constant 0 : index
    %48 = vector.load %arg5[%c1, %c0_26, %c0_27] : memref<9x128x128xbf16, #tpu.memory_space<vmem>>, vector<1x128x128xbf16>
    %49 = vector.shape_cast %48 : vector<1x128x128xbf16> to vector<128x128xbf16>
    %cst_28 = arith.constant dense<0.000000e+00> : vector<256x128xf32>
    %50 = tpu.matmul %47, %49, %cst_28 {dimension_numbers = #tpu.dot_dimension_numbers<[1], [0], [0], [1], [0, 0, 1, 1], [], []>} : vector<256x128xbf16>, vector<128x128xbf16>, vector<256x128xf32> -> vector<256x128xf32>
    %51 = arith.addf %45, %50 : vector<256x128xf32>
    %c17 = arith.constant 17 : index
    %c0_29 = arith.constant 0 : index
    %52 = vector.load %arg9[%c17, %c0_29] : memref<320x128xf32, #tpu.memory_space<vmem>>, vector<256x128xf32>
    %53 = arith.truncf %52 : vector<256x128xf32> to vector<256x128xbf16>
    %c15_i32 = arith.constant 15 : i32
    %54 = vector.broadcast %c15_i32 : i32 to vector<256x1xi32>
    %55 = arith.cmpi ne, %32, %54 : vector<256x1xi32>
    %cst_30 = arith.constant 0.000000e+00 : bf16
    %56 = vector.broadcast %cst_30 : bf16 to vector<256x128xbf16>
    %57 = vector.shape_cast %55 : vector<256x1xi1> to vector<256x1xi1>
    %58 = vector.broadcast %57 : vector<256x1xi1> to vector<256x128xi1>
    %59 = arith.select %58, %53, %56 : vector<256x128xi1>, vector<256x128xbf16>
    %c2 = arith.constant 2 : index
    %c0_31 = arith.constant 0 : index
    %c0_32 = arith.constant 0 : index
    %60 = vector.load %arg5[%c2, %c0_31, %c0_32] : memref<9x128x128xbf16, #tpu.memory_space<vmem>>, vector<1x128x128xbf16>
    %61 = vector.shape_cast %60 : vector<1x128x128xbf16> to vector<128x128xbf16>
    %cst_33 = arith.constant dense<0.000000e+00> : vector<256x128xf32>
    %62 = tpu.matmul %59, %61, %cst_33 {dimension_numbers = #tpu.dot_dimension_numbers<[1], [0], [0], [1], [0, 0, 1, 1], [], []>} : vector<256x128xbf16>, vector<128x128xbf16>, vector<256x128xf32> -> vector<256x128xf32>
    %63 = arith.addf %51, %62 : vector<256x128xf32>
    %c31 = arith.constant 31 : index
    %c0_34 = arith.constant 0 : index
    %64 = vector.load %arg9[%c31, %c0_34] : memref<320x128xf32, #tpu.memory_space<vmem>>, vector<256x128xf32>
    %65 = arith.truncf %64 : vector<256x128xf32> to vector<256x128xbf16>
    %c0_i32_35 = arith.constant 0 : i32
    %66 = vector.broadcast %c0_i32_35 : i32 to vector<256x1xi32>
    %67 = arith.cmpi ne, %32, %66 : vector<256x1xi32>
    %cst_36 = arith.constant 0.000000e+00 : bf16
    %68 = vector.broadcast %cst_36 : bf16 to vector<256x128xbf16>
    %69 = vector.shape_cast %67 : vector<256x1xi1> to vector<256x1xi1>
    %70 = vector.broadcast %69 : vector<256x1xi1> to vector<256x128xi1>
    %71 = arith.select %70, %65, %68 : vector<256x128xi1>, vector<256x128xbf16>
    %c3 = arith.constant 3 : index
    %c0_37 = arith.constant 0 : index
    %c0_38 = arith.constant 0 : index
    %72 = vector.load %arg5[%c3, %c0_37, %c0_38] : memref<9x128x128xbf16, #tpu.memory_space<vmem>>, vector<1x128x128xbf16>
    %73 = vector.shape_cast %72 : vector<1x128x128xbf16> to vector<128x128xbf16>
    %cst_39 = arith.constant dense<0.000000e+00> : vector<256x128xf32>
    %74 = tpu.matmul %71, %73, %cst_39 {dimension_numbers = #tpu.dot_dimension_numbers<[1], [0], [0], [1], [0, 0, 1, 1], [], []>} : vector<256x128xbf16>, vector<128x128xbf16>, vector<256x128xf32> -> vector<256x128xf32>
    %75 = arith.addf %63, %74 : vector<256x128xf32>
    %c32_40 = arith.constant 32 : index
    %c0_41 = arith.constant 0 : index
    %76 = vector.load %arg9[%c32_40, %c0_41] : memref<320x128xf32, #tpu.memory_space<vmem>>, vector<256x128xf32>
    %77 = arith.truncf %76 : vector<256x128xf32> to vector<256x128xbf16>
    %c4 = arith.constant 4 : index
    %c0_42 = arith.constant 0 : index
    %c0_43 = arith.constant 0 : index
    %78 = vector.load %arg5[%c4, %c0_42, %c0_43] : memref<9x128x128xbf16, #tpu.memory_space<vmem>>, vector<1x128x128xbf16>
    %79 = vector.shape_cast %78 : vector<1x128x128xbf16> to vector<128x128xbf16>
    %cst_44 = arith.constant dense<0.000000e+00> : vector<256x128xf32>
    %80 = tpu.matmul %77, %79, %cst_44 {dimension_numbers = #tpu.dot_dimension_numbers<[1], [0], [0], [1], [0, 0, 1, 1], [], []>} : vector<256x128xbf16>, vector<128x128xbf16>, vector<256x128xf32> -> vector<256x128xf32>
    %81 = arith.addf %75, %80 : vector<256x128xf32>
    %c33 = arith.constant 33 : index
    %c0_45 = arith.constant 0 : index
    %82 = vector.load %arg9[%c33, %c0_45] : memref<320x128xf32, #tpu.memory_space<vmem>>, vector<256x128xf32>
    %83 = arith.truncf %82 : vector<256x128xf32> to vector<256x128xbf16>
    %c15_i32_46 = arith.constant 15 : i32
    %84 = vector.broadcast %c15_i32_46 : i32 to vector<256x1xi32>
    %85 = arith.cmpi ne, %32, %84 : vector<256x1xi32>
    %cst_47 = arith.constant 0.000000e+00 : bf16
    %86 = vector.broadcast %cst_47 : bf16 to vector<256x128xbf16>
    %87 = vector.shape_cast %85 : vector<256x1xi1> to vector<256x1xi1>
    %88 = vector.broadcast %87 : vector<256x1xi1> to vector<256x128xi1>
    %89 = arith.select %88, %83, %86 : vector<256x128xi1>, vector<256x128xbf16>
    %c5 = arith.constant 5 : index
    %c0_48 = arith.constant 0 : index
    %c0_49 = arith.constant 0 : index
    %90 = vector.load %arg5[%c5, %c0_48, %c0_49] : memref<9x128x128xbf16, #tpu.memory_space<vmem>>, vector<1x128x128xbf16>
    %91 = vector.shape_cast %90 : vector<1x128x128xbf16> to vector<128x128xbf16>
    %cst_50 = arith.constant dense<0.000000e+00> : vector<256x128xf32>
    %92 = tpu.matmul %89, %91, %cst_50 {dimension_numbers = #tpu.dot_dimension_numbers<[1], [0], [0], [1], [0, 0, 1, 1], [], []>} : vector<256x128xbf16>, vector<128x128xbf16>, vector<256x128xf32> -> vector<256x128xf32>
    %93 = arith.addf %81, %92 : vector<256x128xf32>
    %c47 = arith.constant 47 : index
    %c0_51 = arith.constant 0 : index
    %94 = vector.load %arg9[%c47, %c0_51] : memref<320x128xf32, #tpu.memory_space<vmem>>, vector<256x128xf32>
    %95 = arith.truncf %94 : vector<256x128xf32> to vector<256x128xbf16>
    %c0_i32_52 = arith.constant 0 : i32
    %96 = vector.broadcast %c0_i32_52 : i32 to vector<256x1xi32>
    %97 = arith.cmpi ne, %32, %96 : vector<256x1xi32>
    %cst_53 = arith.constant 0.000000e+00 : bf16
    %98 = vector.broadcast %cst_53 : bf16 to vector<256x128xbf16>
    %99 = vector.shape_cast %97 : vector<256x1xi1> to vector<256x1xi1>
    %100 = vector.broadcast %99 : vector<256x1xi1> to vector<256x128xi1>
    %101 = arith.select %100, %95, %98 : vector<256x128xi1>, vector<256x128xbf16>
    %c6 = arith.constant 6 : index
    %c0_54 = arith.constant 0 : index
    %c0_55 = arith.constant 0 : index
    %102 = vector.load %arg5[%c6, %c0_54, %c0_55] : memref<9x128x128xbf16, #tpu.memory_space<vmem>>, vector<1x128x128xbf16>
    %103 = vector.shape_cast %102 : vector<1x128x128xbf16> to vector<128x128xbf16>
    %cst_56 = arith.constant dense<0.000000e+00> : vector<256x128xf32>
    %104 = tpu.matmul %101, %103, %cst_56 {dimension_numbers = #tpu.dot_dimension_numbers<[1], [0], [0], [1], [0, 0, 1, 1], [], []>} : vector<256x128xbf16>, vector<128x128xbf16>, vector<256x128xf32> -> vector<256x128xf32>
    %105 = arith.addf %93, %104 : vector<256x128xf32>
    %c48 = arith.constant 48 : index
    %c0_57 = arith.constant 0 : index
    %106 = vector.load %arg9[%c48, %c0_57] : memref<320x128xf32, #tpu.memory_space<vmem>>, vector<256x128xf32>
    %107 = arith.truncf %106 : vector<256x128xf32> to vector<256x128xbf16>
    %c7 = arith.constant 7 : index
    %c0_58 = arith.constant 0 : index
    %c0_59 = arith.constant 0 : index
    %108 = vector.load %arg5[%c7, %c0_58, %c0_59] : memref<9x128x128xbf16, #tpu.memory_space<vmem>>, vector<1x128x128xbf16>
    %109 = vector.shape_cast %108 : vector<1x128x128xbf16> to vector<128x128xbf16>
    %cst_60 = arith.constant dense<0.000000e+00> : vector<256x128xf32>
    %110 = tpu.matmul %107, %109, %cst_60 {dimension_numbers = #tpu.dot_dimension_numbers<[1], [0], [0], [1], [0, 0, 1, 1], [], []>} : vector<256x128xbf16>, vector<128x128xbf16>, vector<256x128xf32> -> vector<256x128xf32>
    %111 = arith.addf %105, %110 : vector<256x128xf32>
    %c49 = arith.constant 49 : index
    %c0_61 = arith.constant 0 : index
    %112 = vector.load %arg9[%c49, %c0_61] : memref<320x128xf32, #tpu.memory_space<vmem>>, vector<256x128xf32>
    %113 = arith.truncf %112 : vector<256x128xf32> to vector<256x128xbf16>
    %c15_i32_62 = arith.constant 15 : i32
    %114 = vector.broadcast %c15_i32_62 : i32 to vector<256x1xi32>
    %115 = arith.cmpi ne, %32, %114 : vector<256x1xi32>
    %cst_63 = arith.constant 0.000000e+00 : bf16
    %116 = vector.broadcast %cst_63 : bf16 to vector<256x128xbf16>
    %117 = vector.shape_cast %115 : vector<256x1xi1> to vector<256x1xi1>
    %118 = vector.broadcast %117 : vector<256x1xi1> to vector<256x128xi1>
    %119 = arith.select %118, %113, %116 : vector<256x128xi1>, vector<256x128xbf16>
    %c8 = arith.constant 8 : index
    %c0_64 = arith.constant 0 : index
    %c0_65 = arith.constant 0 : index
    %120 = vector.load %arg5[%c8, %c0_64, %c0_65] : memref<9x128x128xbf16, #tpu.memory_space<vmem>>, vector<1x128x128xbf16>
    %121 = vector.shape_cast %120 : vector<1x128x128xbf16> to vector<128x128xbf16>
    %cst_66 = arith.constant dense<0.000000e+00> : vector<256x128xf32>
    %122 = tpu.matmul %119, %121, %cst_66 {dimension_numbers = #tpu.dot_dimension_numbers<[1], [0], [0], [1], [0, 0, 1, 1], [], []>} : vector<256x128xbf16>, vector<128x128xbf16>, vector<256x128xf32> -> vector<256x128xf32>
    %123 = arith.addf %111, %122 : vector<256x128xf32>
    %c0_67 = arith.constant 0 : index
    %c0_68 = arith.constant 0 : index
    %124 = vector.load %arg6[%c0_67, %c0_68] : memref<1x128xf32, #tpu.memory_space<vmem>>, vector<1x128xf32>
    %125 = vector.broadcast %124 : vector<1x128xf32> to vector<256x128xf32>
    %126 = arith.mulf %123, %125 : vector<256x128xf32>
    %c0_69 = arith.constant 0 : index
    %c0_70 = arith.constant 0 : index
    %127 = vector.load %arg7[%c0_69, %c0_70] : memref<1x128xf32, #tpu.memory_space<vmem>>, vector<1x128xf32>
    %128 = vector.broadcast %127 : vector<1x128xf32> to vector<256x128xf32>
    %129 = arith.addf %126, %128 : vector<256x128xf32>
    %cst_71 = arith.constant 0.000000e+00 : f32
    %130 = vector.broadcast %cst_71 : f32 to vector<256x128xf32>
    %131 = arith.maximumf %129, %130 : vector<256x128xf32>
    %132 = arith.truncf %131 : vector<256x128xf32> to vector<256x128xbf16>
    %c0_72 = arith.constant 0 : index
    %c0_73 = arith.constant 0 : index
    %c0_74 = arith.constant 0 : index
    %133 = vector.load %arg8[%c0_72, %c0_73, %c0_74] : memref<1x256x128xbf16, #tpu.memory_space<vmem>>, vector<1x256x128xbf16>
    %134 = vector.shape_cast %133 : vector<1x256x128xbf16> to vector<256x128xbf16>
    %135 = vector.shape_cast %132 : vector<256x128xbf16> to vector<1x256x128xbf16>
    tpu.vector_store %arg8[%c0_72, %c0_73, %c0_74], %135 {strides = array<i32>} : memref<1x256x128xbf16, #tpu.memory_space<vmem>>, vector<1x256x128xbf16>,
    return
  }
  func.func @transform_0(%arg0: i32) -> (i32, i32, i32) {
    %c0_i32 = arith.constant 0 : i32
    %c0_i32_0 = arith.constant 0 : i32
    %c0_i32_1 = arith.constant 0 : i32
    return %arg0, %c0_i32, %c0_i32_0 : i32, i32, i32
  }
  func.func @transform_1(%arg0: i32) -> (i32, i32) {
    %c0_i32 = arith.constant 0 : i32
    %c0_i32_0 = arith.constant 0 : i32
    %c0_i32_1 = arith.constant 0 : i32
    return %c0_i32, %c0_i32_0 : i32, i32
  }
  func.func @transform_2(%arg0: i32) -> (i32, i32) {
    %c0_i32 = arith.constant 0 : i32
    %c0_i32_0 = arith.constant 0 : i32
    %c0_i32_1 = arith.constant 0 : i32
    return %c0_i32, %c0_i32_0 : i32, i32
  }
  func.func @transform_3(%arg0: i32) -> (i32, i32) {
    %c0_i32 = arith.constant 0 : i32
    %c0_i32_0 = arith.constant 0 : i32
    %c0_i32_1 = arith.constant 0 : i32
    return %c0_i32, %c0_i32_0 : i32, i32
  }
  func.func @transform_4(%arg0: i32) -> (i32, i32, i32) {
    %c0_i32 = arith.constant 0 : i32
    %c0_i32_0 = arith.constant 0 : i32
    %c0_i32_1 = arith.constant 0 : i32
    %c0_i32_2 = arith.constant 0 : i32
    return %c0_i32, %c0_i32_0, %c0_i32_1 : i32, i32, i32
  }
  func.func @transform_5(%arg0: i32) -> (i32, i32) {
    %c0_i32 = arith.constant 0 : i32
    %c0_i32_0 = arith.constant 0 : i32
    %c0_i32_1 = arith.constant 0 : i32
    return %c0_i32, %c0_i32_0 : i32, i32
  }
  func.func @transform_6(%arg0: i32) -> (i32, i32) {
    %c0_i32 = arith.constant 0 : i32
    %c0_i32_0 = arith.constant 0 : i32
    %c0_i32_1 = arith.constant 0 : i32
    return %c0_i32, %c0_i32_0 : i32, i32
  }
  func.func @transform_7(%arg0: i32) -> (i32, i32, i32) {
    %c0_i32 = arith.constant 0 : i32
    %c0_i32_0 = arith.constant 0 : i32
    %c0_i32_1 = arith.constant 0 : i32
    return %arg0, %c0_i32, %c0_i32_0 : i32, i32, i32
  }
}

module attributes {stable_mosaic.version = 11 : i64} {
  func.func @_tail_dual_kernel(%arg0: i32, %arg1: memref<128x512xbf16, #tpu.memory_space<vmem>>, %arg2: memref<512x128xbf16, #tpu.memory_space<vmem>>, %arg3: memref<1x128xf32, #tpu.memory_space<vmem>>, %arg4: memref<128x512xbf16, #tpu.memory_space<vmem>>, %arg5: memref<512x128xbf16, #tpu.memory_space<vmem>>, %arg6: memref<1x128xf32, #tpu.memory_space<vmem>>, %arg7: memref<1x128xf32, #tpu.memory_space<vmem>>, %arg8: memref<128x128xbf16, #tpu.memory_space<vmem>>) attributes {dimension_semantics = [#tpu.dimension_semantics<parallel>], iteration_bounds = array<i64: 1>, scalar_prefetch = 0 : i64, scratch_operands = 0 : i64, tpu.core_type = #tpu.core_type<tc>, window_params = [{transform_indices = @transform_0, window_bounds = array<i64: 128, 512>}, {pipeline_mode = #tpu.pipeline_mode<synchronous>, transform_indices = @transform_1, window_bounds = array<i64: 512, 128>}, {pipeline_mode = #tpu.pipeline_mode<synchronous>, transform_indices = @transform_2, window_bounds = array<i64: 1, 128>}, {transform_indices = @transform_3, window_bounds = array<i64: 128, 512>}, {pipeline_mode = #tpu.pipeline_mode<synchronous>, transform_indices = @transform_4, window_bounds = array<i64: 512, 128>}, {pipeline_mode = #tpu.pipeline_mode<synchronous>, transform_indices = @transform_5, window_bounds = array<i64: 1, 128>}, {pipeline_mode = #tpu.pipeline_mode<synchronous>, transform_indices = @transform_6, window_bounds = array<i64: 1, 128>}, {transform_indices = @transform_7, window_bounds = array<i64: 128, 128>}]} {
    %c0 = arith.constant 0 : index
    %c0_0 = arith.constant 0 : index
    %0 = vector.load %arg1[%c0, %c0_0] : memref<128x512xbf16, #tpu.memory_space<vmem>>, vector<128x512xbf16>
    %c0_1 = arith.constant 0 : index
    %c0_2 = arith.constant 0 : index
    %1 = vector.load %arg2[%c0_1, %c0_2] : memref<512x128xbf16, #tpu.memory_space<vmem>>, vector<512x128xbf16>
    %cst = arith.constant dense<0.000000e+00> : vector<128x128xf32>
    %2 = tpu.matmul %0, %1, %cst {dimension_numbers = #tpu.dot_dimension_numbers<[1], [0], [0], [1], [0, 0, 1, 1], [], []>} : vector<128x512xbf16>, vector<512x128xbf16>, vector<128x128xf32> -> vector<128x128xf32>
    %c0_3 = arith.constant 0 : index
    %c0_4 = arith.constant 0 : index
    %3 = vector.load %arg4[%c0_3, %c0_4] : memref<128x512xbf16, #tpu.memory_space<vmem>>, vector<128x512xbf16>
    %c0_5 = arith.constant 0 : index
    %c0_6 = arith.constant 0 : index
    %4 = vector.load %arg5[%c0_5, %c0_6] : memref<512x128xbf16, #tpu.memory_space<vmem>>, vector<512x128xbf16>
    %cst_7 = arith.constant dense<0.000000e+00> : vector<128x128xf32>
    %5 = tpu.matmul %3, %4, %cst_7 {dimension_numbers = #tpu.dot_dimension_numbers<[1], [0], [0], [1], [0, 0, 1, 1], [], []>} : vector<128x512xbf16>, vector<512x128xbf16>, vector<128x128xf32> -> vector<128x128xf32>
    %c0_8 = arith.constant 0 : index
    %c0_9 = arith.constant 0 : index
    %6 = vector.load %arg3[%c0_8, %c0_9] : memref<1x128xf32, #tpu.memory_space<vmem>>, vector<1x128xf32>
    %7 = vector.broadcast %6 : vector<1x128xf32> to vector<128x128xf32>
    %8 = arith.mulf %2, %7 : vector<128x128xf32>
    %c0_10 = arith.constant 0 : index
    %c0_11 = arith.constant 0 : index
    %9 = vector.load %arg6[%c0_10, %c0_11] : memref<1x128xf32, #tpu.memory_space<vmem>>, vector<1x128xf32>
    %10 = vector.broadcast %9 : vector<1x128xf32> to vector<128x128xf32>
    %11 = arith.mulf %5, %10 : vector<128x128xf32>
    %12 = arith.addf %8, %11 : vector<128x128xf32>
    %c0_12 = arith.constant 0 : index
    %c0_13 = arith.constant 0 : index
    %13 = vector.load %arg7[%c0_12, %c0_13] : memref<1x128xf32, #tpu.memory_space<vmem>>, vector<1x128xf32>
    %14 = vector.broadcast %13 : vector<1x128xf32> to vector<128x128xf32>
    %15 = arith.addf %12, %14 : vector<128x128xf32>
    %cst_14 = arith.constant 0.000000e+00 : f32
    %16 = vector.broadcast %cst_14 : f32 to vector<128x128xf32>
    %17 = arith.maximumf %15, %16 : vector<128x128xf32>
    %18 = arith.truncf %17 : vector<128x128xf32> to vector<128x128xbf16>
    %c0_15 = arith.constant 0 : index
    %c0_16 = arith.constant 0 : index
    %19 = vector.load %arg8[%c0_15, %c0_16] : memref<128x128xbf16, #tpu.memory_space<vmem>>, vector<128x128xbf16>
    tpu.vector_store %arg8[%c0_15, %c0_16], %18 {strides = array<i32>} : memref<128x128xbf16, #tpu.memory_space<vmem>>, vector<128x128xbf16>,
    return
  }
  func.func @transform_0(%arg0: i32) -> (i32, i32) {
    %c0_i32 = arith.constant 0 : i32
    %c0_i32_0 = arith.constant 0 : i32
    return %arg0, %c0_i32 : i32, i32
  }
  func.func @transform_1(%arg0: i32) -> (i32, i32) {
    %c0_i32 = arith.constant 0 : i32
    %c0_i32_0 = arith.constant 0 : i32
    %c0_i32_1 = arith.constant 0 : i32
    return %c0_i32, %c0_i32_0 : i32, i32
  }
  func.func @transform_2(%arg0: i32) -> (i32, i32) {
    %c0_i32 = arith.constant 0 : i32
    %c0_i32_0 = arith.constant 0 : i32
    %c0_i32_1 = arith.constant 0 : i32
    return %c0_i32, %c0_i32_0 : i32, i32
  }
  func.func @transform_3(%arg0: i32) -> (i32, i32) {
    %c0_i32 = arith.constant 0 : i32
    %c0_i32_0 = arith.constant 0 : i32
    return %arg0, %c0_i32 : i32, i32
  }
  func.func @transform_4(%arg0: i32) -> (i32, i32) {
    %c0_i32 = arith.constant 0 : i32
    %c0_i32_0 = arith.constant 0 : i32
    %c0_i32_1 = arith.constant 0 : i32
    return %c0_i32, %c0_i32_0 : i32, i32
  }
  func.func @transform_5(%arg0: i32) -> (i32, i32) {
    %c0_i32 = arith.constant 0 : i32
    %c0_i32_0 = arith.constant 0 : i32
    %c0_i32_1 = arith.constant 0 : i32
    return %c0_i32, %c0_i32_0 : i32, i32
  }
  func.func @transform_6(%arg0: i32) -> (i32, i32) {
    %c0_i32 = arith.constant 0 : i32
    %c0_i32_0 = arith.constant 0 : i32
    %c0_i32_1 = arith.constant 0 : i32
    return %c0_i32, %c0_i32_0 : i32, i32
  }
  func.func @transform_7(%arg0: i32) -> (i32, i32) {
    %c0_i32 = arith.constant 0 : i32
    %c0_i32_0 = arith.constant 0 : i32
    return %arg0, %c0_i32 : i32, i32
  }
}

</mosaic_0001>

<bundles_post_ra>
// kernel: tpu_custom_call.1
= control target key start
LH: loop header
LB: loop body
LE: loop exit
PB: predicated region body
PF: predicated region fallthrough
CT: control target
= control target key end

     0   :  { %7 = vsyncpa [#allocation3], 0  ;;  %s690_s0 = inlined_call_operand.hbm [shape: f32[16,128], index: 0, kind: input, shape index: {}]   ;;  %s691_s1 = inlined_call_operand.hbm [shape: f32[8,128], index: 1, kind: input, shape index: {}]   ;;  %s692_s2 = inlined_call_operand.hbm [shape: f32[16,128], index: 2, kind: output, shape index: {}]  }
   0x1   :  { %9 = vsyncpa [#allocation3 + $0x1], 0 }
   0x2   :  { %10 = vsyncpa [#allocation6], 0 }
   0x3   :  { %11 = vsyncpa [#allocation4], 0 }
   0x4   :  { %13 = vsyncpa [#allocation4 + $0x1], 0  ;;  %s489_s9 = smov 0   ;;  %s491_s10 = smov 0  }
   0x5   :  { %s493_s11 = smov 0   ;;  %s495_s12 = smov 0  }
   0x6 LB: > { %s510_s13 = sadd.s32 4294967295, %s469_s12   ;;  %s270_s14 = sadd.s32 4294967294, %s469_s12   ;;  %s469_s12 = sphi %s495_s12, %s716_s12   ;;  %s465_s11 = sphi %s493_s11, %s715_s11   ;;  %s461_s10 = sphi %s491_s10, %s714_s10   ;;  %s457_s9 = sphi %s489_s9, %s713_s9  }
   0x7   : > { %p39_p0 = scmp.ne.s32.totalorder %s461_s10, %s457_s9  ;;  %p693_p1 = scmp.eq.s32.totalorder %s510_s13, 0 }
   0x8   : > { %p90_p3 = scmp.eq.s32.totalorder %s270_s14, 1  ;;  %p271_p5 = scmp.ge.s32.totalorder %s469_s12, 1 }
   0x9   : > { %p519_p4 = por %p693_p1, %p39_p0  ;;  %p97_p7 = scmp.lt.s32.totalorder %s469_s12, 3 }
   0xa   : > { %p524_p6 = por %p90_p3, %p39_p0  ;;  %s471_s18 = smov [#allocation5]  }
   0xb   : > { %s696_s15 = scalar_select %p519_p4, 1, 0 }
   0xc   : > { %s697_s16 = scalar_select %p524_p6, 1, 0 }
   0xd   : > { %p529_p8 = pnand %p271_p5, %p97_p7  ;;  %s110_s19 = sshll.u32 %s471_s18, 4  ;;  %s111_s19 = int_to_ptr.vmem [resolvable:$true] %s110_s19 }
   0xe   : > { %s537_s20 = sadd.s32 1, %s469_s12   ;;  %s26_s24 = sadd.s32 1, %s465_s11 }
   0xf   : > { %s698_s17 = scalar_select %p529_p8, 1, 0 }
  0x10   : > { %p292_p10 = pneg %p529_p8  ;;  %s23_s22 = ssub.s32 %s469_s12, %s537_s20 }
  0x11   : > { %p547_p12 = scmp.eq.s32.totalorder %s23_s22, 0  ;;  %s341_s27 = scalar_lea.hbm %s691_s1, 128 }
  0x12   : > { %p541_p11 = pnand %p292_p10, %p693_p1  ;;  %p342_p0 = scmp.ne.s32.totalorder %s691_s1, %s341_s27 }
  0x13   : > { %s700_s23 = scalar_select %p547_p12, 1, 0 }
  0x14   : > { %p343_p3 = pneg %p541_p11  ;;  %p348_p10 = scmp.lt.u32.totalorder %s341_s27, %s691_s1 }
  0x16   : > { %p344_p5 = pnand %p343_p3, %p342_p0 }
  0x18   : > { %p345_p7 = pneg %p344_p5 }
  0x1a   : > { %p350_p9 = pnand %p348_p10, %p345_p7 }
  0x1c   : > { %353 = shalt.err (!%p350_p9)
}
  0x1d   : > { %s354_s4 = scalar_lea.vmem %s111_s19, 128  ;;  %p362_p6 = scmp.lt.s32.totalorder %s111_s19, %s111_s19 }
  0x1e   : > { %p355_p1 = scmp.ne.s32.totalorder %s111_s19, %s354_s4  ;;  %p363_p4 = scmp.lt.s32.totalorder %s354_s4, %s354_s4 }
  0x20   : > { %p357_p2 = pnand %p355_p1, %p343_p3  ;;  %p364_p8 = por %p363_p4, %p362_p6 }
  0x22   : > { %p358_p13 = pneg %p357_p2 }
  0x24   : > { %p365_p12 = pnand %p364_p8, %p358_p13 }
  0x26   : > { %368 = shalt.err (!%p365_p12)
}
  0x27   : > { %295 = dma.hbm_to_vmem [thread:$0]  (!%p541_p11), %s691_s1, 128, %s111_s19, [#allocation6]  }
  0x28   : > { %p701_p1 = scmp.ne.s32.totalorder %s700_s23, 0  ;;  %p34_p2 = scmp.eq.s32.totalorder %s469_s12, 0 }
  0x29   : > { %p702_p4 = scmp.ne.s32.totalorder %s465_s11, %s461_s10  ;;  %p703_p6 = scmp.eq.s32.totalorder %s510_s13, 1 }
  0x2a   : > { %s573_s7 = scalar_select %p701_p1, %s465_s11, %s26_s24  }
  0x2b   : > { %p581_p8 = por %p703_p6, %p702_p4  ;;  %p305_p9 = scmp.lt.s32.totalorder %s469_s12, 2 }
  0x2c   : > { %s121_s14 = sand.u32 1, %s465_s11   ;;  %p705_p12 = pmov %p702_p4 }
  0x2d   : > { %s274_s18 = sshll.u32 %s121_s14, 3  ;;  %s275_s21 = sshll.u32 %s469_s12, 7 }
  0x2e   : > { %p35_p13 = por %p34_p2, %p705_p12  ;;  %s594_s19 = scalar_lea.hbm %s690_s0, %s275_s21 }
  0x2f   : > { %s125_s23 = scalar_lea.vmem [#allocation2], %s274_s18  ;;  %s122_s27 = scalar_lea.sflag [#allocation3], %s121_s14 }
  0x30   : > { %s132_s24 = sshll.u32 %s125_s23, 4  ;;  %p596_p11 = pnand %p305_p9, %p35_p13  ;;  %s600_s24 = int_to_ptr.vmem [resolvable:$true] %s132_s24 }
  0x31   : > { %s369_s28 = scalar_lea.hbm %s594_s19, 128  ;;  %s374_s3 = scalar_lea.hbm %s690_s0, 256 }
  0x32   : > { %p370_p0 = scmp.ne.s32.totalorder %s594_s19, %s369_s28  ;;  %p371_p3 = pneg %p596_p11 }
  0x33   : > { %p375_p10 = scmp.lt.u32.totalorder %s594_s19, %s690_s0  ;;  %p376_p1 = scmp.lt.u32.totalorder %s374_s3, %s369_s28 }
  0x34   : > { %p372_p5 = pnand %p371_p3, %p370_p0  ;;  %p378_p4 = scmp.lt.u32.totalorder %s369_s28, %s594_s19 }
  0x35   : > { %p377_p2 = por %p376_p1, %p375_p10 }
  0x36   : > { %p373_p7 = pneg %p372_p5 }
  0x37   : > { %p379_p6 = por %p378_p4, %p377_p2 }
  0x39   : > { %p380_p9 = pnand %p379_p6, %p373_p7 }
  0x3b   : > { %383 = shalt.err (!%p380_p9)
}
  0x3c   : > { %s384_s6 = scalar_lea.vmem %s600_s24, 128  ;;  %s472_s14 = smov [#allocation2]  }
  0x3d   : > { %p385_p12 = scmp.ne.s32.totalorder %s600_s24, %s384_s6  ;;  %s389_s18 = sshll.u32 %s472_s14, 4  ;;  %s390_s18 = int_to_ptr.vmem [resolvable:$false] %s389_s18 }
  0x3e   : > { %s391_s21 = scalar_lea.vmem %s390_s18, 256  ;;  %p392_p5 = scmp.lt.s32.totalorder %s600_s24, %s390_s18 }
  0x3f   : > { %p387_p13 = pnand %p385_p12, %p371_p3  ;;  %p393_p10 = scmp.lt.s32.totalorder %s391_s21, %s384_s6 }
  0x41   : > { %p388_p0 = pneg %p387_p13  ;;  %p394_p1 = por %p393_p10, %p392_p5 }
  0x43   : > { %p395_p2 = pnand %p394_p1, %p388_p0 }
  0x45   : > { %398 = shalt.err (!%p395_p2)
}
  0x46   : > { %299 = dma.hbm_to_vmem [thread:$0]  (!%p596_p11), %s594_s19, 128, %s600_s24, %s122_s27  }
  0x47   : > { %p707_p7 = scmp.ne.s32.totalorder %s698_s17, 0 }
  0x48   : > { %s630_s22 = sand.u32 (!%p707_p7), 1, %s461_s10   ;;  %p708_p3 = scmp.ne.s32.totalorder (!%p707_p7), %s696_s15, 0 }
  0x49   : > { %141 = sbr.rel (%p707_p7) target bundleno = 109 (0x6d), region = 28  ;;  %s277_s25 = sshll.u32 (!%p707_p7), %s630_s22, 3 }
  0x4a   : > { %s144_s23 = scalar_lea.sflag (!%p707_p7), [#allocation3], %s630_s22  ;;  %s147_s28 = scalar_lea.vmem (!%p707_p7), [#allocation2], %s277_s25 }
  0x50   : > { %444 = dma.done.wait (%p708_p3), %s144_s23, 128  }
  0x51   : > { %446 = vsyncadd (%p708_p3), %s144_s23, 4294967168  ;;  %p709_p4 = scmp.eq.s32.totalorder %s510_s13, 0 }
  0x53   : > { %448 = dma.done.wait (%p709_p4), [#allocation6], 128   ;;  %p710_p11 = pmov %p709_p4 }
  0x54   : > { %s171_s17 = scalar_lea.vmem [#allocation7], %s277_s25  ;;  %s281_s24 = sshll.u32 %s510_s13, 7  ;;  %v172_v0 = vld [vmem:[%s147_s28] sm:$0xff]  ;;  %v173_v1 = vld [vmem:[#allocation5] sm:$0xff] }
  0x55   : > { %450 = vsyncadd (%p710_p11), [#allocation6], 4294967168  ;;  %s190_s19 = sshll.u32 %s171_s17, 4  ;;  %v174_v2 = vadd.f32 %v173_v1, %v172_v0  ;;  %s648_s27 = scalar_lea.hbm %s692_s2, %s281_s24  ;;  %s643_s19 = int_to_ptr.vmem [resolvable:$true] %s190_s19 }
  0x56   : > { %s177_s29 = scalar_lea.sflag [#allocation4], %s630_s22  ;;  %s399_s30 = scalar_lea.vmem %s643_s19, 128 }
  0x57   : > { %175 = vst [vmem:[%s171_s17] sm:$0xff] %v174_v2  ;;  %p400_p6 = scmp.ne.s32.totalorder %s643_s19, %s399_s30  ;;  %s473_s13 = smov [#allocation7]  }
  0x58   : > { %s403_s3 = sshll.u32 %s473_s13, 4  ;;  %s404_s3 = int_to_ptr.vmem [resolvable:$false] %s403_s3 }
  0x59   : > { %p401_p9 = pnand %p400_p6, %p581_p8  ;;  %s405_s4 = scalar_lea.vmem %s404_s3, 256 }
  0x5a   : > { %p406_p13 = scmp.lt.s32.totalorder %s643_s19, %s404_s3  ;;  %p407_p0 = scmp.lt.s32.totalorder %s405_s4, %s399_s30 }
  0x5b   : > { %p402_p12 = pneg %p401_p9 }
  0x5c   : > { %p408_p5 = por %p407_p0, %p406_p13 }
  0x5e   : > { %p409_p10 = pnand %p408_p5, %p402_p12 }
  0x60   : > { %412 = shalt.err (!%p409_p10)
}
  0x61   : > { %s413_s5 = scalar_lea.hbm %s648_s27, 128  ;;  %s417_s18 = scalar_lea.hbm %s692_s2, 256 }
  0x62   : > { %p414_p1 = scmp.ne.s32.totalorder %s648_s27, %s413_s5  ;;  %p418_p3 = scmp.lt.u32.totalorder %s648_s27, %s692_s2 }
  0x63   : > { %p419_p4 = scmp.lt.u32.totalorder %s417_s18, %s413_s5  ;;  %p421_p6 = scmp.lt.u32.totalorder %s413_s5, %s648_s27 }
  0x64   : > { %p415_p2 = pnand %p414_p1, %p581_p8 }
  0x65   : > { %p420_p11 = por %p419_p4, %p418_p3 }
  0x66   : > { %p416_p7 = pneg %p415_p2 }
  0x67   : > { %p422_p9 = por %p421_p6, %p420_p11 }
  0x69   : > { %p423_p12 = pnand %p422_p9, %p416_p7 }
  0x6b   : > { %426 = shalt.err (!%p423_p12)
}
  0x6c   : > { %290 = dma.vmem_to_hbm [thread:$0]  (%p581_p8), %s643_s19, 128, %s648_s27, %s177_s29  }
  0x6d PF: > { %s202_s25 = sand.u32 1, %s457_s9   ;;  %p711_p13 = scmp.ne.s32.totalorder %s697_s16, 0 }
  0x6e   : > { %p712_p0 = scmp.ge.s32.totalorder %s469_s12, 2  ;;  %s203_s23 = scalar_lea.sflag [#allocation4], %s202_s25 }
  0x70   : > { %p301_p5 = pnand %p712_p0, %p711_p13 }
  0x72   : > { %452 = dma.done.wait (!%p301_p5), %s203_s23, 128  }
  0x73   : > { %454 = vsyncadd (!%p301_p5), %s203_s23, 4294967168  ;;  %p16_p10 = scmp.ge.s32.totalorder %s537_s20, 4   ;;  %s713_s9 = smov %s461_s10 }
  0x74   : > { %s714_s10 = smov %s465_s11  ;;  %s715_s11 = smov %s573_s7 }
  0x75   : > { %s716_s12 = smov %s537_s20  ;;  %18 = sbr.rel (!%p16_p10) target bundleno = 6 (0x6), region = 77 }
  0x7c   :  { %208 = vsyncpa [#allocation3], 1 }
  0x7d   :  { %210 = vsyncpa [#allocation3 + $0x1], 1 }
  0x7e   :  { %211 = vsyncpa [#allocation6], 1 }
  0x7f   :  { %212 = vsyncpa [#allocation4], 1 }
  0x80   :  { %214 = vsyncpa [#allocation4 + $0x1], 1 }

// kernel: tpu_custom_call.1
= control target key start
LH: loop header
LB: loop body
LE: loop exit
PB: predicated region body
PF: predicated region fallthrough
CT: control target
= control target key end

     0   :  { %6 = vsyncpa [#allocation3], 0  ;;  %s130_s0 = inlined_call_operand.hbm [shape: f32[16,128], index: 0, kind: input, shape index: {}]   ;;  %s131_s1 = inlined_call_operand.hbm [shape: f32[8,128], index: 1, kind: output, shape index: {}]  }
   0x1   :  { %7 = vsyncpa [#allocation4], 0  ;;  %s92_s6 = smov [#allocation2]   ;;  %s44_s10 = scalar_lea.hbm %s130_s0, 256 }
   0x2   :  { %s13_s7 = sshll.u32 %s92_s6, 4  ;;  %p45_p0 = scmp.ne.s32.totalorder %s130_s0, %s44_s10  ;;  %s14_s7 = int_to_ptr.vmem [resolvable:$true] %s13_s7 }
   0x3   :  { %p48_p1 = scmp.lt.u32.totalorder %s44_s10, %s130_s0 }
   0x5   :  { %p50_p2 = pnand %p48_p1, %p45_p0 }
   0x7   :  { %53 = shalt.err (!%p50_p2)
}
   0x8   :  { %s54_s15 = scalar_lea.vmem %s14_s7, 256  ;;  %p59_p4 = scmp.lt.s32.totalorder %s14_s7, %s14_s7 }
   0x9   :  { %p55_p3 = scmp.ne.s32.totalorder %s14_s7, %s54_s15  ;;  %p60_p5 = scmp.lt.s32.totalorder %s54_s15, %s54_s15 }
   0xb   :  { %p61_p6 = por %p60_p5, %p59_p4 }
   0xd   :  { %p62_p7 = pnand %p61_p6, %p55_p3 }
   0xf   :  { %65 = shalt.err (!%p62_p7)
}
  0x10   :  { %s93_s16 = smov 128   ;;  %s94_s17 = smov 8  }
  0x11   :  { %19 = dma.hbm_to_vmem [thread:$0]  %s130_s0, 256, %s14_s7, [#allocation3], %s93_s16, %s93_s16, %s94_s17  }
  0x12   :  { %88 = dma.done.wait [#allocation3], 256  }
  0x13   :  { %89 = vsyncadd [#allocation3], 4294967040  ;;  %s95_s20 = smov [#allocation5]   ;;  %v23_v0 = vld [vmem:[#allocation2] ss:$2 sm:$0xff] }
  0x14   :  { %s31_s21 = sshll.u32 %s95_s20, 4  ;;  %24 = vst [vmem:[#allocation5] sm:$0xff] %v23_v0  ;;  %s32_s21 = int_to_ptr.vmem [resolvable:$true] %s31_s21 }
  0x15   :  { %s66_s22 = scalar_lea.vmem %s32_s21, 128  ;;  %p71_p9 = scmp.lt.s32.totalorder %s32_s21, %s32_s21 }
  0x16   :  { %p67_p8 = scmp.ne.s32.totalorder %s32_s21, %s66_s22  ;;  %p72_p10 = scmp.lt.s32.totalorder %s66_s22, %s66_s22 }
  0x18   :  { %p73_p11 = por %p72_p10, %p71_p9 }
  0x1a   :  { %p74_p12 = pnand %p73_p11, %p67_p8 }
  0x1c   :  { %77 = shalt.err (!%p74_p12)
}
  0x1d   :  { %s78_s25 = scalar_lea.hbm %s131_s1, 128 }
  0x1e   :  { %p79_p13 = scmp.ne.s32.totalorder %s131_s1, %s78_s25  ;;  %p82_p0 = scmp.lt.u32.totalorder %s78_s25, %s131_s1 }
  0x20   :  { %p84_p1 = pnand %p82_p0, %p79_p13 }
  0x22   :  { %87 = shalt.err (!%p84_p1)
}
  0x23   :  { %34 = dma.vmem_to_hbm [thread:$0]  %s32_s21, 128, %s131_s1, [#allocation4]  }
  0x24   :  { %90 = dma.done.wait [#allocation4], 128  }
  0x25   :  { %91 = vsyncadd [#allocation4], 4294967168 }
  0x26   :  { %38 = vsyncpa [#allocation3], 1 }
  0x27   :  { %39 = vsyncpa [#allocation4], 1 }

// kernel: bottleneck_forward.3
= control target key start
LH: loop header
LB: loop body
LE: loop exit
PB: predicated region body
PF: predicated region fallthrough
CT: control target
= control target key end

     0   :  { %s2712_s0 = inlined_call_operand.vmem [shape: bf16[128,512], index: 0, kind: input, shape index: {}]   ;;  %s2713_s1 = inlined_call_operand.vmem [shape: bf16[512,128], index: 1, kind: input, shape index: {}]   ;;  %s2714_s2 = inlined_call_operand.vmem [shape: f32[1,128], index: 2, kind: input, shape index: {}]   ;;  %s2715_s3 = inlined_call_operand.vmem [shape: bf16[128,512], index: 3, kind: input, shape index: {}]   ;;  %s2716_s4 = inlined_call_operand.vmem [shape: bf16[512,128], index: 4, kind: input, shape index: {}]   ;;  %s2717_s5 = inlined_call_operand.vmem [shape: f32[1,128], index: 5, kind: input, shape index: {}]   ;;  %s2718_s6 = inlined_call_operand.vmem [shape: f32[1,128], index: 6, kind: input, shape index: {}]   ;;  %s2719_s7 = inlined_call_operand.hbm [shape: bf16[128,128], index: 7, kind: output, shape index: {}]  }
   0x1   :  { %v1978_v0 = vld [vmem:[%s2713_s1 + $0x40] sm:$0xff]   ;;  %v1982_v4 = vld [vmem:[%s2713_s1 + $0x48] sm:$0xff]   ;;  %v1986_v8 = vld [vmem:[%s2713_s1 + $0x50] sm:$0xff]  }
   0x2   :  { %v1979_v1 = vld [vmem:[%s2713_s1 + $0xc0] sm:$0xff]   ;;  %1719 = vmatprep.subr.bf16.mxu0 %v1978_v0  ;;  %v1983_v5 = vld [vmem:[%s2713_s1 + $0xc8] sm:$0xff]   ;;  %v1987_v9 = vld [vmem:[%s2713_s1 + $0xd0] sm:$0xff]  }
   0x3   :  { %v1980_v2 = vld [vmem:[%s2713_s1] sm:$0xff]   ;;  %1783 = vmatprep.subr.bf16.mxu1 %v1979_v1  ;;  %v1984_v6 = vld [vmem:[%s2713_s1 + $0x8] sm:$0xff]   ;;  %v1988_v10 = vld [vmem:[%s2713_s1 + $0x10] sm:$0xff]  }
   0x4   :  { %v1981_v3 = vld [vmem:[%s2713_s1 + $0x80] sm:$0xff]   ;;  %1720 = vmatpush3.bf16.msra.mxu0 %v1980_v2  ;;  %v1985_v7 = vld [vmem:[%s2713_s1 + $0x88] sm:$0xff]   ;;  %v1989_v11 = vld [vmem:[%s2713_s1 + $0x90] sm:$0xff]  }
   0x5   :  { %1784 = vmatpush3.bf16.msra.mxu1 %v1981_v3  ;;  %1721 = vmatprep.subr.bf16.mxu0 %v1982_v4  ;;  %v1990_v12 = vld [vmem:[%s2713_s1 + $0x58] sm:$0xff]   ;;  %v1994_v16 = vld [vmem:[%s2713_s1 + $0x60] sm:$0xff]   ;;  %v1998_v20 = vld [vmem:[%s2713_s1 + $0x68] sm:$0xff]  }
   0x6   :  { %1785 = vmatprep.subr.bf16.mxu1 %v1983_v5  ;;  %v1991_v13 = vld [vmem:[%s2713_s1 + $0xd8] sm:$0xff]   ;;  %v1995_v17 = vld [vmem:[%s2713_s1 + $0xe0] sm:$0xff]   ;;  %v1999_v21 = vld [vmem:[%s2713_s1 + $0xe8] sm:$0xff]  }
   0x7   :  { %v1992_v14 = vld [vmem:[%s2713_s1 + $0x18] sm:$0xff]   ;;  %v1996_v18 = vld [vmem:[%s2713_s1 + $0x20] sm:$0xff]   ;;  %v2000_v22 = vld [vmem:[%s2713_s1 + $0x28] sm:$0xff]  }
   0x8   :  { %1722 = vmatpush3.bf16.msra.mxu0 %v1984_v6  ;;  %v1993_v15 = vld [vmem:[%s2713_s1 + $0x98] sm:$0xff]   ;;  %v1997_v19 = vld [vmem:[%s2713_s1 + $0xa0] sm:$0xff]   ;;  %v2001_v23 = vld [vmem:[%s2713_s1 + $0xa8] sm:$0xff]  }
   0x9   :  { %1786 = vmatpush3.bf16.msra.mxu1 %v1985_v7  ;;  %1723 = vmatprep.subr.bf16.mxu0 %v1986_v8  ;;  %v2002_v24 = vld [vmem:[%s2713_s1 + $0x70] sm:$0xff]   ;;  %v2006_v28 = vld [vmem:[%s2713_s1 + $0x78] sm:$0xff]   ;;  %v2016_v36 = vld [vmem:[%s2716_s4 + $0x40] sm:$0xff]  }
   0xa   :  { %1787 = vmatprep.subr.bf16.mxu1 %v1987_v9  ;;  %v2003_v25 = vld [vmem:[%s2713_s1 + $0xf0] sm:$0xff]   ;;  %v2007_v29 = vld [vmem:[%s2713_s1 + $0xf8] sm:$0xff]   ;;  %v2017_v37 = vld [vmem:[%s2716_s4 + $0xc0] sm:$0xff]  }
   0xb   :  { %v2004_v26 = vld [vmem:[%s2713_s1 + $0x30] sm:$0xff]   ;;  %v2008_v30 = vld [vmem:[%s2713_s1 + $0x38] sm:$0xff]   ;;  %v2018_v38 = vld [vmem:[%s2716_s4] sm:$0xff]  }
   0xc   :  { %1724 = vmatpush3.bf16.msra.mxu0 %v1988_v10  ;;  %v2005_v27 = vld [vmem:[%s2713_s1 + $0xb0] sm:$0xff]   ;;  %v2009_v31 = vld [vmem:[%s2713_s1 + $0xb8] sm:$0xff]   ;;  %v2019_v39 = vld [vmem:[%s2716_s4 + $0x80] sm:$0xff]  }
   0xd   :  { %1788 = vmatpush3.bf16.msra.mxu1 %v1989_v11  ;;  %1725 = vmatprep.subr.bf16.mxu0 %v1990_v12  ;;  %v2010_v32 = vld [vmem:[%s2712_s0] ss:$16 sps:$4 sm:$0xff]   ;;  %v2012_v33 = vld [vmem:[%s2712_s0 + $0x4] ss:$16 sps:$4 sm:$0xff]   ;;  %v2013_v34 = vld [vmem:[%s2712_s0 + $0x8] ss:$16 sps:$4 sm:$0xff]  }
   0xe   :  { %1789 = vmatprep.subr.bf16.mxu1 %v1991_v13  ;;  %v2015_v35 = vld [vmem:[%s2712_s0 + $0xc] ss:$16 sps:$4 sm:$0xff]   ;;  %508 = vmatprep.mubr.bf16.mxu0 %v2012_v33  ;;  %v2020_v40 = vld [vmem:[%s2712_s0 + $0x24] ss:$16 sps:$4 sm:$0xff]   ;;  %v2024_v42 = vld [vmem:[%s2712_s0 + $0x20] ss:$16 sps:$4 sm:$0xff]  }
   0xf   :  { %605 = vmatprep.mubr.bf16.mxu1 %v2015_v35  ;;  %v2022_v41 = vld [vmem:[%s2712_s0 + $0x2c] ss:$16 sps:$4 sm:$0xff]   ;;  %v2025_v43 = vld [vmem:[%s2712_s0 + $0x28] ss:$16 sps:$4 sm:$0xff]   ;;  %v2030_v48 = vld [vmem:[%s2712_s0 + $0x44] ss:$16 sps:$4 sm:$0xff]  }
  0x10   :  { %1726 = vmatpush3.bf16.msra.mxu0 %v1992_v14  ;;  %v2026_v44 = vld [vmem:[%s2716_s4 + $0x48] sm:$0xff]   ;;  %v2034_v50 = vld [vmem:[%s2712_s0 + $0x40] ss:$16 sps:$4 sm:$0xff]   ;;  %v2040_v56 = vld [vmem:[%s2712_s0 + $0x64] ss:$16 sps:$4 sm:$0xff]  }
  0x11   :  { %1790 = vmatpush3.bf16.msra.mxu1 %v1993_v15  ;;  %1727 = vmatprep.subr.bf16.mxu0 %v1994_v16  ;;  %v2027_v45 = vld [vmem:[%s2716_s4 + $0xc8] sm:$0xff]   ;;  %v2036_v52 = vld [vmem:[%s2716_s4 + $0x50] sm:$0xff]   ;;  %v2046_v60 = vld [vmem:[%s2716_s4 + $0x58] sm:$0xff]  }
  0x12   :  { %1791 = vmatprep.subr.bf16.mxu1 %v1995_v17  ;;  %v2028_v46 = vld [vmem:[%s2716_s4 + $0x8] sm:$0xff]   ;;  %v2037_v53 = vld [vmem:[%s2716_s4 + $0xd0] sm:$0xff]   ;;  %v2047_v61 = vld [vmem:[%s2716_s4 + $0xd8] sm:$0xff]  }
  0x13   :  { %v2029_v47 = vld [vmem:[%s2716_s4 + $0x88] sm:$0xff]   ;;  %v2038_v54 = vld [vmem:[%s2716_s4 + $0x10] sm:$0xff]   ;;  %v2048_v62 = vld [vmem:[%s2716_s4 + $0x18] sm:$0xff]  }
  0x14   :  { %1728 = vmatpush3.bf16.msra.mxu0 %v1996_v18  ;;  %v2032_v49 = vld [vmem:[%s2712_s0 + $0x4c] ss:$16 sps:$4 sm:$0xff]   ;;  %v2035_v51 = vld [vmem:[%s2712_s0 + $0x48] ss:$16 sps:$4 sm:$0xff]   ;;  %v2039_v55 = vld [vmem:[%s2716_s4 + $0x90] sm:$0xff]  }
  0x15   :  { %1792 = vmatpush3.bf16.msra.mxu1 %v1997_v19  ;;  %1729 = vmatprep.subr.bf16.mxu0 %v1998_v20  ;;  %v2042_v57 = vld [vmem:[%s2712_s0 + $0x6c] ss:$16 sps:$4 sm:$0xff]   ;;  %v2044_v58 = vld [vmem:[%s2712_s0 + $0x60] ss:$16 sps:$4 sm:$0xff]   ;;  %v2045_v59 = vld [vmem:[%s2712_s0 + $0x68] ss:$16 sps:$4 sm:$0xff]  }
  0x16   :  { %1793 = vmatprep.subr.bf16.mxu1 %v1999_v21  ;;  %v2049_v63 = vld [vmem:[%s2716_s4 + $0x98] sm:$0xff]   ;;  %v2050_v0 = vld [vmem:[%s2712_s0 + $0x84] ss:$16 sps:$4 sm:$0xff]   ;;  %v2054_v2 = vld [vmem:[%s2712_s0 + $0x80] ss:$16 sps:$4 sm:$0xff]  }
  0x17   :  { %v2052_v1 = vld [vmem:[%s2712_s0 + $0x8c] ss:$16 sps:$4 sm:$0xff]   ;;  %v2056_v3 = vld [vmem:[%s2716_s4 + $0x60] sm:$0xff]   ;;  %v2055_v4 = vld [vmem:[%s2712_s0 + $0x88] ss:$16 sps:$4 sm:$0xff]  }
  0x18   :  { %1730 = vmatpush3.bf16.msra.mxu0 %v2000_v22  ;;  %v2057_v5 = vld [vmem:[%s2716_s4 + $0xe0] sm:$0xff]   ;;  %v2062_v9 = vld [vmem:[%s2712_s0 + $0xac] ss:$16 sps:$4 sm:$0xff]   ;;  %v2065_v15 = vld [vmem:[%s2712_s0 + $0xa8] ss:$16 sps:$4 sm:$0xff]  }
  0x19   :  { %1794 = vmatpush3.bf16.msra.mxu1 %v2001_v23  ;;  %1731 = vmatprep.subr.bf16.mxu0 %v2002_v24  ;;  %v2058_v6 = vld [vmem:[%s2716_s4 + $0x20] sm:$0xff]   ;;  %v2066_v10 = vld [vmem:[%s2716_s4 + $0x68] sm:$0xff]   ;;  %v2076_v18 = vld [vmem:[%s2716_s4 + $0x70] sm:$0xff]  }
  0x1a   :  { %1795 = vmatprep.subr.bf16.mxu1 %v2003_v25  ;;  %v2059_v7 = vld [vmem:[%s2716_s4 + $0xa0] sm:$0xff]   ;;  %v2067_v11 = vld [vmem:[%s2716_s4 + $0xe8] sm:$0xff]   ;;  %v2077_v19 = vld [vmem:[%s2716_s4 + $0xf0] sm:$0xff]  }
  0x1b   :  { %v2060_v8 = vld [vmem:[%s2712_s0 + $0xa4] ss:$16 sps:$4 sm:$0xff]   ;;  %v2064_v12 = vld [vmem:[%s2712_s0 + $0xa0] ss:$16 sps:$4 sm:$0xff]   ;;  %v2068_v13 = vld [vmem:[%s2716_s4 + $0x28] sm:$0xff]  }
  0x1c   :  { %1732 = vmatpush3.bf16.msra.mxu0 %v2004_v26  ;;  %v2069_v14 = vld [vmem:[%s2716_s4 + $0xa8] sm:$0xff]   ;;  %v2070_v16 = vld [vmem:[%s2712_s0 + $0xc4] ss:$16 sps:$4 sm:$0xff]   ;;  %v2074_v22 = vld [vmem:[%s2712_s0 + $0xc0] ss:$16 sps:$4 sm:$0xff]  }
  0x1d   :  { %1796 = vmatpush3.bf16.msra.mxu1 %v2005_v27  ;;  %1733 = vmatprep.subr.bf16.mxu0 %v2006_v28  ;;  %v2072_v17 = vld [vmem:[%s2712_s0 + $0xcc] ss:$16 sps:$4 sm:$0xff]   ;;  %v2078_v20 = vld [vmem:[%s2716_s4 + $0x30] sm:$0xff]   ;;  %v2075_v23 = vld [vmem:[%s2712_s0 + $0xc8] ss:$16 sps:$4 sm:$0xff]  }
  0x1e   :  { %1797 = vmatprep.subr.bf16.mxu1 %v2007_v29  ;;  %v2079_v21 = vld [vmem:[%s2716_s4 + $0xb0] sm:$0xff]   ;;  %v2082_v25 = vld [vmem:[%s2712_s0 + $0xec] ss:$16 sps:$4 sm:$0xff]   ;;  %v2093_v35 = vld [vmem:[%s2715_s3 + $0x8] ss:$16 sps:$4 sm:$0xff]  }
  0x1f   :  { %v2080_v24 = vld [vmem:[%s2712_s0 + $0xe4] ss:$16 sps:$4 sm:$0xff]   ;;  %v2086_v26 = vld [vmem:[%s2716_s4 + $0x78] sm:$0xff]  }
  0x20   :  { %1734 = vmatpush3.bf16.msra.mxu0 %v2008_v30  ;;  %v2087_v27 = vld [vmem:[%s2716_s4 + $0xf8] sm:$0xff]   ;;  %v2084_v30 = vld [vmem:[%s2712_s0 + $0xe0] ss:$16 sps:$4 sm:$0xff]  }
  0x21   :  { %1798 = vmatpush3.bf16.msra.mxu1 %v2009_v31  ;;  %1847 = vmatprep.subr.bf16.mxu0 %v2016_v36  ;;  %v2088_v28 = vld [vmem:[%s2716_s4 + $0x38] sm:$0xff]   ;;  %v2096_v36 = vld [vmem:[%s2715_s3 + $0x24] ss:$16 sps:$4 sm:$0xff]  }
  0x22   :  { %1911 = vmatprep.subr.bf16.mxu1 %v2017_v37  ;;  %v2089_v29 = vld [vmem:[%s2716_s4 + $0xb8] sm:$0xff]  }
  0x23   :  { %509 = vmatmul.mubr.bf16.vlgmr.msra.gmra.mrb[0].mxu0 %v2010_v32  ;;  %v2085_v31 = vld [vmem:[%s2712_s0 + $0xe8] ss:$16 sps:$4 sm:$0xff]   ;;  %v2092_v32 = vld [vmem:[%s2715_s3 + $0x4] ss:$16 sps:$4 sm:$0xff]   ;;  %v2095_v33 = vld [vmem:[%s2715_s3 + $0xc] ss:$16 sps:$4 sm:$0xff]  }
  0x24   :  { %606 = vmatmul.mubr.bf16.vlgmr.msra.gmra.mrb[0].mxu1 %v2013_v34  ;;  %1848 = vmatpush3.bf16.msra.mxu0 %v2018_v38  ;;  %v2090_v34 = vld [vmem:[%s2715_s3] ss:$16 sps:$4 sm:$0xff]   ;;  %v2098_v37 = vld [vmem:[%s2715_s3 + $0x2c] ss:$16 sps:$4 sm:$0xff]  }
  0x25   :  { %1912 = vmatpush3.bf16.msra.mxu1 %v2019_v39  ;;  %516 = vmatprep.mubr.bf16.mxu0 %v2020_v40  ;;  %v2100_v38 = vld [vmem:[%s2715_s3 + $0x20] ss:$16 sps:$4 sm:$0xff]   ;;  %v2101_v39 = vld [vmem:[%s2715_s3 + $0x28] ss:$16 sps:$4 sm:$0xff]   ;;  %v2102_v40 = vld [vmem:[%s2715_s3 + $0x44] ss:$16 sps:$4 sm:$0xff]  }
  0x26   :  { %613 = vmatprep.mubr.bf16.mxu1 %v2022_v41  ;;  %1849 = vmatprep.subr.bf16.mxu0 %v2026_v44  ;;  %v2104_v41 = vld [vmem:[%s2715_s3 + $0x4c] ss:$16 sps:$4 sm:$0xff]  }
  0x27   :  { %1913 = vmatprep.subr.bf16.mxu1 %v2027_v45 }
  0x28   :  { %1850 = vmatpush3.bf16.msra.mxu0 %v2028_v46 }
  0x29   :  { %1914 = vmatpush3.bf16.msra.mxu1 %v2029_v47  ;;  %1851 = vmatprep.subr.bf16.mxu0 %v2036_v52 }
  0x2a   :  { %1915 = vmatprep.subr.bf16.mxu1 %v2037_v53 }
  0x2b   :  { %517 = vmatmul.mubr.bf16.gmra.mrb[4].mxu0 %v2024_v42 }
  0x2c   :  { %614 = vmatmul.mubr.bf16.gmra.mrb[4].mxu1 %v2025_v43  ;;  %524 = vmatprep.mubr.bf16.mxu0 %v2030_v48 }
  0x2d   :  { %621 = vmatprep.mubr.bf16.mxu1 %v2032_v49  ;;  %1852 = vmatpush3.bf16.msra.mxu0 %v2038_v54 }
  0x2e   :  { %1916 = vmatpush3.bf16.msra.mxu1 %v2039_v55  ;;  %1853 = vmatprep.subr.bf16.mxu0 %v2046_v60 }
  0x2f   :  { %1917 = vmatprep.subr.bf16.mxu1 %v2047_v61 }
  0x31   :  { %1854 = vmatpush3.bf16.msra.mxu0 %v2048_v62 }
  0x32   :  { %1918 = vmatpush3.bf16.msra.mxu1 %v2049_v63  ;;  %1855 = vmatprep.subr.bf16.mxu0 %v2056_v3 }
  0x33   :  { %525 = vmatmul.mubr.bf16.gmra.mrb[8].mxu0 %v2034_v50  ;;  %1919 = vmatprep.subr.bf16.mxu1 %v2057_v5 }
  0x34   :  { %622 = vmatmul.mubr.bf16.gmra.mrb[8].mxu1 %v2035_v51  ;;  %532 = vmatprep.mubr.bf16.mxu0 %v2040_v56 }
  0x35   :  { %629 = vmatprep.mubr.bf16.mxu1 %v2042_v57  ;;  %1856 = vmatpush3.bf16.msra.mxu0 %v2058_v6 }
  0x36   :  { %1920 = vmatpush3.bf16.msra.mxu1 %v2059_v7  ;;  %1857 = vmatprep.subr.bf16.mxu0 %v2066_v10 }
  0x37   :  { %1921 = vmatprep.subr.bf16.mxu1 %v2067_v11 }
  0x39   :  { %1858 = vmatpush3.bf16.msra.mxu0 %v2068_v13 }
  0x3a   :  { %1922 = vmatpush3.bf16.msra.mxu1 %v2069_v14  ;;  %1859 = vmatprep.subr.bf16.mxu0 %v2076_v18 }
  0x3b   :  { %533 = vmatmul.mubr.bf16.gmra.mrb[12].mxu0 %v2044_v58  ;;  %1923 = vmatprep.subr.bf16.mxu1 %v2077_v19 }
  0x3c   :  { %630 = vmatmul.mubr.bf16.gmra.mrb[12].mxu1 %v2045_v59  ;;  %540 = vmatprep.mubr.bf16.mxu0 %v2050_v0 }
  0x3d   :  { %637 = vmatprep.mubr.bf16.mxu1 %v2052_v1  ;;  %1860 = vmatpush3.bf16.msra.mxu0 %v2078_v20 }
  0x3e   :  { %1924 = vmatpush3.bf16.msra.mxu1 %v2079_v21  ;;  %1861 = vmatprep.subr.bf16.mxu0 %v2086_v26 }
  0x3f   :  { %1925 = vmatprep.subr.bf16.mxu1 %v2087_v27 }
  0x41   :  { %1862 = vmatpush3.bf16.msra.mxu0 %v2088_v28 }
  0x42   :  { %1926 = vmatpush3.bf16.msra.mxu1 %v2089_v29 }
  0x43   :  { %541 = vmatmul.mubr.bf16.gmra.mrb[16].mxu0 %v2054_v2 }
  0x44   :  { %638 = vmatmul.mubr.bf16.gmra.mrb[16].mxu1 %v2055_v4  ;;  %548 = vmatprep.mubr.bf16.mxu0 %v2060_v8 }
  0x45   :  { %645 = vmatprep.mubr.bf16.mxu1 %v2062_v9 }
  0x4b   :  { %549 = vmatmul.mubr.bf16.gmra.mrb[20].mxu0 %v2064_v12 }
  0x4c   :  { %646 = vmatmul.mubr.bf16.gmra.mrb[20].mxu1 %v2065_v15  ;;  %556 = vmatprep.mubr.bf16.mxu0 %v2070_v16 }
  0x4d   :  { %653 = vmatprep.mubr.bf16.mxu1 %v2072_v17 }
  0x53   :  { %557 = vmatmul.mubr.bf16.gmra.mrb[24].mxu0 %v2074_v22 }
  0x54   :  { %654 = vmatmul.mubr.bf16.gmra.mrb[24].mxu1 %v2075_v23  ;;  %564 = vmatprep.mubr.bf16.mxu0 %v2080_v24 }
  0x55   :  { %661 = vmatprep.mubr.bf16.mxu1 %v2082_v25 }
  0x5b   :  { %565 = vmatmul.mubr.bf16.gmra.mrb[28].mxu0 %v2084_v30 }
  0x5c   :  { %662 = vmatmul.mubr.bf16.gmra.mrb[28].mxu1 %v2085_v31  ;;  %1150 = vmatprep.mubr.bf16.mxu0 %v2092_v32 }
  0x5d   :  { %1247 = vmatprep.mubr.bf16.mxu1 %v2095_v33 }
  0x63   :  { %1151 = vmatmul.mubr.bf16.vlgmr.msra.gmra.mrb[32].mxu0 %v2090_v34 }
  0x64   :  { %1248 = vmatmul.mubr.bf16.vlgmr.msra.gmra.mrb[32].mxu1 %v2093_v35  ;;  %1158 = vmatprep.mubr.bf16.mxu0 %v2096_v36 }
  0x65   :  { %1255 = vmatprep.mubr.bf16.mxu1 %v2098_v37 }
  0x66   :  { %12 = vsyncpa [#allocation3], 0  ;;  %v2106_v42 = vld [vmem:[%s2715_s3 + $0x40] ss:$16 sps:$4 sm:$0xff]   ;;  %v2107_v43 = vld [vmem:[%s2715_s3 + $0x48] ss:$16 sps:$4 sm:$0xff]  }
  0x67   :  { %v2108_v44 = vld [vmem:[%s2715_s3 + $0x64] ss:$16 sps:$4 sm:$0xff]   ;;  %v2110_v45 = vld [vmem:[%s2715_s3 + $0x6c] ss:$16 sps:$4 sm:$0xff]   ;;  %v2112_v46 = vld [vmem:[%s2715_s3 + $0x60] ss:$16 sps:$4 sm:$0xff]  }
  0x68   :  { %v2113_v47 = vld [vmem:[%s2715_s3 + $0x68] ss:$16 sps:$4 sm:$0xff]   ;;  %v2114_v48 = vld [vmem:[%s2715_s3 + $0x84] ss:$16 sps:$4 sm:$0xff]   ;;  %v2116_v49 = vld [vmem:[%s2715_s3 + $0x8c] ss:$16 sps:$4 sm:$0xff]  }
  0x69   :  { %v2118_v50 = vld [vmem:[%s2715_s3 + $0x80] ss:$16 sps:$4 sm:$0xff]   ;;  %v2119_v51 = vld [vmem:[%s2715_s3 + $0x88] ss:$16 sps:$4 sm:$0xff]   ;;  %v2120_v52 = vld [vmem:[%s2715_s3 + $0xa4] ss:$16 sps:$4 sm:$0xff]  }
  0x6a   :  { %v2122_v53 = vld [vmem:[%s2715_s3 + $0xac] ss:$16 sps:$4 sm:$0xff]   ;;  %v2124_v54 = vld [vmem:[%s2715_s3 + $0xa0] ss:$16 sps:$4 sm:$0xff]   ;;  %v2125_v55 = vld [vmem:[%s2715_s3 + $0xa8] ss:$16 sps:$4 sm:$0xff]  }
  0x6b   :  { %1159 = vmatmul.mubr.bf16.gmra.mrb[36].mxu0 %v2100_v38  ;;  %v2126_v56 = vld [vmem:[%s2715_s3 + $0xc4] ss:$16 sps:$4 sm:$0xff]   ;;  %v2128_v57 = vld [vmem:[%s2715_s3 + $0xcc] ss:$16 sps:$4 sm:$0xff]   ;;  %v2130_v58 = vld [vmem:[%s2715_s3 + $0xc0] ss:$16 sps:$4 sm:$0xff]  }
  0x6c   :  { %1256 = vmatmul.mubr.bf16.gmra.mrb[36].mxu1 %v2101_v39  ;;  %1166 = vmatprep.mubr.bf16.mxu0 %v2102_v40  ;;  %v2131_v59 = vld [vmem:[%s2715_s3 + $0xc8] ss:$16 sps:$4 sm:$0xff]   ;;  %v2132_v60 = vld [vmem:[%s2715_s3 + $0xe4] ss:$16 sps:$4 sm:$0xff]   ;;  %v2134_v61 = vld [vmem:[%s2715_s3 + $0xec] ss:$16 sps:$4 sm:$0xff]  }
  0x6d   :  { %1263 = vmatprep.mubr.bf16.mxu1 %v2104_v41  ;;  %v2136_v62 = vld [vmem:[%s2715_s3 + $0xe0] ss:$16 sps:$4 sm:$0xff]   ;;  %v2137_v63 = vld [vmem:[%s2715_s3 + $0xe8] ss:$16 sps:$4 sm:$0xff]  }
  0x73   :  { %1167 = vmatmul.mubr.bf16.gmra.mrb[40].mxu0 %v2106_v42 }
  0x74   :  { %1264 = vmatmul.mubr.bf16.gmra.mrb[40].mxu1 %v2107_v43  ;;  %1174 = vmatprep.mubr.bf16.mxu0 %v2108_v44 }
  0x75   :  { %1271 = vmatprep.mubr.bf16.mxu1 %v2110_v45 }
  0x7b   :  { %1175 = vmatmul.mubr.bf16.gmra.mrb[44].mxu0 %v2112_v46 }
  0x7c   :  { %1272 = vmatmul.mubr.bf16.gmra.mrb[44].mxu1 %v2113_v47  ;;  %1182 = vmatprep.mubr.bf16.mxu0 %v2114_v48 }
  0x7d   :  { %1279 = vmatprep.mubr.bf16.mxu1 %v2116_v49 }
  0x83   :  { %1183 = vmatmul.mubr.bf16.gmra.mrb[48].mxu0 %v2118_v50 }
  0x84   :  { %1280 = vmatmul.mubr.bf16.gmra.mrb[48].mxu1 %v2119_v51  ;;  %1190 = vmatprep.mubr.bf16.mxu0 %v2120_v52 }
  0x85   :  { %1287 = vmatprep.mubr.bf16.mxu1 %v2122_v53 }
  0x8b   :  { %1191 = vmatmul.mubr.bf16.gmra.mrb[52].mxu0 %v2124_v54 }
  0x8c   :  { %1288 = vmatmul.mubr.bf16.gmra.mrb[52].mxu1 %v2125_v55  ;;  %1198 = vmatprep.mubr.bf16.mxu0 %v2126_v56 }
  0x8d   :  { %1295 = vmatprep.mubr.bf16.mxu1 %v2128_v57 }
  0x93   :  { %1199 = vmatmul.mubr.bf16.gmra.mrb[56].mxu0 %v2130_v58 }
  0x94   :  { %1296 = vmatmul.mubr.bf16.gmra.mrb[56].mxu1 %v2131_v59  ;;  %1206 = vmatprep.mubr.bf16.mxu0 %v2132_v60 }
  0x95   :  { %1303 = vmatprep.mubr.bf16.mxu1 %v2134_v61 }
  0x9b   :  { %1207 = vmatmul.mubr.bf16.gmra.mrb[60].mxu0 %v2136_v62 }
  0x9c   :  { %1304 = vmatmul.mubr.bf16.gmra.mrb[60].mxu1 %v2137_v63 }
  0xf6   :  { %v1735_v0 = vpop.f32.mrb[0].mxu0 }
  0xf7   :  { %v1799_v1 = vpop.f32.mrb[0].mxu1  ;;  %v1736_v2 = vpop.f32.mrb[1].mxu0 }
  0xf8   :  { %v1737_v3 = vadd.f32 %v1736_v2, %v1735_v0  ;;  %v1800_v4 = vpop.f32.mrb[1].mxu1  ;;  %v1738_v5 = vpop.f32.mrb[2].mxu0 }
  0xf9   :  { %v1801_v6 = vadd.f32 %v1800_v4, %v1799_v1  ;;  %v1802_v7 = vpop.f32.mrb[2].mxu1  ;;  %v1739_v8 = vpop.f32.mrb[3].mxu0 }
  0xfa   :  { %v1740_v9 = vadd.f32 %v1739_v8, %v1738_v5  ;;  %v1803_v10 = vpop.f32.mrb[3].mxu1 }
  0xfb   :  { %v2589_v11 = vadd.f32 %v1801_v6, %v1737_v3  ;;  %v1804_v12 = vadd.f32 %v1803_v10, %v1802_v7 }
  0xfd   :  { %v2591_v13 = vadd.f32 %v1804_v12, %v1740_v9 }
  0xfe   :  { %v1741_v14 = vpop.f32.mrb[4].mxu0 }
  0xff   :  { %v1805_v15 = vpop.f32.mrb[4].mxu1  ;;  %v1742_v16 = vpop.f32.mrb[5].mxu0 }
 0x100   :  { %v1743_v17 = vadd.f32 %v1742_v16, %v1741_v14  ;;  %v1806_v18 = vpop.f32.mrb[5].mxu1  ;;  %v1744_v19 = vpop.f32.mrb[6].mxu0 }
 0x101   :  { %v1807_v20 = vadd.f32 %v1806_v18, %v1805_v15  ;;  %v1808_v21 = vpop.f32.mrb[6].mxu1  ;;  %v1745_v22 = vpop.f32.mrb[7].mxu0 }
 0x102   :  { %v1746_v23 = vadd.f32 %v1745_v22, %v1744_v19  ;;  %v1809_v24 = vpop.f32.mrb[7].mxu1 }
 0x103   :  { %v2593_v25 = vadd.f32 %v1807_v20, %v1743_v17  ;;  %v1810_v26 = vadd.f32 %v1809_v24, %v1808_v21 }
 0x105   :  { %v2595_v27 = vadd.f32 %v1810_v26, %v1746_v23 }
 0x106   :  { %v1747_v28 = vpop.f32.mrb[8].mxu0 }
 0x107   :  { %v1811_v29 = vpop.f32.mrb[8].mxu1  ;;  %v1748_v30 = vpop.f32.mrb[9].mxu0 }
 0x108   :  { %v1749_v31 = vadd.f32 %v1748_v30, %v1747_v28  ;;  %v1812_v32 = vpop.f32.mrb[9].mxu1  ;;  %v1750_v33 = vpop.f32.mrb[10].mxu0 }
 0x109   :  { %v1813_v34 = vadd.f32 %v1812_v32, %v1811_v29  ;;  %v1814_v35 = vpop.f32.mrb[10].mxu1  ;;  %v1751_v36 = vpop.f32.mrb[11].mxu0 }
 0x10a   :  { %v1752_v37 = vadd.f32 %v1751_v36, %v1750_v33  ;;  %v1815_v38 = vpop.f32.mrb[11].mxu1 }
 0x10b   :  { %v2597_v39 = vadd.f32 %v1813_v34, %v1749_v31  ;;  %v1816_v40 = vadd.f32 %v1815_v38, %v1814_v35 }
 0x10d   :  { %v2599_v41 = vadd.f32 %v1816_v40, %v1752_v37 }
 0x10e   :  { %v1753_v42 = vpop.f32.mrb[12].mxu0 }
 0x10f   :  { %v1817_v43 = vpop.f32.mrb[12].mxu1  ;;  %v1754_v44 = vpop.f32.mrb[13].mxu0 }
 0x110   :  { %v1755_v45 = vadd.f32 %v1754_v44, %v1753_v42  ;;  %v1818_v46 = vpop.f32.mrb[13].mxu1  ;;  %v1756_v47 = vpop.f32.mrb[14].mxu0 }
 0x111   :  { %v1819_v48 = vadd.f32 %v1818_v46, %v1817_v43  ;;  %v1820_v49 = vpop.f32.mrb[14].mxu1  ;;  %v1757_v50 = vpop.f32.mrb[15].mxu0 }
 0x112   :  { %v1758_v51 = vadd.f32 %v1757_v50, %v1756_v47  ;;  %v1821_v52 = vpop.f32.mrb[15].mxu1 }
 0x113   :  { %v2601_v53 = vadd.f32 %v1819_v48, %v1755_v45  ;;  %v1822_v54 = vadd.f32 %v1821_v52, %v1820_v49 }
 0x115   :  { %v2603_v55 = vadd.f32 %v1822_v54, %v1758_v51 }
 0x116   :  { %v1759_v56 = vpop.f32.mrb[16].mxu0 }
 0x117   :  { %v1823_v57 = vpop.f32.mrb[16].mxu1  ;;  %v1760_v58 = vpop.f32.mrb[17].mxu0 }
 0x118   :  { %v1761_v59 = vadd.f32 %v1760_v58, %v1759_v56  ;;  %v1824_v60 = vpop.f32.mrb[17].mxu1  ;;  %v1762_v61 = vpop.f32.mrb[18].mxu0 }
 0x119   :  { %v1825_v62 = vadd.f32 %v1824_v60, %v1823_v57  ;;  %v1826_v63 = vpop.f32.mrb[18].mxu1  ;;  %v1763_v0 = vpop.f32.mrb[19].mxu0 }
 0x11a   :  { %v1764_v1 = vadd.f32 %v1763_v0, %v1762_v61  ;;  %v1827_v2 = vpop.f32.mrb[19].mxu1 }
 0x11b   :  { %v2605_v3 = vadd.f32 %v1825_v62, %v1761_v59  ;;  %v1828_v4 = vadd.f32 %v1827_v2, %v1826_v63  ;;  %v2629_v2 = vld [vmem:[%s2717_s5] ss:$0 sm:$0xff] }
 0x11d   :  { %v2607_v5 = vadd.f32 %v1828_v4, %v1764_v1  ;;  %v2624_v1 = vld [vmem:[%s2714_s2] ss:$0 sm:$0xff]  ;;  %s2162_s2 = smov [#allocation2]  }
 0x11e   :  { %v1765_v6 = vpop.f32.mrb[20].mxu0  ;;  %s1498_s5 = sshll.u32 %s2162_s2, 4  ;;  %s1499_s5 = int_to_ptr.vmem [resolvable:$true] %s1498_s5 }
 0x11f   :  { %v1829_v7 = vpop.f32.mrb[20].mxu1  ;;  %v1766_v8 = vpop.f32.mrb[21].mxu0  ;;  %p2143_p1 = scmp.lt.s32.totalorder %s1499_s5, %s1499_s5 }
 0x120   :  { %v1767_v9 = vadd.f32 %v1766_v8, %v1765_v6  ;;  %v1830_v10 = vpop.f32.mrb[21].mxu1  ;;  %v1768_v12 = vpop.f32.mrb[22].mxu0 }
 0x121   :  { %v1831_v14 = vadd.f32 %v1830_v10, %v1829_v7  ;;  %v1832_v15 = vpop.f32.mrb[22].mxu1  ;;  %v1769_v16 = vpop.f32.mrb[23].mxu0 }
 0x122   :  { %v1770_v17 = vadd.f32 %v1769_v16, %v1768_v12  ;;  %v1833_v18 = vpop.f32.mrb[23].mxu1  ;;  %v1320_v16 = vmul.f32 %v2624_v1, %v2591_v13 }
 0x123   :  { %v2609_v19 = vadd.f32 %v1831_v14, %v1767_v9  ;;  %v1834_v20 = vadd.f32 %v1833_v18, %v1832_v15  ;;  %v1319_v9 = vmul.f32 %v2624_v1, %v2589_v11  ;;  %v2637_v14 = vld [vmem:[%s2718_s6] ss:$0 sm:$0xff]  ;;  %s2138_s6 = scalar_lea.vmem %s1499_s5, 1024 }
 0x124   :  { %p2139_p0 = scmp.ne.s32.totalorder %s1499_s5, %s2138_s6  ;;  %p2144_p2 = scmp.lt.s32.totalorder %s2138_s6, %s2138_s6 }
 0x125   :  { %v2611_v21 = vadd.f32 %v1834_v20, %v1770_v17 }
 0x126   :  { %v1771_v22 = vpop.f32.mrb[24].mxu0  ;;  %p2145_p3 = por %p2144_p2, %p2143_p1 }
 0x127   :  { %v1835_v23 = vpop.f32.mrb[24].mxu1  ;;  %v1772_v24 = vpop.f32.mrb[25].mxu0 }
 0x128   :  { %v1773_v26 = vadd.f32 %v1772_v24, %v1771_v22  ;;  %v1836_v28 = vpop.f32.mrb[25].mxu1  ;;  %v1774_v29 = vpop.f32.mrb[26].mxu0  ;;  %p2146_p4 = pnand %p2145_p3, %p2139_p0 }
 0x129   :  { %v1837_v30 = vadd.f32 %v1836_v28, %v1835_v23  ;;  %v1838_v31 = vpop.f32.mrb[26].mxu1  ;;  %v1775_v32 = vpop.f32.mrb[27].mxu0 }
 0x12a   :  { %v1776_v33 = vadd.f32 %v1775_v32, %v1774_v29  ;;  %v1839_v34 = vpop.f32.mrb[27].mxu1 }
 0x12b   :  { %v2613_v35 = vadd.f32 %v1837_v30, %v1773_v26  ;;  %v1840_v36 = vadd.f32 %v1839_v34, %v1838_v31 }
 0x12d   :  { %v2615_v37 = vadd.f32 %v1840_v36, %v1776_v33 }
 0x12e   :  { %v1777_v38 = vpop.f32.mrb[28].mxu0 }
 0x12f   :  { %v1841_v40 = vpop.f32.mrb[28].mxu1  ;;  %v1778_v42 = vpop.f32.mrb[29].mxu0 }
 0x130   :  { %v1779_v43 = vadd.f32 %v1778_v42, %v1777_v38  ;;  %v1842_v44 = vpop.f32.mrb[29].mxu1  ;;  %v1780_v45 = vpop.f32.mrb[30].mxu0  ;;  %v1321_v38 = vmul.f32 %v2624_v1, %v2593_v25 }
 0x131   :  { %v1843_v46 = vadd.f32 %v1842_v44, %v1841_v40  ;;  %v1844_v47 = vpop.f32.mrb[30].mxu1  ;;  %v1781_v48 = vpop.f32.mrb[31].mxu0 }
 0x132   :  { %v1782_v49 = vadd.f32 %v1781_v48, %v1780_v45  ;;  %v1845_v50 = vpop.f32.mrb[31].mxu1 }
 0x133   :  { %v2617_v51 = vadd.f32 %v1843_v46, %v1779_v43  ;;  %v1846_v52 = vadd.f32 %v1845_v50, %v1844_v47  ;;  %v1322_v46 = vmul.f32 %v2624_v1, %v2595_v27 }
 0x135   :  { %v2619_v54 = vadd.f32 %v1846_v52, %v1782_v49 }
 0x136   :  { %v1863_v56 = vpop.f32.mrb[32].mxu0 }
 0x137   :  { %v1927_v57 = vpop.f32.mrb[32].mxu1  ;;  %v1864_v58 = vpop.f32.mrb[33].mxu0 }
 0x138   :  { %v1865_v59 = vadd.f32 %v1864_v58, %v1863_v56  ;;  %v1928_v60 = vpop.f32.mrb[33].mxu1  ;;  %v1866_v61 = vpop.f32.mrb[34].mxu0 }
 0x139   :  { %v1929_v62 = vadd.f32 %v1928_v60, %v1927_v57  ;;  %v1930_v63 = vpop.f32.mrb[34].mxu1  ;;  %v1867_v0 = vpop.f32.mrb[35].mxu0 }
 0x13a   :  { %v1868_v4 = vadd.f32 %v1867_v0, %v1866_v61  ;;  %v1931_v6 = vpop.f32.mrb[35].mxu1 }
 0x13b   :  { %v1250_v7 = vadd.f32 %v1929_v62, %v1865_v59  ;;  %v1932_v8 = vadd.f32 %v1931_v6, %v1930_v63 }
 0x13d   :  { %v1342_v10 = vmul.f32 %v2629_v2, %v1250_v7  ;;  %v1253_v12 = vadd.f32 %v1932_v8, %v1868_v4  ;;  %v1323_v7 = vmul.f32 %v2624_v1, %v2597_v39 }
 0x13e   :  { %v1869_v15 = vpop.f32.mrb[36].mxu0 }
 0x13f   :  { %v1358_v17 = vadd.f32 %v1342_v10, %v1319_v9  ;;  %v1343_v18 = vmul.f32 %v2629_v2, %v1253_v12  ;;  %v1933_v20 = vpop.f32.mrb[36].mxu1  ;;  %v1870_v22 = vpop.f32.mrb[37].mxu0 }
 0x140   :  { %v1871_v23 = vadd.f32 %v1870_v22, %v1869_v15  ;;  %v1934_v24 = vpop.f32.mrb[37].mxu1  ;;  %v1872_v11 = vpop.f32.mrb[38].mxu0 }
 0x141   :  { %v1381_v26 = vadd.f32 %v2637_v14, %v1358_v17  ;;  %v1359_v28 = vadd.f32 %v1343_v18, %v1320_v16  ;;  %v1935_v29 = vadd.f32 %v1934_v24, %v1933_v20  ;;  %v1936_v30 = vpop.f32.mrb[38].mxu1  ;;  %v1873_v31 = vpop.f32.mrb[39].mxu0  ;;  %v1324_v16 = vmul.f32 %v2624_v1, %v2599_v41 }
 0x142   :  { %v1874_v32 = vadd.f32 %v1873_v31, %v1872_v11  ;;  %v1937_v33 = vpop.f32.mrb[39].mxu1 }
 0x143   :  { %v1382_v34 = vadd.f32 %v2637_v14, %v1359_v28  ;;  %v1258_v36 = vadd.f32 %v1935_v29, %v1871_v23  ;;  %v1938_v13 = vadd.f32 %v1937_v33, %v1936_v30  ;;  %v1397_v40 = vmax.f32 %v1381_v26, 0.0 }
 0x145   :  { %v1398_v42 = vmax.f32 %v1382_v34, 0.0  ;;  %v1344_v43 = vmul.f32 %v2629_v2, %v1258_v36  ;;  %v1261_v44 = vadd.f32 %v1938_v13, %v1874_v32  ;;  %v1325_v13 = vmul.f32 %v2624_v1, %v2601_v53 }
 0x146   :  { %v1875_v45 = vpop.f32.mrb[40].mxu0 }
 0x147   :  { %v1675_v47 = vpack.c.bf16 %v1398_v42, %v1397_v40  ;;  %v1360_v48 = vadd.f32 %v1344_v43, %v1321_v38  ;;  %v1345_v49 = vmul.f32 %v2629_v2, %v1261_v44  ;;  %v1939_v50 = vpop.f32.mrb[40].mxu1  ;;  %v1876_v52 = vpop.f32.mrb[41].mxu0 }
 0x148   :  { %v1877_v56 = vadd.f32 %v1876_v52, %v1875_v45  ;;  %v1940_v57 = vpop.f32.mrb[41].mxu1  ;;  %v1878_v58 = vpop.f32.mrb[42].mxu0  ;;  %v1326_v45 = vmul.f32 %v2624_v1, %v2603_v55 }
 0x149   :  { %1676 = vst [vmem:[#allocation2] sm:$0xff] %v1675_v47   ;;  %v1383_v25 = vadd.f32 %v2637_v14, %v1360_v48  ;;  %v1361_v59 = vadd.f32 %v1345_v49, %v1322_v46  ;;  %v1941_v60 = vadd.f32 %v1940_v57, %v1939_v50  ;;  %v1942_v61 = vpop.f32.mrb[42].mxu1  ;;  %v1879_v62 = vpop.f32.mrb[43].mxu0 }
 0x14a   :  { %v1880_v63 = vadd.f32 %v1879_v62, %v1878_v58  ;;  %v1943_v0 = vpop.f32.mrb[43].mxu1 }
 0x14b   :  { %v1384_v27 = vadd.f32 %v2637_v14, %v1361_v59  ;;  %v1266_v4 = vadd.f32 %v1941_v60, %v1877_v56  ;;  %v1944_v6 = vadd.f32 %v1943_v0, %v1942_v61  ;;  %v1399_v8 = vmax.f32 %v1383_v25, 0.0 }
 0x14d   :  { %v1400_v9 = vmax.f32 %v1384_v27, 0.0  ;;  %v1346_v10 = vmul.f32 %v2629_v2, %v1266_v4  ;;  %v1269_v12 = vadd.f32 %v1944_v6, %v1880_v63  ;;  %v1327_v27 = vmul.f32 %v2624_v1, %v2605_v3 }
 0x14e   :  { %v1881_v15 = vpop.f32.mrb[44].mxu0 }
 0x14f   :  { %v1680_v17 = vpack.c.bf16 %v1400_v9, %v1399_v8  ;;  %v1362_v18 = vadd.f32 %v1346_v10, %v1323_v7  ;;  %v1347_v20 = vmul.f32 %v2629_v2, %v1269_v12  ;;  %v1945_v22 = vpop.f32.mrb[44].mxu1  ;;  %v1882_v23 = vpop.f32.mrb[45].mxu0  ;;  %v1328_v10 = vmul.f32 %v2624_v1, %v2607_v5 }
 0x150   :  { %v1883_v24 = vadd.f32 %v1882_v23, %v1881_v15  ;;  %v1946_v11 = vpop.f32.mrb[45].mxu1  ;;  %v1884_v26 = vpop.f32.mrb[46].mxu0 }
 0x151   :  { %1712 = vst [vmem:[#allocation2 + $0x8] sm:$0xff] %v1680_v17   ;;  %v1385_v39 = vadd.f32 %v2637_v14, %v1362_v18  ;;  %v1363_v28 = vadd.f32 %v1347_v20, %v1324_v16  ;;  %v1947_v29 = vadd.f32 %v1946_v11, %v1945_v22  ;;  %v1948_v30 = vpop.f32.mrb[46].mxu1  ;;  %v1885_v31 = vpop.f32.mrb[47].mxu0 }
 0x152   :  { %v1886_v32 = vadd.f32 %v1885_v31, %v1884_v26  ;;  %v1949_v33 = vpop.f32.mrb[47].mxu1 }
 0x153   :  { %v1386_v41 = vadd.f32 %v2637_v14, %v1363_v28  ;;  %v1274_v34 = vadd.f32 %v1947_v29, %v1883_v24  ;;  %v1950_v36 = vadd.f32 %v1949_v33, %v1948_v30  ;;  %v1401_v38 = vmax.f32 %v1385_v39, 0.0 }
 0x155   :  { %v1402_v40 = vmax.f32 %v1386_v41, 0.0  ;;  %v1348_v42 = vmul.f32 %v2629_v2, %v1274_v34  ;;  %v1277_v43 = vadd.f32 %v1950_v36, %v1886_v32  ;;  %v1329_v32 = vmul.f32 %v2624_v1, %v2609_v19 }
 0x156   :  { %v1887_v44 = vpop.f32.mrb[48].mxu0 }
 0x157   :  { %v1685_v46 = vpack.c.bf16 %v1402_v40, %v1401_v38  ;;  %v1364_v47 = vadd.f32 %v1348_v42, %v1325_v13  ;;  %v1349_v48 = vmul.f32 %v2629_v2, %v1277_v43  ;;  %v1951_v49 = vpop.f32.mrb[48].mxu1  ;;  %v1888_v50 = vpop.f32.mrb[49].mxu0  ;;  %v1330_v38 = vmul.f32 %v2624_v1, %v2611_v21 }
 0x158   :  { %v1889_v52 = vadd.f32 %v1888_v50, %v1887_v44  ;;  %v1952_v56 = vpop.f32.mrb[49].mxu1  ;;  %v1890_v57 = vpop.f32.mrb[50].mxu0 }
 0x159   :  { %1713 = vst [vmem:[#allocation2 + $0x10] sm:$0xff] %v1685_v46   ;;  %v1387_v53 = vadd.f32 %v2637_v14, %v1364_v47  ;;  %v1365_v58 = vadd.f32 %v1349_v48, %v1326_v45  ;;  %v1953_v25 = vadd.f32 %v1952_v56, %v1951_v49  ;;  %v1954_v59 = vpop.f32.mrb[50].mxu1  ;;  %v1891_v60 = vpop.f32.mrb[51].mxu0 }
 0x15a   :  { %v1892_v61 = vadd.f32 %v1891_v60, %v1890_v57  ;;  %v1955_v62 = vpop.f32.mrb[51].mxu1 }
 0x15b   :  { %v1388_v55 = vadd.f32 %v2637_v14, %v1365_v58  ;;  %v1282_v63 = vadd.f32 %v1953_v25, %v1889_v52  ;;  %v1956_v0 = vadd.f32 %v1955_v62, %v1954_v59  ;;  %v1403_v4 = vmax.f32 %v1387_v53, 0.0 }
 0x15c   :  { %v1331_v59 = vmul.f32 %v2624_v1, %v2613_v35 }
 0x15d   :  { %v1404_v6 = vmax.f32 %v1388_v55, 0.0  ;;  %v1350_v7 = vmul.f32 %v2629_v2, %v1282_v63  ;;  %v1285_v8 = vadd.f32 %v1956_v0, %v1892_v61  ;;  %v1332_v0 = vmul.f32 %v2624_v1, %v2615_v37 }
 0x15e   :  { %v1893_v9 = vpop.f32.mrb[52].mxu0 }
 0x15f   :  { %v1690_v12 = vpack.c.bf16 %v1404_v6, %v1403_v4  ;;  %v1366_v15 = vadd.f32 %v1350_v7, %v1327_v27  ;;  %v1351_v16 = vmul.f32 %v2629_v2, %v1285_v8  ;;  %v1957_v17 = vpop.f32.mrb[52].mxu1  ;;  %v1894_v18 = vpop.f32.mrb[53].mxu0 }
 0x160   :  { %v1895_v20 = vadd.f32 %v1894_v18, %v1893_v9  ;;  %v1958_v22 = vpop.f32.mrb[53].mxu1  ;;  %v1896_v23 = vpop.f32.mrb[54].mxu0 }
 0x161   :  { %1714 = vst [vmem:[#allocation2 + $0x18] sm:$0xff] %v1690_v12   ;;  %v1389_v3 = vadd.f32 %v2637_v14, %v1366_v15  ;;  %v1367_v24 = vadd.f32 %v1351_v16, %v1328_v10  ;;  %v1959_v11 = vadd.f32 %v1958_v22, %v1957_v17  ;;  %v1960_v26 = vpop.f32.mrb[54].mxu1  ;;  %v1897_v39 = vpop.f32.mrb[55].mxu0 }
 0x162   :  { %v1898_v28 = vadd.f32 %v1897_v39, %v1896_v23  ;;  %v1961_v29 = vpop.f32.mrb[55].mxu1 }
 0x163   :  { %v1390_v5 = vadd.f32 %v2637_v14, %v1367_v24  ;;  %v1290_v30 = vadd.f32 %v1959_v11, %v1895_v20  ;;  %v1962_v31 = vadd.f32 %v1961_v29, %v1960_v26  ;;  %v1405_v33 = vmax.f32 %v1389_v3, 0.0 }
 0x164   :  { %v1333_v24 = vmul.f32 %v2624_v1, %v2617_v51  ;;  %v1334_v29 = vmul.f32 %v2624_v1, %v2619_v54 }
 0x165   :  { %v1406_v41 = vmax.f32 %v1390_v5, 0.0  ;;  %v1352_v34 = vmul.f32 %v2629_v2, %v1290_v30  ;;  %v1293_v36 = vadd.f32 %v1962_v31, %v1898_v28 }
 0x166   :  { %v1899_v13 = vpop.f32.mrb[56].mxu0 }
 0x167   :  { %v1695_v40 = vpack.c.bf16 %v1406_v41, %v1405_v33  ;;  %v1368_v42 = vadd.f32 %v1352_v34, %v1329_v32  ;;  %v1353_v43 = vmul.f32 %v2629_v2, %v1293_v36  ;;  %v1963_v44 = vpop.f32.mrb[56].mxu1  ;;  %v1900_v45 = vpop.f32.mrb[57].mxu0 }
 0x168   :  { %v1901_v46 = vadd.f32 %v1900_v45, %v1899_v13  ;;  %v1964_v47 = vpop.f32.mrb[57].mxu1  ;;  %v1902_v48 = vpop.f32.mrb[58].mxu0 }
 0x169   :  { %1715 = vst [vmem:[#allocation2 + $0x20] sm:$0xff] %v1695_v40   ;;  %v1391_v19 = vadd.f32 %v2637_v14, %v1368_v42  ;;  %v1369_v49 = vadd.f32 %v1353_v43, %v1330_v38  ;;  %v1965_v50 = vadd.f32 %v1964_v47, %v1963_v44  ;;  %v1966_v52 = vpop.f32.mrb[58].mxu1  ;;  %v1903_v56 = vpop.f32.mrb[59].mxu0 }
 0x16a   :  { %v1904_v57 = vadd.f32 %v1903_v56, %v1902_v48  ;;  %v1967_v53 = vpop.f32.mrb[59].mxu1 }
 0x16b   :  { %v1392_v21 = vadd.f32 %v2637_v14, %v1369_v49  ;;  %v1298_v58 = vadd.f32 %v1965_v50, %v1901_v46  ;;  %v1968_v25 = vadd.f32 %v1967_v53, %v1966_v52  ;;  %v1407_v60 = vmax.f32 %v1391_v19, 0.0 }
 0x16d   :  { %v1408_v61 = vmax.f32 %v1392_v21, 0.0  ;;  %v1354_v62 = vmul.f32 %v2629_v2, %v1298_v58  ;;  %v1301_v55 = vadd.f32 %v1968_v25, %v1904_v57 }
 0x16e   :  { %v1905_v63 = vpop.f32.mrb[60].mxu0 }
 0x16f   :  { %v1700_v27 = vpack.c.bf16 %v1408_v61, %v1407_v60  ;;  %v1370_v4 = vadd.f32 %v1354_v62, %v1331_v59  ;;  %v1355_v6 = vmul.f32 %v2629_v2, %v1301_v55  ;;  %v1969_v7 = vpop.f32.mrb[60].mxu1  ;;  %v1906_v8 = vpop.f32.mrb[61].mxu0 }
 0x170   :  { %v1907_v9 = vadd.f32 %v1906_v8, %v1905_v63  ;;  %v1970_v10 = vpop.f32.mrb[61].mxu1  ;;  %v1908_v12 = vpop.f32.mrb[62].mxu0 }
 0x171   :  { %1716 = vst [vmem:[#allocation2 + $0x28] sm:$0xff] %v1700_v27   ;;  %v1393_v35 = vadd.f32 %v2637_v14, %v1370_v4  ;;  %v1371_v15 = vadd.f32 %v1355_v6, %v1332_v0  ;;  %v1971_v16 = vadd.f32 %v1970_v10, %v1969_v7  ;;  %v1972_v17 = vpop.f32.mrb[62].mxu1  ;;  %v1909_v18 = vpop.f32.mrb[63].mxu0 }
 0x172   :  { %v1910_v20 = vadd.f32 %v1909_v18, %v1908_v12  ;;  %v1973_v22 = vpop.f32.mrb[63].mxu1 }
 0x173   :  { %v1394_v37 = vadd.f32 %v2637_v14, %v1371_v15  ;;  %v1306_v23 = vadd.f32 %v1971_v16, %v1907_v9  ;;  %v1974_v3 = vadd.f32 %v1973_v22, %v1972_v17  ;;  %v1409_v11 = vmax.f32 %v1393_v35, 0.0 }
 0x175   :  { %v1410_v26 = vmax.f32 %v1394_v37, 0.0  ;;  %v1356_v39 = vmul.f32 %v2629_v2, %v1306_v23  ;;  %v1309_v28 = vadd.f32 %v1974_v3, %v1910_v20 }
 0x177   :  { %v1705_v5 = vpack.c.bf16 %v1410_v26, %v1409_v11  ;;  %v1372_v30 = vadd.f32 %v1356_v39, %v1333_v24  ;;  %v1357_v31 = vmul.f32 %v2629_v2, %v1309_v28 }
 0x179   :  { %1717 = vst [vmem:[#allocation2 + $0x30] sm:$0xff] %v1705_v5   ;;  %v1395_v32 = vadd.f32 %v2637_v14, %v1372_v30  ;;  %v1373_v33 = vadd.f32 %v1357_v31, %v1334_v29 }
 0x17b   :  { %v1396_v41 = vadd.f32 %v2637_v14, %v1373_v33  ;;  %v1411_v51 = vmax.f32 %v1395_v32, 0.0 }
 0x17d   :  { %v1412_v34 = vmax.f32 %v1396_v41, 0.0 }
 0x17f   :  { %v1710_v36 = vpack.c.bf16 %v1412_v34, %v1411_v51 }
 0x181   :  { %1718 = vst [vmem:[#allocation2 + $0x38] sm:$0xff] %v1710_v36  }
 0x182   :  { %2149 = shalt.err (!%p2146_p4)
}
 0x183   :  { %s2150_s20 = scalar_lea.hbm %s2719_s7, 1024 }
 0x184   :  { %p2151_p5 = scmp.ne.s32.totalorder %s2719_s7, %s2150_s20  ;;  %p2154_p6 = scmp.lt.u32.totalorder %s2150_s20, %s2719_s7 }
 0x186   :  { %p2156_p7 = pnand %p2154_p6, %p2151_p5 }
 0x188   :  { %2159 = shalt.err (!%p2156_p7)
}
 0x189   :  { %s2163_s25 = smov 64   ;;  %s2164_s26 = smov 4  }
 0x18a   :  { %1504 = dma.vmem_to_hbm [thread:$0]  %s1499_s5, 1024, %s2719_s7, [#allocation3], %s2163_s25, %s2163_s25, %s2164_s26  }
 0x18b   :  { %2160 = dma.done.wait [#allocation3], 1024  }
 0x18c   :  { %2161 = vsyncadd [#allocation3], 4294966272 }
 0x18d   :  { %1508 = vsyncpa [#allocation3], 1 }

// kernel: bottleneck_forward.2
= control target key start
LH: loop header
LB: loop body
LE: loop exit
PB: predicated region body
PF: predicated region fallthrough
CT: control target
= control target key end

     0   :  { %s6424_s24 = smov 0   ;;  %s7892_s0 = inlined_call_operand.vmem [shape: bf16[2,256,128], index: 0, kind: input, shape index: {}]   ;;  %s7893_s1 = inlined_call_operand.vmem [shape: bf16[128,128], index: 1, kind: input, shape index: {}]   ;;  %s7894_s2 = inlined_call_operand.vmem [shape: f32[1,128], index: 2, kind: input, shape index: {}]   ;;  %s7895_s3 = inlined_call_operand.vmem [shape: f32[1,128], index: 3, kind: input, shape index: {}]   ;;  %s7896_s4 = inlined_call_operand.vmem [shape: bf16[9,128,128], index: 4, kind: input, shape index: {}]   ;;  %s7897_s5 = inlined_call_operand.vmem [shape: f32[1,128], index: 5, kind: input, shape index: {}]   ;;  %s7898_s6 = inlined_call_operand.vmem [shape: f32[1,128], index: 6, kind: input, shape index: {}]   ;;  %s7899_s7 = inlined_call_operand.vmem [shape: bf16[2,256,128], index: 7, kind: output, shape index: {}]  }
   0x1 LB: > { %s4760_s25 = sadd.s32 4294967295, %s6378_s24   ;;  %p4764_p0 = scmp.ge.s32.totalorder %s6378_s24, 1  ;;  %s6378_s24 = sphi %s6424_s24, %s17_s24  }
   0x2   : > { %p237_p1 = scmp.lt.s32.totalorder %s6378_s24, 3 }
   0x4   : > { %p238_p2 = pnand %p4764_p0, %p237_p1 }
   0x6   : > { %241 = sbr.rel (%p238_p2) target bundleno = 808 (0x328), region = 48 }
   0xd   : > { %v6275_v0 = vld [vmem:[%s7893_s1] sm:$0xff]   ;;  %p269_p3 = scmp.lt.s32.totalorder %s4760_s25, 1  ;;  %v6276_v1 = vld [vmem:[%s7893_s1 + $0x8] sm:$0xff]   ;;  %v6277_v2 = vld [vmem:[%s7893_s1 + $0x10] sm:$0xff]   ;;  %v6380_v40 = vmov 0.0   ;;  %v6381_v41 = vmov 0.0|0.0   ;;  %v785_v44 = vlaneseq }
   0xe   : > { %5528 = vmatprep.subr.bf16.mxu0 %v6275_v0  ;;  %v6278_v3 = vld [vmem:[%s7893_s1 + $0x18] sm:$0xff]   ;;  %v6279_v5 = vld [vmem:[%s7893_s1 + $0x20] sm:$0xff]   ;;  %v6280_v6 = vld [vmem:[%s7893_s1 + $0x28] sm:$0xff]   ;;  %745 = vst [vmem:[#allocation2] sm:$0xff] %v6380_v40  ;;  %vm6382_vm0 = vmmov 1   ;;  %v7920_v58 = vmov 0  }
   0xf   : > { %s8157_s25 = smov (!%p269_p3, %s4760_s25), 1  ;;  %5529 = vmatpush3.bf16.msra.mxu0 %v6275_v0  ;;  %v6281_v7 = vld [vmem:[%s7893_s1 + $0x30] sm:$0xff]   ;;  %v6282_v8 = vld [vmem:[%s7893_s1 + $0x38] sm:$0xff]   ;;  %v6300_v9 = vld [vmem:[%s7896_s4 + $0x100] sm:$0xff]   ;;  %747 = vst [vmem:[#allocation2 + $0x10] sm:$0xff] %v6380_v40  ;;  %v6536_v45 = vshrl.u32 %v785_v44, 7 }
  0x10   : > { %5530 = vmatprep.subr.bf16.mxu0 %v6276_v1  ;;  %s5159_s9 = sshll.u32 %s8157_s25, 7  ;;  %5768 = vmatprep.subr.bf16.mxu1 %v6300_v9  ;;  %v6302_v10 = vld [vmem:[%s7896_s4 + $0x108] sm:$0xff]   ;;  %v6299_v12 = vld [vmem:[%s7896_s4 + $0x40] sm:$0xff]   ;;  %v6304_v14 = vld [vmem:[%s7896_s4 + $0x110] sm:$0xff]   ;;  %748 = vst [vmem:[#allocation2 + $0x18] sm:$0xff] %v6380_v40 }
  0x11   : > { %s6449_s12 = scalar_lea.vmem %s7892_s0, %s5159_s9  ;;  %5769 = vmatpush3.bf16.msra.mxu1 %v6300_v9  ;;  %v6301_v15 = vld [vmem:[%s7896_s4 + $0x48] sm:$0xff]   ;;  %v6303_v16 = vld [vmem:[%s7896_s4 + $0x50] sm:$0xff]   ;;  %v6305_v30 = vld [vmem:[%s7896_s4 + $0x58] sm:$0xff]   ;;  %746 = vst [vmem:[#allocation2 + $0x8] sm:$0xff] %v6380_v40  ;;  %v817_v46 = vadd.s32 248, %v6536_v45  ;;  %s7791_s18 = scalar_lea.vmem %s7899_s7, %s5159_s9 }
  0x12   : > { %v6283_v4 = vld [vmem:[%s6449_s12] sm:$0xff]   ;;  %v6284_v11 = vld [vmem:[%s6449_s12 + $0x8] sm:$0xff]   ;;  %v6285_v13 = vld [vmem:[%s6449_s12 + $0x10] sm:$0xff]   ;;  %5770 = vmatprep.subr.bf16.mxu1 %v6302_v10  ;;  %749 = vst [vmem:[#allocation2 + $0x120] sm:$0xff] %v6380_v40 }
  0x13   : > { %5531 = vmatpush3.bf16.msra.mxu0 %v6276_v1  ;;  %5544 = vmatprep.mubr.bf16.mxu0 %v6283_v4  ;;  %v6286_v17 = vld [vmem:[%s6449_s12 + $0x18] sm:$0xff]   ;;  %v6287_v18 = vld [vmem:[%s6449_s12 + $0x20] sm:$0xff]   ;;  %v6288_v19 = vld [vmem:[%s6449_s12 + $0x28] sm:$0xff]   ;;  %750 = vst [vmem:[#allocation2 + $0x128] sm:$0xff] %v6380_v40  ;;  %v1039_v48 = vand.u32 15, %v817_v46 }
  0x14   : > { %5532 = vmatprep.subr.bf16.mxu0 %v6277_v2  ;;  %v6289_v20 = vld [vmem:[%s6449_s12 + $0x30] sm:$0xff]   ;;  %v6290_v21 = vld [vmem:[%s6449_s12 + $0x38] sm:$0xff]   ;;  %v6291_v22 = vld [vmem:[%s6449_s12 + $0x40] sm:$0xff]   ;;  %751 = vst [vmem:[#allocation2 + $0x130] sm:$0xff] %v6380_v40 }
  0x15   : > { %5771 = vmatpush3.bf16.msra.mxu1 %v6302_v10  ;;  %v6292_v23 = vld [vmem:[%s6449_s12 + $0x48] sm:$0xff]   ;;  %v6293_v24 = vld [vmem:[%s6449_s12 + $0x50] sm:$0xff]   ;;  %v6294_v25 = vld [vmem:[%s6449_s12 + $0x58] sm:$0xff]   ;;  %vm2068_vm2 = vcmp.ne.s32.totalorder %v1039_v48, 15 }
  0x16   : > { %5772 = vmatprep.subr.bf16.mxu1 %v6304_v14  ;;  %v6295_v26 = vld [vmem:[%s6449_s12 + $0x60] sm:$0xff]   ;;  %v6296_v27 = vld [vmem:[%s6449_s12 + $0x68] sm:$0xff]   ;;  %v6297_v28 = vld [vmem:[%s6449_s12 + $0x70] sm:$0xff]  }
  0x17   : > { %5533 = vmatpush3.bf16.msra.mxu0 %v6277_v2  ;;  %v6298_v29 = vld [vmem:[%s6449_s12 + $0x78] sm:$0xff]   ;;  %v6307_v32 = vld [vmem:[%s7896_s4 + $0x60] sm:$0xff]   ;;  %v6309_v34 = vld [vmem:[%s7896_s4 + $0x68] sm:$0xff]  }
  0x18   : > { %5534 = vmatprep.subr.bf16.mxu0 %v6278_v3  ;;  %v6306_v31 = vld [vmem:[%s7896_s4 + $0x118] sm:$0xff]   ;;  %v6308_v33 = vld [vmem:[%s7896_s4 + $0x120] sm:$0xff]   ;;  %v6310_v35 = vld [vmem:[%s7896_s4 + $0x128] sm:$0xff]  }
  0x19   : > { %5773 = vmatpush3.bf16.msra.mxu1 %v6304_v14  ;;  %v6311_v36 = vld [vmem:[%s7896_s4 + $0x70] sm:$0xff]   ;;  %v6313_v38 = vld [vmem:[%s7896_s4 + $0x78] sm:$0xff]   ;;  %v6315_v42 = vld [vmem:[%s7896_s4 + $0x140] sm:$0xff]  }
  0x1a   : > { %5774 = vmatprep.subr.bf16.mxu1 %v6306_v31  ;;  %v6312_v37 = vld [vmem:[%s7896_s4 + $0x130] sm:$0xff]   ;;  %v6314_v39 = vld [vmem:[%s7896_s4 + $0x138] sm:$0xff]   ;;  %v6319_v43 = vld [vmem:[%s7896_s4] sm:$0xff]  }
  0x1b   : > { %5535 = vmatpush3.bf16.msra.mxu0 %v6278_v3  ;;  %v6542_v47 = vld [vmem:[%s7894_s2] ss:$0 sm:$0xff]  ;;  %vm1347_vm1 = vmpackc.low %vm6382_vm0, %vm6382_vm0 }
  0x1c   : > { %5536 = vmatprep.subr.bf16.mxu0 %v6279_v5  ;;  %v6547_v50 = vld [vmem:[%s7895_s3] ss:$0 sm:$0xff]  ;;  %vm2164_vm3 = vmpackc.low %vm2068_vm2, %vm2068_vm2  ;;  %v6554_v59 = vsel %vm1347_vm1, 65537, %v7920_v58 }
  0x1d   : > { %5775 = vmatpush3.bf16.msra.mxu1 %v6306_v31  ;;  %v6557_v60 = vsel %vm2164_vm3, 65537, %v7920_v58 }
  0x1e   : > { %5776 = vmatprep.subr.bf16.mxu1 %v6308_v33 }
  0x1f   : > { %5537 = vmatpush3.bf16.msra.mxu0 %v6279_v5 }
  0x20   : > { %5538 = vmatprep.subr.bf16.mxu0 %v6280_v6 }
  0x21   : > { %5777 = vmatpush3.bf16.msra.mxu1 %v6308_v33 }
  0x22   : > { %5778 = vmatprep.subr.bf16.mxu1 %v6310_v35 }
  0x23   : > { %5539 = vmatpush3.bf16.msra.mxu0 %v6280_v6 }
  0x24   : > { %5540 = vmatprep.subr.bf16.mxu0 %v6281_v7 }
  0x25   : > { %5779 = vmatpush3.bf16.msra.mxu1 %v6310_v35 }
  0x26   : > { %5780 = vmatprep.subr.bf16.mxu1 %v6312_v37 }
  0x27   : > { %5541 = vmatpush3.bf16.msra.mxu0 %v6281_v7 }
  0x28   : > { %5542 = vmatprep.subr.bf16.mxu0 %v6282_v8 }
  0x29   : > { %5781 = vmatpush3.bf16.msra.mxu1 %v6312_v37 }
  0x2a   : > { %5782 = vmatprep.subr.bf16.mxu1 %v6314_v39 }
  0x2b   : > { %5543 = vmatpush3.bf16.msra.mxu0 %v6282_v8 }
  0x2c   : > { %5576 = vmatprep.subr.bf16.mxu0 %v6299_v12 }
  0x2d   : > { %5783 = vmatpush3.bf16.msra.mxu1 %v6314_v39  ;;  %v6324_v39 = vld [vmem:[%s7896_s4 + $0x18] sm:$0xff]  }
  0x2e   : > { %5545 = vmatmul.mubr.bf16.vlgmr.msra.gmra.mrb[0].mxu0 %v6284_v11  ;;  %5816 = vmatprep.subr.bf16.mxu1 %v6315_v42 }
  0x2f   : > { %5548 = vmatprep.mubr.bf16.mxu0 %v6285_v13  ;;  %5577 = vmatpush3.bf16.msra.mxu0 %v6299_v12 }
  0x30   : > { %5578 = vmatprep.subr.bf16.mxu0 %v6301_v15 }
  0x33   : > { %5579 = vmatpush3.bf16.msra.mxu0 %v6301_v15 }
  0x34   : > { %5580 = vmatprep.subr.bf16.mxu0 %v6303_v16 }
  0x36   : > { %5549 = vmatmul.mubr.bf16.gmra.mrb[4].mxu0 %v6286_v17  ;;  %v6321_v17 = vld [vmem:[%s7896_s4 + $0x8] sm:$0xff]  }
  0x37   : > { %5552 = vmatprep.mubr.bf16.mxu0 %v6287_v18  ;;  %5581 = vmatpush3.bf16.msra.mxu0 %v6303_v16  ;;  %v6316_v16 = vld [vmem:[%s7896_s4 + $0x148] sm:$0xff]  }
  0x38   : > { %5582 = vmatprep.subr.bf16.mxu0 %v6305_v30 }
  0x3b   : > { %5583 = vmatpush3.bf16.msra.mxu0 %v6305_v30 }
  0x3c   : > { %5584 = vmatprep.subr.bf16.mxu0 %v6307_v32 }
  0x3e   : > { %5553 = vmatmul.mubr.bf16.gmra.mrb[8].mxu0 %v6288_v19 }
  0x3f   : > { %5556 = vmatprep.mubr.bf16.mxu0 %v6289_v20  ;;  %5585 = vmatpush3.bf16.msra.mxu0 %v6307_v32 }
  0x40   : > { %5586 = vmatprep.subr.bf16.mxu0 %v6309_v34 }
  0x43   : > { %5587 = vmatpush3.bf16.msra.mxu0 %v6309_v34 }
  0x44   : > { %5588 = vmatprep.subr.bf16.mxu0 %v6311_v36 }
  0x46   : > { %5557 = vmatmul.mubr.bf16.gmra.mrb[12].mxu0 %v6290_v21 }
  0x47   : > { %5560 = vmatprep.mubr.bf16.mxu0 %v6291_v22  ;;  %5589 = vmatpush3.bf16.msra.mxu0 %v6311_v36 }
  0x48   : > { %5590 = vmatprep.subr.bf16.mxu0 %v6313_v38 }
  0x4b   : > { %5591 = vmatpush3.bf16.msra.mxu0 %v6313_v38  ;;  %v6318_v38 = vld [vmem:[%s7896_s4 + $0x158] sm:$0xff]  }
  0x4c   : > { %5624 = vmatprep.subr.bf16.mxu0 %v6319_v43 }
  0x4e   : > { %5561 = vmatmul.mubr.bf16.gmra.mrb[16].mxu0 %v6292_v23 }
  0x4f   : > { %5564 = vmatprep.mubr.bf16.mxu0 %v6293_v24 }
  0x56   : > { %5565 = vmatmul.mubr.bf16.gmra.mrb[20].mxu0 %v6294_v25  ;;  %v6317_v25 = vld [vmem:[%s7896_s4 + $0x150] sm:$0xff]  }
  0x57   : > { %5568 = vmatprep.mubr.bf16.mxu0 %v6295_v26  ;;  %v6322_v26 = vld [vmem:[%s7896_s4 + $0x10] sm:$0xff]  }
  0x5e   : > { %5569 = vmatmul.mubr.bf16.gmra.mrb[24].mxu0 %v6296_v27 }
  0x5f   : > { %5572 = vmatprep.mubr.bf16.mxu0 %v6297_v28 }
  0x66   : > { %5573 = vmatmul.mubr.bf16.gmra.mrb[28].mxu0 %v6298_v29 }
  0x67   : > { %5592 = vmatprep.mubr.bf16.mxu0 %v6381_v41 }
 0x101   : > { %v5546_v49 = vpop.f32.mrb[0].mxu0 }
 0x102   : > { %v644_v51 = vmul.f32 %v5546_v49, %v6542_v47  ;;  %v508_v52 = vpop.f32.mrb[1].mxu0  ;;  %v6320_v49 = vld [vmem:[%s7896_s4 + $0x160] sm:$0xff]  }
 0x103   : > { %v642_v53 = vmul.f32 %v6542_v47, %v508_v52  ;;  %v5547_v54 = vpop.f32.mrb[2].mxu0 }
 0x104   : > { %v683_v55 = vadd.f32 %v6547_v50, %v644_v51  ;;  %v645_v56 = vmul.f32 %v5547_v54, %v6542_v47  ;;  %v511_v57 = vpop.f32.mrb[3].mxu0  ;;  %v6325_v51 = vld [vmem:[%s7896_s4 + $0x20] sm:$0xff]  }
 0x105   : > { %v681_v61 = vadd.f32 %v6547_v50, %v642_v53  ;;  %v643_v62 = vmul.f32 %v6542_v47, %v511_v57 }
 0x106   : > { %v715_v0 = vmax.f32 %v683_v55, 0.0  ;;  %v684_v1 = vadd.f32 %v6547_v50, %v645_v56 }
 0x107   : > { %v713_v2 = vmax.f32 %v681_v61, 0.0  ;;  %v682_v3 = vadd.f32 %v6547_v50, %v643_v62 }
 0x108   : > { %755 = vst [vmem:[#allocation2 + $0x30] sm:$0xff] %v715_v0  ;;  %v716_v4 = vmax.f32 %v684_v1, 0.0 }
 0x109   : > { %753 = vst [vmem:[#allocation2 + $0x20] sm:$0xff] %v713_v2  ;;  %v714_v5 = vmax.f32 %v682_v3, 0.0  ;;  %v5550_v6 = vpop.f32.mrb[4].mxu0  ;;  %v6323_v3 = vld [vmem:[%s7896_s4 + $0x168] sm:$0xff]  }
 0x10a   : > { %756 = vst [vmem:[#allocation2 + $0x38] sm:$0xff] %v716_v4  ;;  %v648_v7 = vmul.f32 %v5550_v6, %v6542_v47  ;;  %v524_v8 = vpop.f32.mrb[5].mxu0  ;;  %v1540_v9 = vpack.c.bf16 %v716_v4, %v715_v0  ;;  %v6327_v4 = vld [vmem:[%s7896_s4 + $0x28] sm:$0xff]  }
 0x10b   : > { %754 = vst [vmem:[#allocation2 + $0x28] sm:$0xff] %v714_v5  ;;  %v646_v10 = vmul.f32 %v6542_v47, %v524_v8  ;;  %v5551_v11 = vpop.f32.mrb[6].mxu0  ;;  %v1539_v12 = vpack.c.bf16 %v714_v5, %v713_v2 }
 0x10c   : > { %v687_v13 = vadd.f32 %v6547_v50, %v648_v7  ;;  %v649_v14 = vmul.f32 %v5551_v11, %v6542_v47  ;;  %v527_v15 = vpop.f32.mrb[7].mxu0 }
 0x10d   : > { %v685_v18 = vadd.f32 %v6547_v50, %v646_v10  ;;  %v647_v19 = vmul.f32 %v6542_v47, %v527_v15  ;;  %5593 = vmatmul.mubr.bf16.vlgmr.msra.gmra.mrb[32].mxu0 %v1539_v12  ;;  %5784 = vmatprep.mubr.bf16.mxu1 %v1539_v12  ;;  %v6326_v12 = vld [vmem:[%s7896_s4 + $0x170] sm:$0xff]  }
 0x10e   : > { %v719_v20 = vmax.f32 %v687_v13, 0.0  ;;  %v688_v21 = vadd.f32 %v6547_v50, %v649_v14  ;;  %5596 = vmatprep.mubr.bf16.mxu0 %v1540_v9  ;;  %5785 = vmatmul.mubr.bf16.vlgmr.msra.gmra.mrb[0].mxu1 %v1540_v9  ;;  %v6328_v13 = vld [vmem:[%s7896_s4 + $0x30] sm:$0xff]  }
 0x10f   : > { %v717_v22 = vmax.f32 %v685_v18, 0.0  ;;  %v686_v23 = vadd.f32 %v6547_v50, %v647_v19  ;;  %5817 = vmatpush3.bf16.msra.mxu1 %v6315_v42  ;;  %5625 = vmatpush3.bf16.msra.mxu0 %v6319_v43 }
 0x110   : > { %759 = vst [vmem:[#allocation2 + $0x50] sm:$0xff] %v719_v20  ;;  %v720_v24 = vmax.f32 %v688_v21, 0.0  ;;  %5818 = vmatprep.subr.bf16.mxu1 %v6316_v16  ;;  %5626 = vmatprep.subr.bf16.mxu0 %v6321_v17 }
 0x111   : > { %757 = vst [vmem:[#allocation2 + $0x40] sm:$0xff] %v717_v22  ;;  %v718_v27 = vmax.f32 %v686_v23, 0.0  ;;  %v5554_v28 = vpop.f32.mrb[8].mxu0 }
 0x112   : > { %760 = vst [vmem:[#allocation2 + $0x58] sm:$0xff] %v720_v24  ;;  %v652_v29 = vmul.f32 %v5554_v28, %v6542_v47  ;;  %v540_v30 = vpop.f32.mrb[9].mxu0  ;;  %v1542_v31 = vpack.c.bf16 %v720_v24, %v719_v20 }
 0x113   : > { %758 = vst [vmem:[#allocation2 + $0x48] sm:$0xff] %v718_v27  ;;  %v650_v32 = vmul.f32 %v6542_v47, %v540_v30  ;;  %v5555_v33 = vpop.f32.mrb[10].mxu0  ;;  %v1541_v34 = vpack.c.bf16 %v718_v27, %v717_v22  ;;  %5819 = vmatpush3.bf16.msra.mxu1 %v6316_v16  ;;  %5627 = vmatpush3.bf16.msra.mxu0 %v6321_v17 }
 0x114   : > { %v691_v35 = vadd.f32 %v6547_v50, %v652_v29  ;;  %v653_v36 = vmul.f32 %v5555_v33, %v6542_v47  ;;  %v543_v37 = vpop.f32.mrb[11].mxu0  ;;  %5820 = vmatprep.subr.bf16.mxu1 %v6317_v25  ;;  %5628 = vmatprep.subr.bf16.mxu0 %v6322_v26  ;;  %v787_v29 = vadd.s32 8, %v6536_v45 }
 0x115   : > { %v689_v40 = vadd.f32 %v6547_v50, %v650_v32  ;;  %v651_v41 = vmul.f32 %v6542_v47, %v543_v37  ;;  %5597 = vmatmul.mubr.bf16.gmra.mrb[36].mxu0 %v1541_v34  ;;  %5788 = vmatprep.mubr.bf16.mxu1 %v1541_v34 }
 0x116   : > { %v723_v42 = vmax.f32 %v691_v35, 0.0  ;;  %v692_v43 = vadd.f32 %v6547_v50, %v653_v36  ;;  %5600 = vmatprep.mubr.bf16.mxu0 %v1542_v31  ;;  %5789 = vmatmul.mubr.bf16.gmra.mrb[4].mxu1 %v1542_v31  ;;  %v6643_v35 = vld [vmem:[%s7896_s4 + $0x180] sm:$0xff]  }
 0x117   : > { %v721_v44 = vmax.f32 %v689_v40, 0.0  ;;  %v690_v46 = vadd.f32 %v6547_v50, %v651_v41  ;;  %5821 = vmatpush3.bf16.msra.mxu1 %v6317_v25  ;;  %5629 = vmatpush3.bf16.msra.mxu0 %v6322_v26  ;;  %v6329_v25 = vld [vmem:[%s7896_s4 + $0x178] sm:$0xff]  }
 0x118   : > { %763 = vst [vmem:[#allocation2 + $0x70] sm:$0xff] %v723_v42  ;;  %v724_v48 = vmax.f32 %v692_v43, 0.0  ;;  %5822 = vmatprep.subr.bf16.mxu1 %v6318_v38  ;;  %5630 = vmatprep.subr.bf16.mxu0 %v6324_v39  ;;  %v6330_v26 = vld [vmem:[%s7896_s4 + $0x38] sm:$0xff]  }
 0x119   : > { %761 = vst [vmem:[#allocation2 + $0x60] sm:$0xff] %v721_v44  ;;  %v722_v52 = vmax.f32 %v690_v46, 0.0  ;;  %v5558_v53 = vpop.f32.mrb[12].mxu0  ;;  %v6650_v46 = vld [vmem:[%s7896_s4 + $0x80] sm:$0xff]  }
 0x11a   : > { %764 = vst [vmem:[#allocation2 + $0x78] sm:$0xff] %v724_v48  ;;  %v656_v54 = vmul.f32 %v5558_v53, %v6542_v47  ;;  %v556_v55 = vpop.f32.mrb[13].mxu0  ;;  %v1544_v56 = vpack.c.bf16 %v724_v48, %v723_v42 }
 0x11b   : > { %762 = vst [vmem:[#allocation2 + $0x68] sm:$0xff] %v722_v52  ;;  %v654_v57 = vmul.f32 %v6542_v47, %v556_v55  ;;  %v5559_v61 = vpop.f32.mrb[14].mxu0  ;;  %v1543_v62 = vpack.c.bf16 %v722_v52, %v721_v44  ;;  %5823 = vmatpush3.bf16.msra.mxu1 %v6318_v38  ;;  %5631 = vmatpush3.bf16.msra.mxu0 %v6324_v39  ;;  %v829_v38 = vand.u32 15, %v787_v29  ;;  %v788_v55 = vadd.s32 16, %v6536_v45 }
 0x11c   : > { %v695_v0 = vadd.f32 %v6547_v50, %v656_v54  ;;  %v657_v1 = vmul.f32 %v5559_v61, %v6542_v47  ;;  %v559_v2 = vpop.f32.mrb[15].mxu0  ;;  %5824 = vmatprep.subr.bf16.mxu1 %v6320_v49  ;;  %5632 = vmatprep.subr.bf16.mxu0 %v6325_v51  ;;  %v805_v54 = vadd.s32 152, %v6536_v45 }
 0x11d   : > { %v693_v5 = vadd.f32 %v6547_v50, %v654_v57  ;;  %v655_v6 = vmul.f32 %v6542_v47, %v559_v2  ;;  %5601 = vmatmul.mubr.bf16.gmra.mrb[40].mxu0 %v1543_v62  ;;  %5792 = vmatprep.mubr.bf16.mxu1 %v1543_v62  ;;  %vm6657_vm4 = vcmp.ne.s32.totalorder %v829_v38, 15  ;;  %v790_v2 = vadd.s32 32, %v6536_v45 }
 0x11e   : > { %v727_v7 = vmax.f32 %v695_v0, 0.0  ;;  %v696_v8 = vadd.f32 %v6547_v50, %v657_v1  ;;  %5604 = vmatprep.mubr.bf16.mxu0 %v1544_v56  ;;  %5793 = vmatmul.mubr.bf16.gmra.mrb[8].mxu1 %v1544_v56  ;;  %vm2134_vm5 = vmpackc.low %vm6657_vm4, %vm6657_vm4  ;;  %v822_v1 = vand.u32 15, %v6536_v45 }
 0x11f   : > { %v725_v9 = vmax.f32 %v693_v5, 0.0  ;;  %v694_v10 = vadd.f32 %v6547_v50, %v655_v6  ;;  %5825 = vmatpush3.bf16.msra.mxu1 %v6320_v49  ;;  %5633 = vmatpush3.bf16.msra.mxu0 %v6325_v51  ;;  %v836_v5 = vand.u32 15, %v788_v55  ;;  %v789_v6 = vadd.s32 24, %v6536_v45 }
 0x120   : > { %767 = vst [vmem:[#allocation2 + $0x90] sm:$0xff] %v727_v7  ;;  %v728_v11 = vmax.f32 %v696_v8, 0.0  ;;  %5826 = vmatprep.subr.bf16.mxu1 %v6323_v3  ;;  %5634 = vmatprep.subr.bf16.mxu0 %v6327_v4  ;;  %vm6684_vm6 = vcmp.ne.s32.totalorder %v822_v1, 0 }
 0x121   : > { %765 = vst [vmem:[#allocation2 + $0x80] sm:$0xff] %v725_v9  ;;  %v726_v14 = vmax.f32 %v694_v10, 0.0  ;;  %v5562_v15 = vpop.f32.mrb[16].mxu0  ;;  %vm6690_vm7 = vcmp.ne.s32.totalorder %v836_v5, 0  ;;  %vm1346_vm8 = vmpackc.low %vm6684_vm6, %vm6684_vm6 }
 0x122   : > { %768 = vst [vmem:[#allocation2 + $0x98] sm:$0xff] %v728_v11  ;;  %v660_v16 = vmul.f32 %v5562_v15, %v6542_v47  ;;  %v572_v17 = vpop.f32.mrb[17].mxu0  ;;  %v1546_v18 = vpack.c.bf16 %v728_v11, %v727_v7  ;;  %vm1348_vm9 = vmpackc.low %vm6690_vm7, %vm6690_vm7 }
 0x123   : > { %766 = vst [vmem:[#allocation2 + $0x88] sm:$0xff] %v726_v14  ;;  %v658_v19 = vmul.f32 %v6542_v47, %v572_v17  ;;  %v5563_v20 = vpop.f32.mrb[18].mxu0  ;;  %v1545_v21 = vpack.c.bf16 %v726_v14, %v725_v9  ;;  %5827 = vmatpush3.bf16.msra.mxu1 %v6323_v3  ;;  %5635 = vmatpush3.bf16.msra.mxu0 %v6327_v4  ;;  %v791_v14 = vadd.s32 40, %v6536_v45 }
 0x124   : > { %v699_v22 = vadd.f32 %v6547_v50, %v660_v16  ;;  %v661_v23 = vmul.f32 %v5563_v20, %v6542_v47  ;;  %v575_v24 = vpop.f32.mrb[19].mxu0  ;;  %5828 = vmatprep.subr.bf16.mxu1 %v6326_v12  ;;  %5636 = vmatprep.subr.bf16.mxu0 %v6328_v13 }
 0x125   : > { %v697_v27 = vadd.f32 %v6547_v50, %v658_v19  ;;  %v659_v28 = vmul.f32 %v6542_v47, %v575_v24  ;;  %5605 = vmatmul.mubr.bf16.gmra.mrb[44].mxu0 %v1545_v21  ;;  %5796 = vmatprep.mubr.bf16.mxu1 %v1545_v21  ;;  %v850_v19 = vand.u32 15, %v790_v2 }
 0x126   : > { %v731_v30 = vmax.f32 %v699_v22, 0.0  ;;  %v700_v31 = vadd.f32 %v6547_v50, %v661_v23  ;;  %5608 = vmatprep.mubr.bf16.mxu0 %v1546_v18  ;;  %5797 = vmatmul.mubr.bf16.gmra.mrb[12].mxu1 %v1546_v18  ;;  %v843_v23 = vand.u32 15, %v789_v6  ;;  %v798_v18 = vadd.s32 96, %v6536_v45 }
 0x127   : > { %v729_v32 = vmax.f32 %v697_v27, 0.0  ;;  %v698_v33 = vadd.f32 %v6547_v50, %v659_v28  ;;  %5829 = vmatpush3.bf16.msra.mxu1 %v6326_v12  ;;  %5637 = vmatpush3.bf16.msra.mxu0 %v6328_v13  ;;  %v6679_v13 = vsel %vm2134_vm5, 65537, %v7920_v58  ;;  %v6697_v27 = vld [vmem:[#allocation2 + $0x17] sm:$0xff]  ;;  %vm6708_vm10 = vcmp.ne.s32.totalorder %v850_v19, 0 }
 0x128   : > { %771 = vst [vmem:[#allocation2 + $0xb0] sm:$0xff] %v731_v30  ;;  %v732_v34 = vmax.f32 %v700_v31, 0.0  ;;  %5830 = vmatprep.subr.bf16.mxu1 %v6329_v25  ;;  %5638 = vmatprep.subr.bf16.mxu0 %v6330_v26  ;;  %vm6715_vm11 = vcmp.ne.s32.totalorder %v843_v23, 15  ;;  %vm1350_vm12 = vmpackc.low %vm6708_vm10, %vm6708_vm10  ;;  %v6333_v23 = vld [vmem:[%s7896_s4 + $0x190] sm:$0xff]  }
 0x129   : > { %769 = vst [vmem:[#allocation2 + $0xa0] sm:$0xff] %v729_v32  ;;  %v730_v36 = vmax.f32 %v698_v33, 0.0  ;;  %v5566_v37 = vpop.f32.mrb[20].mxu0  ;;  %vm2136_vm14 = vmpackc.low %vm6715_vm11, %vm6715_vm11  ;;  %v1211_v33 = vld [vmem:[#allocation2 + $0x57] sm:$0xff] }
 0x12a   : > { %772 = vst [vmem:[#allocation2 + $0xb8] sm:$0xff] %v732_v34  ;;  %v664_v39 = vmul.f32 %v5566_v37, %v6542_v47  ;;  %v588_v40 = vpop.f32.mrb[21].mxu0  ;;  %v1548_v41 = vpack.c.bf16 %v732_v34, %v731_v30  ;;  %v857_v30 = vand.u32 15, %v791_v14  ;;  %v792_v34 = vadd.s32 48, %v6536_v45 }
 0x12b   : > { %770 = vst [vmem:[#allocation2 + $0xa8] sm:$0xff] %v730_v36  ;;  %v662_v42 = vmul.f32 %v6542_v47, %v588_v40  ;;  %v5567_v43 = vpop.f32.mrb[22].mxu0  ;;  %v1547_v44 = vpack.c.bf16 %v730_v36, %v729_v32  ;;  %5831 = vmatpush3.bf16.msra.mxu1 %v6329_v25  ;;  %5639 = vmatpush3.bf16.msra.mxu0 %v6330_v26  ;;  %v6695_v26 = vld [vmem:[#allocation2 + $0xf] sm:$0xff]  ;;  %v794_v40 = vadd.s32 64, %v6536_v45  ;;  %v796_v14 = vadd.s32 80, %v6536_v45 }
 0x12c   : > { %v703_v48 = vadd.f32 %v6547_v50, %v664_v39  ;;  %v665_v49 = vmul.f32 %v5567_v43, %v6542_v47  ;;  %v591_v51 = vpop.f32.mrb[23].mxu0  ;;  %5864 = vmatprep.subr.bf16.mxu1 %v6643_v35  ;;  %5672 = vmatprep.subr.bf16.mxu0 %v6650_v46  ;;  %v4859_v32 = vcombine.low %v6554_v59, %v6679_v13  ;;  %vm6738_vm13 = vcmp.ne.s32.totalorder %v857_v30, 15 }
 0x12d   : > { %v701_v52 = vadd.f32 %v6547_v50, %v662_v42  ;;  %v663_v53 = vmul.f32 %v6542_v47, %v591_v51  ;;  %5609 = vmatmul.mubr.bf16.gmra.mrb[48].mxu0 %v1547_v44  ;;  %5800 = vmatprep.mubr.bf16.mxu1 %v1547_v44  ;;  %v1234_v38 = vpack.c.bf16 %v6697_v27, %v6695_v26  ;;  %v1378_v44 = vsel %vm1346_vm8, 65537, %v7920_v58  ;;  %vm2138_vm15 = vmpackc.low %vm6738_vm13, %vm6738_vm13 }
 0x12e   : > { %v735_v56 = vmax.f32 %v703_v48, 0.0  ;;  %v704_v57 = vadd.f32 %v6547_v50, %v665_v49  ;;  %5612 = vmatprep.mubr.bf16.mxu0 %v1548_v41  ;;  %5801 = vmatmul.mubr.bf16.gmra.mrb[16].mxu1 %v1548_v41  ;;  %v793_v48 = vadd.s32 56, %v6536_v45  ;;  %v4795_v2 = vcombine.low %v1378_v44, %v6554_v59 }
 0x12f   : > { %v733_v61 = vmax.f32 %v701_v52, 0.0  ;;  %v702_v62 = vadd.f32 %v6547_v50, %v663_v53  ;;  %v1380_v53 = vsel %vm1348_vm9, 65537, %v7920_v58  ;;  %v2170_v22 = vsel %vm2138_vm15, 65537, %v7920_v58 }
 0x130   : > { %775 = vst [vmem:[#allocation2 + $0xd0] sm:$0xff] %v735_v56  ;;  %v736_v0 = vmax.f32 %v704_v57, 0.0  ;;  %v4796_v6 = vcombine.low %v1380_v53, %v6554_v59  ;;  %vm6774_vm1 = vcmp.ne.s16.totalorder %v4795_v2, 0  ;;  %v799_v30 = vadd.s32 104, %v6536_v45 }
 0x131   : > { %773 = vst [vmem:[#allocation2 + $0xc0] sm:$0xff] %v733_v61  ;;  %v734_v3 = vmax.f32 %v702_v62, 0.0  ;;  %v5570_v4 = vpop.f32.mrb[24].mxu0  ;;  %v795_v62 = vadd.s32 72, %v6536_v45  ;;  %vm6798_vm5 = vcmp.ne.s16.totalorder %v4859_v32, 0  ;;  %v906_v13 = vand.u32 15, %v798_v18 }
 0x132   : > { %776 = vst [vmem:[#allocation2 + $0xd8] sm:$0xff] %v736_v0  ;;  %v668_v7 = vmul.f32 %v5570_v4, %v6542_v47  ;;  %v604_v8 = vpop.f32.mrb[25].mxu0  ;;  %v1550_v9 = vpack.c.bf16 %v736_v0, %v735_v56  ;;  %vm6820_vm9 = vcmp.ne.s16.totalorder %v4796_v6, 0  ;;  %v913_v27 = vand.u32 15, %v799_v30  ;;  %v1210_v30 = vld [vmem:[#allocation2 + $0x4f] sm:$0xff]  ;;  %v2543_v32 = vld [vmem:[#allocation2 + $0x5f] sm:$0xff] }
 0x133   : > { %774 = vst [vmem:[#allocation2 + $0xc8] sm:$0xff] %v734_v3  ;;  %v666_v10 = vmul.f32 %v6542_v47, %v604_v8  ;;  %v5571_v11 = vpop.f32.mrb[26].mxu0  ;;  %v1549_v12 = vpack.c.bf16 %v734_v3, %v733_v61  ;;  %v864_v61 = vand.u32 15, %v792_v34  ;;  %v878_v3 = vand.u32 15, %v794_v40 }
 0x134   : > { %v707_v15 = vadd.f32 %v6547_v50, %v668_v7  ;;  %v669_v16 = vmul.f32 %v5571_v11, %v6542_v47  ;;  %v607_v17 = vpop.f32.mrb[27].mxu0  ;;  %v871_v7 = vand.u32 15, %v793_v48  ;;  %v892_v34 = vand.u32 15, %v796_v14 }
 0x135   : > { %v705_v20 = vadd.f32 %v6547_v50, %v666_v10  ;;  %v667_v21 = vmul.f32 %v6542_v47, %v607_v17  ;;  %5613 = vmatmul.mubr.bf16.gmra.mrb[52].mxu0 %v1549_v12  ;;  %5804 = vmatprep.mubr.bf16.mxu1 %v1549_v12  ;;  %v2168_v10 = vsel %vm2136_vm14, 65537, %v7920_v58  ;;  %vm6769_vm0 = vcmp.ne.s32.totalorder %v864_v61, 0  ;;  %v3168_v61 = vld [vmem:[#allocation2 + $0x49] sm:$0xff] }
 0x136   : > { %v739_v24 = vmax.f32 %v707_v15, 0.0  ;;  %v708_v25 = vadd.f32 %v6547_v50, %v669_v16  ;;  %5616 = vmatprep.mubr.bf16.mxu0 %v1550_v9  ;;  %5805 = vmatmul.mubr.bf16.gmra.mrb[20].mxu1 %v1550_v9  ;;  %v885_v12 = vand.u32 15, %v795_v62  ;;  %vm6778_vm2 = vcmp.ne.s32.totalorder %v878_v3, 0  ;;  %vm1352_vm4 = vmpackc.low %vm6769_vm0, %vm6769_vm0  ;;  %v6364_v16 = vld [vmem:[%s7896_s4 + $0x208] sm:$0xff]  }
 0x137   : > { %v737_v28 = vmax.f32 %v705_v20, 0.0  ;;  %v706_v29 = vadd.f32 %v6547_v50, %v667_v21  ;;  %v3163_v20 = vld [vmem:[#allocation2 + $0x21] sm:$0xff]  ;;  %v3164_v21 = vld [vmem:[#allocation2 + $0x29] sm:$0xff]  ;;  %vm6784_vm3 = vcmp.ne.s32.totalorder %v871_v7, 15  ;;  %vm1354_vm6 = vmpackc.low %vm6778_vm2, %vm6778_vm2  ;;  %v7983_v40 = vmov 0 }
 0x138   : > { %779 = vst [vmem:[#allocation2 + $0xf0] sm:$0xff] %v739_v24  ;;  %v740_v31 = vmax.f32 %v708_v25, 0.0  ;;  %vm6805_vm7 = vcmp.ne.s32.totalorder %v885_v12, 15  ;;  %vm2140_vm8 = vmpackc.low %vm6784_vm3, %vm6784_vm3  ;;  %v1384_v26 = vsel %vm1352_vm4, 65537, %v7920_v58  ;;  %vm6851_vm13 = vcmp.ne.s32.totalorder %v892_v34, 0  ;;  %v3170_v34 = vld [vmem:[#allocation2 + $0x59] sm:$0xff] }
 0x139   : > { %777 = vst [vmem:[#allocation2 + $0xe0] sm:$0xff] %v737_v28  ;;  %v738_v36 = vmax.f32 %v706_v29, 0.0  ;;  %v5574_v37 = vpop.f32.mrb[28].mxu0  ;;  %v4860_v29 = vcombine.low %v6554_v59, %v2168_v10  ;;  %v800_v48 = vadd.s32 112, %v6536_v45  ;;  %v7989_v53 = vmov 0  ;;  %vm1356_vm2 = vmpackc.low %vm6851_vm13, %vm6851_vm13 }
 0x13a   : > { %780 = vst [vmem:[#allocation2 + $0xf8] sm:$0xff] %v740_v31  ;;  %v672_v41 = vmul.f32 %v5574_v37, %v6542_v47  ;;  %v620_v42 = vpop.f32.mrb[29].mxu0  ;;  %v1552_v43 = vpack.c.bf16 %v740_v31, %v739_v24  ;;  %v797_v24 = vadd.s32 88, %v6536_v45  ;;  %v7977_v31 = vmov 0  ;;  %v3183_v63 = vld [vmem:[#allocation2 + $0xc1] sm:$0xff] }
 0x13b   : > { %778 = vst [vmem:[#allocation2 + $0xe8] sm:$0xff] %v738_v36  ;;  %v670_v49 = vmul.f32 %v6542_v47, %v620_v42  ;;  %v5575_v51 = vpop.f32.mrb[30].mxu0  ;;  %v1551_v52 = vpack.c.bf16 %v738_v36, %v737_v28  ;;  %v7978_v31 = vsel %vm6798_vm5, 4294967295, %v7977_v31  ;;  %v6809_v36 = vpack.c.bf16 %v3164_v21, %v3163_v20 }
 0x13c   : > { %v711_v55 = vadd.f32 %v6547_v50, %v672_v41  ;;  %v673_v56 = vmul.f32 %v5575_v51, %v6542_v47  ;;  %v623_v57 = vpop.f32.mrb[31].mxu0  ;;  %v4861_v37 = vcombine.low %v6554_v59, %v2170_v22  ;;  %v899_v39 = vand.u32 15, %v797_v24  ;;  %v1207_v51 = vld [vmem:[#allocation2 + $0x37] sm:$0xff]  ;;  %v1209_v22 = vld [vmem:[#allocation2 + $0x47] sm:$0xff] }
 0x13d   : > { %v709_v0 = vadd.f32 %v6547_v50, %v670_v49  ;;  %v671_v1 = vmul.f32 %v6542_v47, %v623_v57  ;;  %5617 = vmatmul.mubr.bf16.gmra.mrb[56].mxu0 %v1551_v52  ;;  %5808 = vmatprep.mubr.bf16.mxu1 %v1551_v52  ;;  %v1382_v47 = vsel %vm1350_vm12, 65537, %v7920_v58  ;;  %vm6831_vm11 = vcmp.ne.s16.totalorder %v4860_v29, 0  ;;  %vm2142_vm12 = vmpackc.low %vm6805_vm7, %vm6805_vm7  ;;  %v1206_v49 = vld [vmem:[#allocation2 + $0x2f] sm:$0xff]  ;;  %v3166_v52 = vld [vmem:[#allocation2 + $0x39] sm:$0xff] }
 0x13e   : > { %v743_v4 = vmax.f32 %v711_v55, 0.0  ;;  %v712_v5 = vadd.f32 %v6547_v50, %v673_v56  ;;  %5620 = vmatprep.mubr.bf16.mxu0 %v1552_v43  ;;  %5809 = vmatmul.mubr.bf16.gmra.mrb[24].mxu1 %v1552_v43  ;;  %v4797_v28 = vcombine.low %v1382_v47, %v6554_v59  ;;  %v7985_v41 = vmov 0  ;;  %v1204_v56 = vld [vmem:[#allocation2 + $0x1f] sm:$0xff]  ;;  %v6332_v47 = vld [vmem:[%s7896_s4 + $0x188] sm:$0xff]   ;;  %v6338_v29 = vld [vmem:[%s7896_s4 + $0x90] sm:$0xff]  }
 0x13f   : > { %v741_v8 = vmax.f32 %v709_v0, 0.0  ;;  %v710_v9 = vadd.f32 %v6547_v50, %v671_v1  ;;  %v7986_v41 = vsel %vm6831_vm11, 4294967295, %v7985_v41  ;;  %v1386_v42 = vsel %vm1354_vm6, 65537, %v7920_v58  ;;  %v3167_v57 = vld [vmem:[#allocation2 + $0x41] sm:$0xff] }
 0x140   : > { %783 = vst [vmem:[#allocation2 + $0x110] sm:$0xff] %v743_v4  ;;  %v744_v50 = vmax.f32 %v712_v5, 0.0  ;;  %vm6827_vm10 = vcmp.ne.s16.totalorder %v4797_v28, 0  ;;  %v2172_v43 = vsel %vm2140_vm8, 65537, %v7920_v58  ;;  %vm6856_vm14 = vcmp.ne.s16.totalorder %v4861_v37, 0 }
 0x141   : > { %781 = vst [vmem:[#allocation2 + $0x100] sm:$0xff] %v741_v8  ;;  %v742_v15 = vmax.f32 %v710_v9, 0.0  ;;  %v7984_v40 = vsel %vm6827_vm10, 4294967295, %v7983_v40  ;;  %v7990_v53 = vsel %vm6856_vm14, 4294967295, %v7989_v53  ;;  %vm6860_vm15 = vcmp.ne.s32.totalorder %v906_v13, 0 }
 0x142   : > { %784 = vst [vmem:[#allocation2 + $0x118] sm:$0xff] %v744_v50  ;;  %v2904_v19 = vpack.c.bf16 %v744_v50, %v743_v4  ;;  %v802_v55 = vadd.s32 128, %v6536_v45  ;;  %v4798_v62 = vcombine.low %v1384_v26, %v6554_v59  ;;  %v2174_v0 = vsel %vm2142_vm12, 65537, %v7920_v58  ;;  %v3165_v4 = vld [vmem:[#allocation2 + $0x31] sm:$0xff]  ;;  %vm1358_vm4 = vmpackc.low %vm6860_vm15, %vm6860_vm15  ;;  %v1208_v26 = vld [vmem:[#allocation2 + $0x3f] sm:$0xff] }
 0x143   : > { %782 = vst [vmem:[#allocation2 + $0x108] sm:$0xff] %v742_v15  ;;  %v1553_v25 = vpack.c.bf16 %v742_v15, %v741_v8  ;;  %vm6872_vm0 = vcmp.ne.s32.totalorder %v899_v39, 15  ;;  %v801_v2 = vadd.s32 120, %v6536_v45  ;;  %v4799_v5 = vcombine.low %v1386_v42, %v6554_v59  ;;  %v6337_v15 = vld [vmem:[%s7896_s4 + $0x88] sm:$0xff]  }
 0x144   : > { %v4862_v6 = vcombine.low %v6554_v59, %v2172_v43  ;;  %vm6882_vm3 = vcmp.ne.s32.totalorder %v913_v27, 15  ;;  %v6886_v8 = vpack.c.bf16 %v1207_v51, %v1206_v49  ;;  %v6888_v9 = vpack.c.bf16 %v3166_v52, %v3165_v4  ;;  %vm8003_vm13 = vmpackc.low %vm6872_vm0, %vm6872_vm0  ;;  %v3172_v27 = vld [vmem:[#allocation2 + $0x69] sm:$0xff]  ;;  %v3169_v49 = vld [vmem:[#allocation2 + $0x51] sm:$0xff] }
 0x145   : > { %5621 = vmatmul.mubr.bf16.gmra.mrb[60].mxu0 %v1553_v25  ;;  %5812 = vmatprep.mubr.bf16.mxu1 %v1553_v25  ;;  %v920_v10 = vand.u32 15, %v800_v48  ;;  %v803_v50 = vadd.s32 136, %v6536_v45  ;;  %v6899_v11 = vpack.c.bf16 %v3168_v61, %v3167_v57  ;;  %v4863_v12 = vcombine.low %v6554_v59, %v2174_v0  ;;  %vm2146_vm6 = vmpackc.low %vm6882_vm3, %vm6882_vm3  ;;  %v6334_v57 = vld [vmem:[%s7896_s4 + $0x198] sm:$0xff]  }
 0x146   : > { %5813 = vmatmul.mubr.bf16.gmra.mrb[28].mxu1 %v2904_v19  ;;  %5640 = vmatprep.mubr.msk.bf16.mxu0 %vm6774_vm1, %v1234_v38  ;;  %v1205_v38 = vld [vmem:[#allocation2 + $0x27] sm:$0xff]  ;;  %v934_v14 = vand.u32 15, %v802_v55  ;;  %vm6914_vm7 = vcmp.ne.s16.totalorder %v4798_v62, 0  ;;  %v7997_v17 = vmov 0  ;;  %v927_v18 = vand.u32 15, %v801_v2 }
 0x147   : > { %5832 = vmatprep.mubr.msk.bf16.mxu1 %vm6798_vm5, %v6809_v36  ;;  %v1235_v3 = vpack.c.bf16 %v1205_v38, %v1204_v56  ;;  %v7998_v17 = vsel %vm6914_vm7, 4294967295, %v7997_v17  ;;  %vm6922_vm8 = vcmp.ne.s16.totalorder %v4799_v5, 0  ;;  %v7999_v19 = vmov 0 }
 0x148   : > { %v8000_v19 = vsel %vm6922_vm8, 4294967295, %v7999_v19  ;;  %vm6926_vm12 = vcmp.ne.s16.totalorder %v4862_v6, 0  ;;  %v8001_v20 = vmov 0  ;;  %v1388_v21 = vsel %vm1356_vm2, 65537, %v7920_v58 }
 0x149   : > { %v8002_v20 = vsel %vm6926_vm12, 4294967295, %v8001_v20  ;;  %v2176_v24 = vsel %vm8003_vm13, 65537, %v7920_v58  ;;  %vm6954_vm2 = vcmp.ne.s32.totalorder %v920_v10, 0  ;;  %v941_v28 = vand.u32 15, %v803_v50  ;;  %v1213_v50 = vld [vmem:[#allocation2 + $0x67] sm:$0xff] }
 0x14a   : > { %vm6962_vm15 = vcmp.ne.s16.totalorder %v4863_v12, 0  ;;  %v8006_v37 = vmov 0  ;;  %vm6966_vm0 = vcmp.ne.s32.totalorder %v934_v14, 0  ;;  %v804_v39 = vadd.s32 144, %v6536_v45  ;;  %vm8014_vm13 = vmpackc.low %vm6954_vm2, %vm6954_vm2 }
 0x14b   : > { %v8007_v37 = vsel %vm6962_vm15, 4294967295, %v8006_v37  ;;  %v4800_v38 = vcombine.low %v1388_v21, %v6554_v59  ;;  %v2178_v42 = vsel %vm2146_vm6, 65537, %v7920_v58  ;;  %v806_v44 = vadd.s32 160, %v6536_v45  ;;  %vm8019_vm2 = vmpackc.low %vm6966_vm0, %vm6966_vm0  ;;  %v6341_v21 = vld [vmem:[%s7896_s4 + $0xa0] sm:$0xff]  }
 0x14c   : > { %v6983_v48 = vpack.c.bf16 %v1209_v22, %v1208_v26  ;;  %v4864_v52 = vcombine.low %v6554_v59, %v2176_v24  ;;  %v6991_v55 = vpack.c.bf16 %v1211_v33, %v1210_v30  ;;  %v6993_v56 = vpack.c.bf16 %v3170_v34, %v3169_v49  ;;  %v1215_v22 = vld [vmem:[#allocation2 + $0x77] sm:$0xff]  ;;  %v3175_v33 = vld [vmem:[#allocation2 + $0x81] sm:$0xff]  ;;  %v3176_v34 = vld [vmem:[#allocation2 + $0x89] sm:$0xff] }
 0x14d   : > { %5641 = vmatmul.mubr.msk.bf16.vlgmr.msra.gmra.mrb[32].mxu0 %vm6820_vm9, %v1235_v3  ;;  %vm7001_vm6 = vcmp.ne.s32.totalorder %v941_v28, 15  ;;  %v807_v62 = vadd.s32 168, %v6536_v45  ;;  %v4865_v1 = vcombine.low %v6554_v59, %v2178_v42  ;;  %v948_v2 = vand.u32 15, %v804_v39  ;;  %v6340_v3 = vld [vmem:[%s7896_s4 + $0x98] sm:$0xff]  }
 0x14e   : > { %5644 = vmatprep.mubr.msk.bf16.mxu0 %vm6827_vm10, %v6886_v8  ;;  %5833 = vmatmul.mubr.msk.bf16.vlgmr.msra.gmra.mrb[0].mxu1 %vm6831_vm11, %v6888_v9  ;;  %v1392_v4 = vsel %vm8014_vm13, 65537, %v7920_v58  ;;  %v962_v5 = vand.u32 15, %v806_v44  ;;  %vm7033_vm3 = vcmp.ne.s16.totalorder %v4800_v38, 0  ;;  %v8015_v6 = vmov 0  ;;  %vm2150_vm13 = vmpackc.low %vm7001_vm6, %vm7001_vm6  ;;  %v3173_v38 = vld [vmem:[#allocation2 + $0x71] sm:$0xff] }
 0x14f   : > { %5865 = vmatpush3.bf16.msra.mxu1 %v6643_v35  ;;  %5836 = vmatprep.mubr.msk.bf16.mxu1 %vm6856_vm14, %v6899_v11  ;;  %v1390_v35 = vsel %vm1358_vm4, 65537, %v7920_v58  ;;  %vm6978_vm4 = vcmp.ne.s32.totalorder %v927_v18, 15  ;;  %v8016_v6 = vsel %vm7033_vm3, 4294967295, %v8015_v6  ;;  %v8017_v7 = vmov 0 }
 0x150   : > { %5866 = vmatprep.subr.bf16.mxu1 %v6332_v47  ;;  %5673 = vmatpush3.bf16.msra.mxu0 %v6650_v46  ;;  %v3171_v46 = vld [vmem:[#allocation2 + $0x61] sm:$0xff]  ;;  %v4801_v51 = vcombine.low %v1390_v35, %v6554_v59  ;;  %v955_v10 = vand.u32 15, %v805_v54  ;;  %v8020_v12 = vmov 0  ;;  %v969_v18 = vand.u32 15, %v807_v62  ;;  %v1214_v35 = vld [vmem:[#allocation2 + $0x6f] sm:$0xff] }
 0x151   : > { %5674 = vmatprep.subr.bf16.mxu0 %v6337_v15  ;;  %v7009_v0 = vpack.c.bf16 %v3172_v27, %v3171_v46  ;;  %vm7066_vm0 = vcmp.ne.s16.totalorder %v4865_v1, 0  ;;  %v8023_v24 = vmov 0  ;;  %v4802_v25 = vcombine.low %v1392_v4, %v6554_v59  ;;  %v6339_v54 = vld [vmem:[%s7896_s4 + $0x1a8] sm:$0xff]  }
 0x152   : > { %v8024_v24 = vsel %vm7066_vm0, 4294967295, %v8023_v24  ;;  %v808_v30 = vadd.s32 176, %v6536_v45  ;;  %v2182_v39 = vsel %vm2150_vm13, 65537, %v7920_v58  ;;  %v810_v46 = vadd.s32 192, %v6536_v45 }
 0x153   : > { %5867 = vmatpush3.bf16.msra.mxu1 %v6332_v47  ;;  %v1394_v47 = vsel %vm8019_vm2, 65537, %v7920_v58  ;;  %vm7091_vm2 = vcmp.ne.s32.totalorder %v955_v10, 15  ;;  %v809_v44 = vadd.s32 184, %v6536_v45  ;;  %v7096_v49 = vpack.c.bf16 %v1215_v22, %v1214_v35  ;;  %v1217_v10 = vld [vmem:[#allocation2 + $0x87] sm:$0xff]  ;;  %v6344_v35 = vld [vmem:[%s7896_s4 + $0xb0] sm:$0xff]  }
 0x154   : > { %5868 = vmatprep.subr.bf16.mxu1 %v6333_v23  ;;  %5675 = vmatpush3.bf16.msra.mxu0 %v6337_v15  ;;  %v6336_v15 = vld [vmem:[%s7896_s4 + $0x1a0] sm:$0xff]   ;;  %v4803_v13 = vcombine.low %v1394_v47, %v6554_v59  ;;  %vm7103_vm13 = vcmp.ne.s32.totalorder %v969_v18, 15  ;;  %v7114_v61 = vpack.c.bf16 %v3176_v34, %v3175_v33  ;;  %v4867_v62 = vcombine.low %v6554_v59, %v2182_v39  ;;  %v1218_v22 = vld [vmem:[#allocation2 + $0x8f] sm:$0xff] }
 0x155   : > { %5645 = vmatmul.mubr.msk.bf16.gmra.mrb[36].mxu0 %vm6914_vm7, %v6983_v48  ;;  %5676 = vmatprep.subr.bf16.mxu0 %v6338_v29  ;;  %vm7050_vm7 = vcmp.ne.s16.totalorder %v4864_v52, 0  ;;  %v976_v1 = vand.u32 15, %v808_v30  ;;  %vm7135_vm6 = vcmp.ne.s16.totalorder %v4802_v25, 0  ;;  %v8033_v4 = vmov 0  ;;  %v3178_v25 = vld [vmem:[#allocation2 + $0x99] sm:$0xff]  ;;  %v3179_v33 = vld [vmem:[#allocation2 + $0xa1] sm:$0xff] }
 0x156   : > { %5648 = vmatprep.mubr.msk.bf16.mxu0 %vm6922_vm8, %v6991_v55  ;;  %5837 = vmatmul.mubr.msk.bf16.gmra.mrb[4].mxu1 %vm6926_vm12, %v6993_v56  ;;  %vm7037_vm8 = vcmp.ne.s16.totalorder %v4801_v51, 0  ;;  %v8021_v12 = vsel %vm7050_vm7, 4294967295, %v8020_v12  ;;  %v8034_v4 = vsel %vm7135_vm6, 4294967295, %v8033_v4  ;;  %v983_v47 = vand.u32 15, %v809_v44  ;;  %v3180_v34 = vld [vmem:[#allocation2 + $0xa9] sm:$0xff]  ;;  %vm8046_vm12 = vmpackc.low %vm7091_vm2, %vm7091_vm2 }
 0x157   : > { %5840 = vmatprep.mubr.msk.bf16.mxu1 %vm6962_vm15, %v7009_v0  ;;  %v8018_v7 = vsel %vm7037_vm8, 4294967295, %v8017_v7  ;;  %5869 = vmatpush3.bf16.msra.mxu1 %v6333_v23  ;;  %vm8022_vm15 = vmpackc.low %vm6978_vm4, %vm6978_vm4  ;;  %v3174_v23 = vld [vmem:[#allocation2 + $0x79] sm:$0xff]  ;;  %vm7083_vm4 = vcmp.ne.s32.totalorder %v962_v5, 0  ;;  %v8041_v28 = vmov 0  ;;  %v2184_v39 = vsel %vm8046_vm12, 65537, %v7920_v58 }
 0x158   : > { %5870 = vmatprep.subr.bf16.mxu1 %v6334_v57  ;;  %v2180_v14 = vsel %vm8022_vm15, 65537, %v7920_v58  ;;  %5677 = vmatpush3.bf16.msra.mxu0 %v6338_v29  ;;  %vm7071_vm15 = vcmp.ne.s32.totalorder %v948_v2, 0  ;;  %v1212_v29 = vld [vmem:[#allocation2 + $0x5f] sm:$0xff]  ;;  %v7098_v51 = vpack.c.bf16 %v3174_v23, %v3173_v38  ;;  %v6343_v2 = vld [vmem:[%s7896_s4 + $0xa8] sm:$0xff]   ;;  %v1219_v23 = vld [vmem:[#allocation2 + $0x97] sm:$0xff]  ;;  %v813_v52 = vadd.s32 216, %v6536_v45 }
 0x159   : > { %5678 = vmatprep.subr.bf16.mxu0 %v6340_v3  ;;  %v7088_v27 = vpack.c.bf16 %v1213_v50, %v1212_v29  ;;  %v4866_v42 = vcombine.low %v6554_v59, %v2180_v14  ;;  %v8036_v50 = vmov 0  ;;  %v8039_v14 = vmov 0  ;;  %v1216_v29 = vld [vmem:[#allocation2 + $0x7f] sm:$0xff] }
 0x15a   : > { %v7188_v38 = vpack.c.bf16 %v1217_v10, %v1216_v29  ;;  %v4868_v10 = vcombine.low %v6554_v59, %v2184_v39  ;;  %v8055_v29 = vmov 0  ;;  %v7258_v39 = vld [vmem:[%s7896_s4 + $0xc0] sm:$0xff]  }
 0x15b   : > { %5871 = vmatpush3.bf16.msra.mxu1 %v6334_v57  ;;  %v811_v57 = vadd.s32 200, %v6536_v45 }
 0x15c   : > { %5872 = vmatprep.subr.bf16.mxu1 %v6336_v15  ;;  %5679 = vmatpush3.bf16.msra.mxu0 %v6340_v3  ;;  %v990_v3 = vand.u32 15, %v810_v46  ;;  %v812_v46 = vadd.s32 208, %v6536_v45 }
 0x15d   : > { %5649 = vmatmul.mubr.msk.bf16.gmra.mrb[40].mxu0 %vm7033_vm3, %v7088_v27  ;;  %5680 = vmatprep.subr.bf16.mxu0 %v6341_v21  ;;  %v997_v18 = vand.u32 15, %v811_v57  ;;  %vm7172_vm3 = vcmp.ne.s32.totalorder %v976_v1, 0  ;;  %v814_v57 = vadd.s32 224, %v6536_v45 }
 0x15e   : > { %5652 = vmatprep.mubr.msk.bf16.mxu0 %vm7037_vm8, %v7096_v49  ;;  %5841 = vmatmul.mubr.msk.bf16.gmra.mrb[8].mxu1 %vm7050_vm7, %v7098_v51  ;;  %vm8035_vm8 = vmpackc.low %vm7071_vm15, %vm7071_vm15  ;;  %vm7148_vm7 = vcmp.ne.s16.totalorder %v4803_v13, 0  ;;  %vm7183_vm10 = vcmp.ne.s32.totalorder %v990_v3, 0 }
 0x15f   : > { %5844 = vmatprep.mubr.msk.bf16.mxu1 %vm7066_vm0, %v7114_v61  ;;  %v1396_v5 = vsel %vm8035_vm8, 65537, %v7920_v58  ;;  %5873 = vmatpush3.bf16.msra.mxu1 %v6336_v15  ;;  %v8037_v50 = vsel %vm7148_vm7, 4294967295, %v8036_v50  ;;  %vm7152_vm0 = vcmp.ne.s16.totalorder %v4866_v42, 0  ;;  %v6342_v15 = vld [vmem:[%s7896_s4 + $0x1b0] sm:$0xff]   ;;  %vm7162_vm8 = vcmp.ne.s16.totalorder %v4867_v62, 0  ;;  %vm8043_vm15 = vmpackc.low %vm7083_vm4, %vm7083_vm4 }
 0x160   : > { %8038 = vst [vmem:[#allocation3_spill] sm:$0xff] %v8037_v50  ;;  %v8040_v14 = vsel %vm7152_vm0, 4294967295, %v8039_v14  ;;  %5874 = vmatprep.subr.bf16.mxu1 %v6339_v54  ;;  %5681 = vmatpush3.bf16.msra.mxu0 %v6341_v21  ;;  %v8042_v28 = vsel %vm7162_vm8, 4294967295, %v8041_v28  ;;  %v1398_v30 = vsel %vm8043_vm15, 65537, %v7920_v58  ;;  %v4804_v13 = vcombine.low %v1396_v5, %v6554_v59  ;;  %v3177_v42 = vld [vmem:[#allocation2 + $0x91] sm:$0xff]  ;;  %vm8049_vm4 = vmpackc.low %vm7103_vm13, %vm7103_vm13 }
 0x161   : > { %5682 = vmatprep.subr.bf16.mxu0 %v6343_v2  ;;  %v2186_v44 = vsel %vm8049_vm4, 65537, %v7920_v58  ;;  %vm7196_vm15 = vcmp.ne.s32.totalorder %v983_v47, 15  ;;  %v7201_v62 = vpack.c.bf16 %v1219_v23, %v1218_v22  ;;  %v7203_v1 = vpack.c.bf16 %v3178_v25, %v3177_v42  ;;  %v3184_v58 = vld [vmem:[#allocation2 + $0xc9] sm:$0xff]  ;;  %v3181_v50 = vld [vmem:[#allocation2 + $0xb1] sm:$0xff] }
 0x162   : > { %vm7208_vm2 = vcmp.ne.s32.totalorder %v997_v18, 15  ;;  %v7219_v5 = vpack.c.bf16 %v3180_v34, %v3179_v33  ;;  %v4805_v47 = vcombine.low %v1398_v30, %v6554_v59  ;;  %v6346_v18 = vld [vmem:[%s7896_s4 + $0xb8] sm:$0xff]   ;;  %v4869_v22 = vcombine.low %v6554_v59, %v2186_v44  ;;  %v1221_v30 = vld [vmem:[#allocation2 + $0xa7] sm:$0xff] }
 0x163   : > { %5875 = vmatpush3.bf16.msra.mxu1 %v6339_v54  ;;  %v6345_v54 = vld [vmem:[%s7896_s4 + $0x1b8] sm:$0xff]   ;;  %v1004_v23 = vand.u32 15, %v812_v46  ;;  %v1018_v25 = vand.u32 15, %v814_v57  ;;  %vm7246_vm12 = vcmp.ne.s16.totalorder %v4804_v13, 0  ;;  %v1011_v33 = vand.u32 15, %v813_v52  ;;  %v7253_v34 = vld [vmem:[%s7896_s4 + $0x1c0] sm:$0xff]  }
 0x164   : > { %5876 = vmatprep.subr.bf16.mxu1 %v6342_v15  ;;  %5683 = vmatpush3.bf16.msra.mxu0 %v6343_v2  ;;  %8054 = vst [vmem:[#allocation4_spill] sm:$0xff] %v7219_v5  ;;  %v815_v2 = vadd.s32 232, %v6536_v45  ;;  %v8056_v29 = vsel %vm7246_vm12, 4294967295, %v8055_v29  ;;  %v1222_v46 = vld [vmem:[#allocation2 + $0xaf] sm:$0xff]  ;;  %vm7260_vm13 = vcmp.ne.s16.totalorder %v4805_v47, 0  ;;  %v8058_v13 = vmov 0 }
 0x165   : > { %5653 = vmatmul.mubr.msk.bf16.gmra.mrb[44].mxu0 %vm7135_vm6, %v7188_v38  ;;  %5684 = vmatprep.subr.bf16.mxu0 %v6344_v35  ;;  %8057 = vst [vmem:[#allocation5_spill] sm:$0xff] %v8056_v29  ;;  %v8059_v13 = vsel %vm7260_vm13, 4294967295, %v8058_v13  ;;  %vm7264_vm4 = vcmp.ne.s16.totalorder %v4868_v10, 0  ;;  %v8061_v42 = vmov 0  ;;  %v1220_v57 = vld [vmem:[#allocation2 + $0x9f] sm:$0xff]  ;;  %v8063_v52 = vmov 0  ;;  %vm8066_vm6 = vmpackc.low %vm7172_vm3, %vm7172_vm3 }
 0x166   : > { %5656 = vmatprep.mubr.msk.bf16.mxu0 %vm7148_vm7, %v7201_v62  ;;  %5845 = vmatmul.mubr.msk.bf16.gmra.mrb[12].mxu1 %vm7152_vm0, %v7203_v1  ;;  %8060 = vst [vmem:[#allocation6_spill] sm:$0xff] %v8059_v13  ;;  %v8062_v42 = vsel %vm7264_vm4, 4294967295, %v8061_v42  ;;  %v1025_v44 = vand.u32 15, %v815_v2  ;;  %vm7268_vm7 = vcmp.ne.s16.totalorder %v4869_v22, 0  ;;  %v7282_v2 = vpack.c.bf16 %v1221_v30, %v1220_v57  ;;  %vm8069_vm0 = vmpackc.low %vm7183_vm10, %vm7183_vm10  ;;  %v3185_v29 = vld [vmem:[#allocation2 + $0xd1] sm:$0xff] }
 0x167   : > { %5848 = vmatprep.mubr.msk.bf16.mxu1 %vm7162_vm8, %v7219_v5  ;;  %5877 = vmatpush3.bf16.msra.mxu1 %v6342_v15  ;;  %v1223_v15 = vld [vmem:[#allocation2 + $0xb7] sm:$0xff]  ;;  %v8064_v52 = vsel %vm7268_vm7, 4294967295, %v8063_v52  ;;  %v8065_v5 = vmov 0   ;;  %vm7278_vm8 = vcmp.ne.s32.totalorder %v1004_v23, 0  ;;  %vm8070_vm3 = vmpackc.low %vm7196_vm15, %vm7196_vm15 }
 0x168   : > { %5878 = vmatprep.subr.bf16.mxu1 %v6345_v54  ;;  %5685 = vmatpush3.bf16.msra.mxu0 %v6344_v35  ;;  %v3182_v35 = vld [vmem:[#allocation2 + $0xb9] sm:$0xff]  ;;  %v1400_v47 = vsel %vm8066_vm6, 65537, %v8065_v5  ;;  %v1402_v22 = vsel %vm8069_vm0, 65537, %v8065_v5  ;;  %v2188_v21 = vsel %vm8070_vm3, 65537, %v8065_v5  ;;  %vm7296_vm6 = vcmp.ne.s32.totalorder %v1018_v25, 0  ;;  %vm8073_vm10 = vmpackc.low %vm7208_vm2, %vm7208_vm2  ;;  %v1225_v25 = vld [vmem:[#allocation2 + $0xc7] sm:$0xff] }
 0x169   : > { %5686 = vmatprep.subr.bf16.mxu0 %v6346_v18  ;;  %v7300_v30 = vpack.c.bf16 %v1223_v15, %v1222_v46  ;;  %v7302_v57 = vpack.c.bf16 %v3182_v35, %v3181_v50  ;;  %v2190_v26 = vsel %vm8073_vm10, 65537, %v8065_v5  ;;  %vm7310_vm0 = vcmp.ne.s32.totalorder %v1011_v33, 15  ;;  %v1226_v33 = vld [vmem:[#allocation2 + $0xcf] sm:$0xff]  ;;  %v1227_v46 = vld [vmem:[#allocation2 + $0xd7] sm:$0xff] }
 0x16a   : > { %v7318_v50 = vpack.c.bf16 %v3184_v58, %v3183_v63  ;;  %vm7323_vm3 = vcmp.ne.s32.totalorder %v1025_v44, 15  ;;  %v4806_v58 = vcombine.low %v1400_v47, %v6554_v59  ;;  %v4807_v63 = vcombine.low %v1402_v22, %v6554_v59  ;;  %v3186_v15 = vld [vmem:[#allocation2 + $0xd9] sm:$0xff] }
 0x16b   : > { %5879 = vmatpush3.bf16.msra.mxu1 %v6345_v54  ;;  %v816_v54 = vadd.s32 240, %v6536_v45  ;;  %v4870_v45 = vcombine.low %v6554_v59, %v2188_v21  ;;  %v1224_v44 = vld [vmem:[#allocation2 + $0xbf] sm:$0xff]  ;;  %v8079_v47 = vmov 0  ;;  %v8082_v22 = vmov 0 }
 0x16c   : > { %5687 = vmatpush3.bf16.msra.mxu0 %v6346_v18  ;;  %5912 = vmatprep.subr.bf16.mxu1 %v7253_v34  ;;  %8076 = vst [vmem:[#allocation7_spill] sm:$0xff] %v7318_v50  ;;  %v4871_v18 = vcombine.low %v6554_v59, %v2190_v26  ;;  %vm7351_vm2 = vcmp.ne.s16.totalorder %v4806_v58, 0  ;;  %v3187_v21 = vld [vmem:[#allocation2 + $0xe1] sm:$0xff]  ;;  %v3188_v26 = vld [vmem:[#allocation2 + $0xe9] sm:$0xff] }
 0x16d   : > { %5657 = vmatmul.mubr.msk.bf16.gmra.mrb[48].mxu0 %vm7246_vm12, %v7282_v2  ;;  %5720 = vmatprep.subr.bf16.mxu0 %v7258_v39  ;;  %v1032_v35 = vand.u32 15, %v816_v54  ;;  %v8080_v47 = vsel %vm7351_vm2, 4294967295, %v8079_v47  ;;  %vm7361_vm10 = vcmp.ne.s16.totalorder %v4870_v45, 0  ;;  %v8087_v54 = vmov 0  ;;  %vm8090_vm12 = vmpackc.low %vm7278_vm8, %vm7278_vm8 }
 0x16e   : > { %5660 = vmatprep.mubr.msk.bf16.mxu0 %vm7260_vm13, %v7300_v30  ;;  %5849 = vmatmul.mubr.msk.bf16.gmra.mrb[16].mxu1 %vm7264_vm4, %v7302_v57  ;;  %8081 = vst [vmem:[#allocation8_spill] sm:$0xff] %v8080_v47  ;;  %vm7355_vm13 = vcmp.ne.s16.totalorder %v4807_v63, 0  ;;  %vm7365_vm15 = vcmp.ne.s16.totalorder %v4871_v18, 0  ;;  %v1404_v58 = vsel %vm8090_vm12, 65537, %v8065_v5  ;;  %v7375_v63 = vpack.c.bf16 %v1227_v46, %v1226_v33  ;;  %vm8093_vm4 = vmpackc.low %vm7310_vm0, %vm7310_vm0  ;;  %v1229_v46 = vld [vmem:[#allocation2 + $0xe7] sm:$0xff]  ;;  %v3189_v18 = vld [vmem:[#allocation2 + $0xf1] sm:$0xff] }
 0x16f   : > { %5852 = vmatprep.mubr.msk.bf16.mxu1 %vm7268_vm7, %v7318_v50  ;;  %v8083_v22 = vsel %vm7355_vm13, 4294967295, %v8082_v22  ;;  %v7359_v50 = vpack.c.bf16 %v1225_v25, %v1224_v44  ;;  %v8088_v54 = vsel %vm7365_vm15, 4294967295, %v8087_v54  ;;  %v7377_v25 = vpack.c.bf16 %v3186_v15, %v3185_v29  ;;  %vm8092_vm7 = vmpackc.low %vm7296_vm6, %vm7296_vm6  ;;  %v1231_v44 = vld [vmem:[#allocation2 + $0xf7] sm:$0xff] }
 0x170   : > { %8084 = vst [vmem:[#allocation9_spill] sm:$0xff] %v8083_v22  ;;  %8089 = vst [vmem:[#allocation10_spill] sm:$0xff] %v8088_v54  ;;  %v1406_v45 = vsel %vm8092_vm7, 65537, %v8065_v5  ;;  %v2192_v10 = vsel %vm8093_vm4, 65537, %v8065_v5  ;;  %v7394_v29 = vpack.c.bf16 %v3188_v26, %v3187_v21  ;;  %vm7402_vm7 = vcmp.ne.s32.totalorder %v1032_v35, 0  ;;  %v1230_v35 = vld [vmem:[#allocation2 + $0xef] sm:$0xff] }
 0x171   : > { %8091 = vst [vmem:[#allocation11_spill] sm:$0xff] %v7377_v25  ;;  %vm8095_vm8 = vmpackc.low %vm7323_vm3, %vm7323_vm3  ;;  %v4808_v43 = vcombine.low %v1404_v58, %v6554_v59  ;;  %v4809_v3 = vcombine.low %v1406_v45, %v6554_v59  ;;  %v4872_v33 = vcombine.low %v6554_v59, %v2192_v10  ;;  %v3190_v21 = vld [vmem:[#allocation2 + $0xf9] sm:$0xff]  ;;  %v3192_v22 = vld [vmem:[#allocation2 + $0x109] sm:$0xff]  ;;  %v7437_v54 = vpack.c.bf16 %v1231_v44, %v1230_v35 }
 0x172   : > { %8094 = vst [vmem:[#allocation12_spill] sm:$0xff] %v7394_v29  ;;  %v2194_v23 = vsel %vm8095_vm8, 65537, %v8065_v5  ;;  %vm1376_vm12 = vmpackc.low %vm7402_vm7, %vm7402_vm7  ;;  %v1228_v26 = vld [vmem:[#allocation2 + $0xdf] sm:$0xff]  ;;  %v3193_v35 = vld [vmem:[#allocation2 + $0x111] sm:$0xff] }
 0x173   : > { %v4873_v15 = vcombine.low %v6554_v59, %v2194_v23  ;;  %vm7422_vm4 = vcmp.ne.s16.totalorder %v4808_v43, 0  ;;  %v7426_v45 = vpack.c.bf16 %v1229_v46, %v1228_v26  ;;  %vm7428_vm6 = vcmp.ne.s16.totalorder %v4809_v3, 0  ;;  %v1989_v46 = vld [vmem:[#allocation2 + $0x11] sm:$0xff]  ;;  %v4116_v58 = vld [vmem:[#allocation2 + $0x49] sm:$0xff] }
 0x174   : > { %vm7432_vm0 = vcmp.ne.s16.totalorder %v4872_v33, 0  ;;  %v1408_v47 = vsel %vm1376_vm12, 65537, %v8065_v5  ;;  %v7439_v43 = vpack.c.bf16 %v3190_v21, %v3189_v18  ;;  %v1233_v33 = vld [vmem:[#allocation2 + $0x107] sm:$0xff]  ;;  %v8109_v26 = vcombine.low %v6554_v59, %v6557_v60 }
 0x175   : > { %5661 = vmatmul.mubr.msk.bf16.gmra.mrb[52].mxu0 %vm7351_vm2, %v7359_v50  ;;  %vm7441_vm3 = vcmp.ne.s16.totalorder %v4873_v15, 0  ;;  %v4810_v5 = vcombine.low %v1408_v47, %v6554_v59  ;;  %v1990_v15 = vld [vmem:[#allocation2 + $0x19] sm:$0xff]  ;;  %v6348_v59 = vld [vmem:[%s7896_s4 + $0x1c8] sm:$0xff]   ;;  %vm8112_vm12 = vnez %v7984_v40 }
 0x176   : > { %5664 = vmatprep.mubr.msk.bf16.mxu0 %vm7355_vm13, %v7375_v63  ;;  %5853 = vmatmul.mubr.msk.bf16.gmra.mrb[20].mxu1 %vm7361_vm10, %v7377_v25  ;;  %vm7469_vm7 = vcmp.ne.s16.totalorder %v8109_v26, 0  ;;  %v2021_v18 = vpack.c.bf16 %v1990_v15, %v1989_v46  ;;  %v6353_v60 = vld [vmem:[%s7896_s4 + $0xc8] sm:$0xff]   ;;  %v4114_v15 = vld [vmem:[#allocation2 + $0x39] sm:$0xff] }
 0x177   : > { %5856 = vmatprep.mubr.msk.bf16.mxu1 %vm7365_vm15, %v7394_v29  ;;  %v3191_v29 = vld [vmem:[#allocation2 + $0x101] sm:$0xff]  ;;  %vm7460_vm8 = vcmp.ne.s16.totalorder %v4810_v5, 0  ;;  %v4120_v44 = vld [vmem:[#allocation2 + $0x69] sm:$0xff] }
 0x178   : > { %v7448_v3 = vpack.c.bf16 %v3192_v22, %v3191_v29  ;;  %v3194_v22 = vld [vmem:[#allocation2 + $0x119] sm:$0xff] }
 0x179   : > { %v1232_v29 = vld [vmem:[#allocation2 + $0xff] sm:$0xff] }
 0x17a   : > { %8106 = vst [vmem:[#allocation13_spill] sm:$0xff] %v7448_v3  ;;  %v7464_v21 = vpack.c.bf16 %v1233_v33, %v1232_v29  ;;  %v8133_v5 = vld [vmem:[#allocation7_spill] sm:$0xff]  ;;  %v8138_v29 = vld [vmem:[#allocation12_spill] sm:$0xff] }
 0x17b   : > { %v8134_v33 = vld [vmem:[#allocation11_spill] sm:$0xff] }
 0x17d   : > { %5665 = vmatmul.mubr.msk.bf16.gmra.mrb[56].mxu0 %vm7422_vm4, %v7426_v45 }
 0x17e   : > { %5668 = vmatprep.mubr.msk.bf16.mxu0 %vm7428_vm6, %v7437_v54  ;;  %5857 = vmatmul.mubr.msk.bf16.gmra.mrb[24].mxu1 %vm7432_vm0, %v7439_v43 }
 0x17f   : > { %5860 = vmatprep.mubr.msk.bf16.mxu1 %vm7441_vm3, %v7448_v3  ;;  %v7473_v3 = vpack.c.bf16 %v3194_v22, %v3193_v35  ;;  %v3513_v35 = vld [vmem:[#allocation2 + $0x10f] sm:$0xff]  ;;  %v3514_v22 = vld [vmem:[#allocation2 + $0x117] sm:$0xff] }
 0x180   : > { %v7608_v26 = vpack.c.bf16 %v3514_v22, %v3513_v35 }
 0x185   : > { %5669 = vmatmul.mubr.msk.bf16.gmra.mrb[60].mxu0 %vm7460_vm8, %v7464_v21 }
 0x186   : > { %5688 = vmatprep.mubr.msk.bf16.mxu0 %vm6798_vm5, %v2021_v18  ;;  %5861 = vmatmul.mubr.msk.bf16.gmra.mrb[28].mxu1 %vm7469_vm7, %v7473_v3  ;;  %vm8115_vm5 = vnez %v7998_v17  ;;  %v2536_v18 = vld [vmem:[#allocation2 + $0x27] sm:$0xff] }
 0x187   : > { %5880 = vmatprep.mubr.msk.bf16.mxu1 %vm6774_vm1, %v6886_v8  ;;  %v6354_v8 = vld [vmem:[%s7896_s4 + $0xd0] sm:$0xff]  }
 0x18d   : > { %5689 = vmatmul.mubr.msk.bf16.vlgmr.msra.gmra.mrb[32].mxu0 %vm6831_vm11, %v6809_v36  ;;  %v6349_v36 = vld [vmem:[%s7896_s4 + $0x1d0] sm:$0xff]   ;;  %vm8114_vm11 = vnez %v8007_v37 }
 0x18e   : > { %5692 = vmatprep.mubr.msk.bf16.mxu0 %vm6856_vm14, %v6888_v9  ;;  %5881 = vmatmul.mubr.msk.bf16.vlgmr.msra.gmra.mrb[0].mxu1 %vm6820_vm9, %v6983_v48  ;;  %v6350_v9 = vld [vmem:[%s7896_s4 + $0x1d8] sm:$0xff]   ;;  %vm8113_vm14 = vnez %v8002_v20 }
 0x18f   : > { %5913 = vmatpush3.bf16.msra.mxu1 %v7253_v34  ;;  %5884 = vmatprep.mubr.msk.bf16.mxu1 %vm8112_vm12, %v6991_v55  ;;  %v6356_v48 = vld [vmem:[%s7896_s4 + $0xd8] sm:$0xff]   ;;  %vm8116_vm12 = vnez %v8000_v19  ;;  %v6357_v55 = vld [vmem:[%s7896_s4 + $0xe0] sm:$0xff]   ;;  %v8129_v34 = vld [vmem:[#allocation5_spill] sm:$0xff] }
 0x190   : > { %5914 = vmatprep.subr.bf16.mxu1 %v6348_v59  ;;  %5721 = vmatpush3.bf16.msra.mxu0 %v7258_v39  ;;  %v8131_v39 = vld [vmem:[#allocation6_spill] sm:$0xff] }
 0x191   : > { %5722 = vmatprep.subr.bf16.mxu0 %v6353_v60 }
 0x193   : > { %5915 = vmatpush3.bf16.msra.mxu1 %v6348_v59  ;;  %v3515_v59 = vld [vmem:[#allocation2 + $0x11f] sm:$0xff] }
 0x194   : > { %5916 = vmatprep.subr.bf16.mxu1 %v6349_v36  ;;  %5723 = vmatpush3.bf16.msra.mxu0 %v6353_v60  ;;  %v3516_v60 = vld [vmem:[#allocation2 + $0x127] sm:$0xff] }
 0x195   : > { %5693 = vmatmul.mubr.msk.bf16.gmra.mrb[36].mxu0 %vm8113_vm14, %v6899_v11  ;;  %5724 = vmatprep.subr.bf16.mxu0 %v6354_v8  ;;  %v6352_v11 = vld [vmem:[%s7896_s4 + $0x1e0] sm:$0xff]   ;;  %vm8118_vm14 = vnez %v8024_v24 }
 0x196   : > { %5696 = vmatprep.mubr.msk.bf16.mxu0 %vm8114_vm11, %v6993_v56  ;;  %5885 = vmatmul.mubr.msk.bf16.gmra.mrb[4].mxu1 %vm8115_vm5, %v7088_v27  ;;  %v6355_v56 = vld [vmem:[%s7896_s4 + $0x1e8] sm:$0xff]   ;;  %vm8117_vm11 = vnez %v8021_v12  ;;  %vm8120_vm5 = vnez %v8018_v7 }
 0x197   : > { %5888 = vmatprep.mubr.msk.bf16.mxu1 %vm8116_vm12, %v7096_v49  ;;  %5917 = vmatpush3.bf16.msra.mxu1 %v6349_v36  ;;  %v6359_v27 = vld [vmem:[%s7896_s4 + $0xe8] sm:$0xff]   ;;  %vm8119_vm12 = vnez %v8016_v6  ;;  %v6360_v49 = vld [vmem:[%s7896_s4 + $0xf0] sm:$0xff]   ;;  %v3808_v36 = vld [vmem:[#allocation2 + $0x38] sm:$0xff] }
 0x198   : > { %5918 = vmatprep.subr.bf16.mxu1 %v6350_v9  ;;  %5725 = vmatpush3.bf16.msra.mxu0 %v6354_v8  ;;  %v2535_v8 = vld [vmem:[#allocation2 + $0x1f] sm:$0xff] }
 0x199   : > { %5726 = vmatprep.subr.bf16.mxu0 %v6356_v48 }
 0x19b   : > { %5919 = vmatpush3.bf16.msra.mxu1 %v6350_v9  ;;  %v2567_v9 = vpack.c.bf16 %v2536_v18, %v2535_v8  ;;  %v2544_v8 = vld [vmem:[#allocation2 + $0x67] sm:$0xff] }
 0x19c   : > { %5920 = vmatprep.subr.bf16.mxu1 %v6352_v11  ;;  %5727 = vmatpush3.bf16.msra.mxu0 %v6356_v48  ;;  %v3532_v48 = vpack.c.bf16 %v3516_v60, %v3515_v59  ;;  %v2541_v59 = vld [vmem:[#allocation2 + $0x4f] sm:$0xff]  ;;  %v2542_v60 = vld [vmem:[#allocation2 + $0x57] sm:$0xff] }
 0x19d   : > { %5697 = vmatmul.mubr.msk.bf16.gmra.mrb[40].mxu0 %vm8117_vm11, %v7009_v0  ;;  %5728 = vmatprep.subr.bf16.mxu0 %v6357_v55  ;;  %v6358_v0 = vld [vmem:[%s7896_s4 + $0x1f0] sm:$0xff]   ;;  %vm8122_vm11 = vnez %v8042_v28 }
 0x19e   : > { %5700 = vmatprep.mubr.msk.bf16.mxu0 %vm8118_vm14, %v7098_v51  ;;  %5889 = vmatmul.mubr.msk.bf16.gmra.mrb[8].mxu1 %vm8119_vm12, %v7188_v38  ;;  %v6361_v51 = vld [vmem:[%s7896_s4 + $0x1f8] sm:$0xff]   ;;  %vm8121_vm14 = vnez %v8040_v14 }
 0x19f   : > { %5892 = vmatprep.mubr.msk.bf16.mxu1 %vm8120_vm5, %v7201_v62  ;;  %5921 = vmatpush3.bf16.msra.mxu1 %v6352_v11  ;;  %v6362_v38 = vld [vmem:[%s7896_s4 + $0xf8] sm:$0xff]   ;;  %vm8123_vm5 = vnez %v8034_v4  ;;  %v8124_v62 = vld [vmem:[#allocation3_spill] sm:$0xff]  ;;  %v3807_v11 = vld [vmem:[#allocation2 + $0x30] sm:$0xff] }
 0x1a0   : > { %5922 = vmatprep.subr.bf16.mxu1 %v6355_v56  ;;  %5729 = vmatpush3.bf16.msra.mxu0 %v6357_v55  ;;  %vm8125_vm12 = vnez %v8124_v62  ;;  %v8139_v55 = vld [vmem:[#allocation13_spill] sm:$0xff] }
 0x1a1   : > { %5730 = vmatprep.subr.bf16.mxu0 %v6359_v27 }
 0x1a3   : > { %5923 = vmatpush3.bf16.msra.mxu1 %v6355_v56  ;;  %v3839_v56 = vpack.c.bf16 %v3808_v36, %v3807_v11  ;;  %v6365_v36 = vld [vmem:[%s7896_s4 + $0x210] sm:$0xff]   ;;  %v2570_v11 = vpack.c.bf16 %v2542_v60, %v2541_v59  ;;  %v6368_v59 = vld [vmem:[%s7896_s4 + $0x228] sm:$0xff]  }
 0x1a4   : > { %5924 = vmatprep.subr.bf16.mxu1 %v6358_v0  ;;  %5731 = vmatpush3.bf16.msra.mxu0 %v6359_v27  ;;  %v2537_v27 = vld [vmem:[#allocation2 + $0x2f] sm:$0xff] }
 0x1a5   : > { %5701 = vmatmul.mubr.msk.bf16.gmra.mrb[44].mxu0 %vm8121_vm14, %v7114_v61  ;;  %5732 = vmatprep.subr.bf16.mxu0 %v6360_v49  ;;  %v6363_v61 = vld [vmem:[%s7896_s4 + $0x200] sm:$0xff]   ;;  %vm8128_vm14 = vnez %v8064_v52 }
 0x1a6   : > { %5704 = vmatprep.mubr.msk.bf16.mxu0 %vm8122_vm11, %v7203_v1  ;;  %5893 = vmatmul.mubr.msk.bf16.gmra.mrb[12].mxu1 %vm8123_vm5, %v7282_v2  ;;  %v8126_v1 = vld [vmem:[#allocation4_spill] sm:$0xff]  ;;  %vm8127_vm11 = vnez %v8062_v42  ;;  %vm8132_vm5 = vnez %v8131_v39 }
 0x1a7   : > { %5896 = vmatprep.mubr.msk.bf16.mxu1 %vm8125_vm12, %v7300_v30  ;;  %5925 = vmatpush3.bf16.msra.mxu1 %v6358_v0  ;;  %vm8130_vm12 = vnez %v8129_v34  ;;  %v2538_v0 = vld [vmem:[#allocation2 + $0x37] sm:$0xff]  ;;  %v3833_v34 = vld [vmem:[#allocation2 + $0x100] sm:$0xff] }
 0x1a8   : > { %5926 = vmatprep.subr.bf16.mxu1 %v6361_v51  ;;  %5733 = vmatpush3.bf16.msra.mxu0 %v6360_v49  ;;  %v2540_v49 = vld [vmem:[#allocation2 + $0x47] sm:$0xff] }
 0x1a9   : > { %5734 = vmatprep.subr.bf16.mxu0 %v6362_v38 }
 0x1ab   : > { %5927 = vmatpush3.bf16.msra.mxu1 %v6361_v51  ;;  %v3810_v51 = vld [vmem:[#allocation2 + $0x48] sm:$0xff] }
 0x1ac   : > { %5735 = vmatpush3.bf16.msra.mxu0 %v6362_v38  ;;  %5960 = vmatprep.subr.bf16.mxu1 %v6363_v61  ;;  %v3812_v38 = vld [vmem:[#allocation2 + $0x58] sm:$0xff] }
 0x1ad   : > { %5705 = vmatmul.mubr.msk.bf16.gmra.mrb[48].mxu0 %vm8127_vm11, %v8126_v1  ;;  %v2568_v1 = vpack.c.bf16 %v2538_v0, %v2537_v27  ;;  %v2571_v27 = vpack.c.bf16 %v2544_v8, %v2543_v32  ;;  %v3815_v0 = vld [vmem:[#allocation2 + $0x70] sm:$0xff] }
 0x1ae   : > { %5708 = vmatprep.mubr.msk.bf16.mxu0 %vm8128_vm14, %v7302_v57  ;;  %5897 = vmatmul.mubr.msk.bf16.gmra.mrb[16].mxu1 %vm8130_vm12, %v7359_v50  ;;  %v2550_v8 = vld [vmem:[#allocation2 + $0x97] sm:$0xff] }
 0x1af   : > { %5900 = vmatprep.mubr.msk.bf16.mxu1 %vm8132_vm5, %v7375_v63  ;;  %v4113_v57 = vld [vmem:[#allocation2 + $0x31] sm:$0xff] }
 0x1b5   : > { %5709 = vmatmul.mubr.msk.bf16.gmra.mrb[52].mxu0 %vm7361_vm10, %v8133_v5  ;;  %v2539_v5 = vld [vmem:[#allocation2 + $0x3f] sm:$0xff] }
 0x1b6   : > { %5712 = vmatprep.mubr.msk.bf16.mxu0 %vm7365_vm15, %v8134_v33  ;;  %5901 = vmatmul.mubr.msk.bf16.gmra.mrb[20].mxu1 %vm7351_vm2, %v7426_v45  ;;  %v3809_v33 = vld [vmem:[#allocation2 + $0x40] sm:$0xff]  ;;  %v2569_v35 = vpack.c.bf16 %v2540_v49, %v2539_v5 }
 0x1b7   : > { %5904 = vmatprep.mubr.msk.bf16.mxu1 %vm7355_vm13, %v7437_v54  ;;  %v3840_v22 = vpack.c.bf16 %v3810_v51, %v3809_v33  ;;  %v2545_v51 = vld [vmem:[#allocation2 + $0x6f] sm:$0xff]  ;;  %v2548_v5 = vld [vmem:[#allocation2 + $0x87] sm:$0xff] }
 0x1b8   : > { %v3818_v33 = vld [vmem:[#allocation2 + $0x88] sm:$0xff] }
 0x1bd   : > { %5713 = vmatmul.mubr.msk.bf16.gmra.mrb[56].mxu0 %vm7432_vm0, %v8138_v29  ;;  %v3811_v29 = vld [vmem:[#allocation2 + $0x50] sm:$0xff] }
 0x1be   : > { %5716 = vmatprep.mubr.msk.bf16.mxu0 %vm7441_vm3, %v7439_v43  ;;  %5905 = vmatmul.mubr.msk.bf16.gmra.mrb[24].mxu1 %vm7422_vm4, %v7464_v21  ;;  %v3841_v18 = vpack.c.bf16 %v3812_v38, %v3811_v29  ;;  %v2546_v38 = vld [vmem:[#allocation2 + $0x77] sm:$0xff]  ;;  %v3817_v29 = vld [vmem:[#allocation2 + $0x80] sm:$0xff] }
 0x1bf   : > { %5908 = vmatprep.mubr.msk.bf16.mxu1 %vm7428_vm6, %v7608_v26 }
 0x1c5   : > { %5717 = vmatmul.mubr.msk.bf16.gmra.mrb[60].mxu0 %vm7469_vm7, %v8139_v55 }
 0x1c6   : > { %5736 = vmatprep.mubr.msk.bf16.mxu0 %vm6774_vm1, %v2567_v9  ;;  %5909 = vmatmul.mubr.msk.bf16.gmra.mrb[28].mxu1 %vm7460_vm8, %v3532_v48  ;;  %vm8140_vm1 = vnez %v7984_v40  ;;  %v3814_v9 = vld [vmem:[#allocation2 + $0x68] sm:$0xff]  ;;  %v3816_v48 = vld [vmem:[#allocation2 + $0x78] sm:$0xff] }
 0x1c7   : > { %5928 = vmatprep.mubr.bf16.mxu1 %v3839_v56  ;;  %v3813_v56 = vld [vmem:[#allocation2 + $0x60] sm:$0xff]  ;;  %v3843_v49 = vpack.c.bf16 %v3816_v48, %v3815_v0  ;;  %v3822_v48 = vld [vmem:[#allocation2 + $0xa8] sm:$0xff] }
 0x1c8   : > { %v3842_v40 = vpack.c.bf16 %v3814_v9, %v3813_v56  ;;  %v6369_v9 = vld [vmem:[%s7896_s4 + $0x230] sm:$0xff]   ;;  %v3821_v56 = vld [vmem:[#allocation2 + $0xa0] sm:$0xff]  ;;  %v3826_v0 = vld [vmem:[#allocation2 + $0xc8] sm:$0xff] }
 0x1cd   : > { %5737 = vmatmul.mubr.msk.bf16.vlgmr.msra.gmra.mrb[32].mxu0 %vm6820_vm9, %v2568_v1  ;;  %vm8141_vm9 = vnez %v7998_v17  ;;  %v6367_v1 = vld [vmem:[%s7896_s4 + $0x220] sm:$0xff]  }
 0x1ce   : > { %5740 = vmatprep.mubr.msk.bf16.mxu0 %vm8140_vm1, %v2569_v35  ;;  %5929 = vmatmul.mubr.bf16.vlgmr.msra.gmra.mrb[0].mxu1 %v3840_v22  ;;  %vm8142_vm1 = vnez %v8000_v19  ;;  %v3820_v35 = vld [vmem:[#allocation2 + $0x98] sm:$0xff]  ;;  %v2572_v22 = vpack.c.bf16 %v2546_v38, %v2545_v51  ;;  %v3844_v19 = vpack.c.bf16 %v3818_v33, %v3817_v29  ;;  %v3827_v38 = vld [vmem:[#allocation2 + $0xd0] sm:$0xff]  ;;  %v4145_v29 = vpack.c.bf16 %v4114_v15, %v4113_v57 }
 0x1cf   : > { %5961 = vmatpush3.bf16.msra.mxu1 %v6363_v61  ;;  %5932 = vmatprep.mubr.bf16.mxu1 %v3841_v18  ;;  %v6366_v61 = vld [vmem:[%s7896_s4 + $0x218] sm:$0xff]   ;;  %v3819_v18 = vld [vmem:[#allocation2 + $0x90] sm:$0xff] }
 0x1d0   : > { %5962 = vmatprep.subr.bf16.mxu1 %v6364_v16  ;;  %v2547_v17 = vld [vmem:[#allocation2 + $0x7f] sm:$0xff]  ;;  %v3845_v60 = vpack.c.bf16 %v3820_v35, %v3819_v18  ;;  %v3831_v33 = vld [vmem:[#allocation2 + $0xf0] sm:$0xff] }
 0x1d1   : > { %v4119_v18 = vld [vmem:[#allocation2 + $0x61] sm:$0xff] }
 0x1d3   : > { %5963 = vmatpush3.bf16.msra.mxu1 %v6364_v16  ;;  %v2573_v16 = vpack.c.bf16 %v2548_v5, %v2547_v17 }
 0x1d4   : > { %5964 = vmatprep.subr.bf16.mxu1 %v6365_v36 }
 0x1d5   : > { %5741 = vmatmul.mubr.msk.bf16.gmra.mrb[36].mxu0 %vm8141_vm9, %v2570_v11  ;;  %vm8143_vm9 = vnez %v8016_v6  ;;  %v3824_v11 = vld [vmem:[#allocation2 + $0xb8] sm:$0xff]  ;;  %v3846_v6 = vpack.c.bf16 %v3822_v48, %v3821_v56 }
 0x1d6   : > { %5744 = vmatprep.mubr.msk.bf16.mxu0 %vm8142_vm1, %v2571_v27  ;;  %5933 = vmatmul.mubr.bf16.gmra.mrb[4].mxu1 %v3842_v40  ;;  %vm8144_vm1 = vnez %v8018_v7  ;;  %v3823_v27 = vld [vmem:[#allocation2 + $0xb0] sm:$0xff]  ;;  %v6370_v7 = vld [vmem:[%s7896_s4 + $0x238] sm:$0xff]  }
 0x1d7   : > { %5936 = vmatprep.mubr.bf16.mxu1 %v3843_v49  ;;  %5965 = vmatpush3.bf16.msra.mxu1 %v6365_v36  ;;  %v2549_v36 = vld [vmem:[#allocation2 + $0x8f] sm:$0xff]  ;;  %v3847_v40 = vpack.c.bf16 %v3824_v11, %v3823_v27  ;;  %v3825_v49 = vld [vmem:[#allocation2 + $0xc0] sm:$0xff] }
 0x1d8   : > { %5966 = vmatprep.subr.bf16.mxu1 %v6366_v61  ;;  %v2574_v32 = vpack.c.bf16 %v2550_v8, %v2549_v36  ;;  %v3848_v51 = vpack.c.bf16 %v3826_v0, %v3825_v49  ;;  %v4124_v8 = vld [vmem:[#allocation2 + $0x89] sm:$0xff]  ;;  %v4125_v48 = vld [vmem:[#allocation2 + $0x91] sm:$0xff]  ;;  %v4130_v56 = vld [vmem:[#allocation2 + $0xb9] sm:$0xff] }
 0x1d9   : > { %v4133_v0 = vld [vmem:[#allocation2 + $0xd1] sm:$0xff]  ;;  %v4136_v49 = vld [vmem:[#allocation2 + $0xe9] sm:$0xff] }
 0x1db   : > { %5967 = vmatpush3.bf16.msra.mxu1 %v6366_v61  ;;  %v3828_v61 = vld [vmem:[#allocation2 + $0xd8] sm:$0xff] }
 0x1dc   : > { %5968 = vmatprep.subr.bf16.mxu1 %v6367_v1 }
 0x1dd   : > { %5745 = vmatmul.mubr.msk.bf16.gmra.mrb[40].mxu0 %vm8143_vm9, %v2572_v22  ;;  %vm8145_vm9 = vnez %v8034_v4  ;;  %v3849_v4 = vpack.c.bf16 %v3828_v61, %v3827_v38  ;;  %v3835_v22 = vld [vmem:[#allocation2 + $0x110] sm:$0xff] }
 0x1de   : > { %5748 = vmatprep.mubr.msk.bf16.mxu0 %vm8144_vm1, %v2573_v16  ;;  %5937 = vmatmul.mubr.bf16.gmra.mrb[8].mxu1 %v3844_v19  ;;  %vm8146_vm1 = vnez %v8124_v62  ;;  %v3832_v62 = vld [vmem:[#allocation2 + $0xf8] sm:$0xff] }
 0x1df   : > { %5940 = vmatprep.mubr.bf16.mxu1 %v3845_v60  ;;  %5969 = vmatpush3.bf16.msra.mxu1 %v6367_v1  ;;  %v3829_v1 = vld [vmem:[#allocation2 + $0xe0] sm:$0xff]  ;;  %v3851_v35 = vpack.c.bf16 %v3832_v62, %v3831_v33  ;;  %v4121_v60 = vld [vmem:[#allocation2 + $0x71] sm:$0xff] }
 0x1e0   : > { %5970 = vmatprep.subr.bf16.mxu1 %v6368_v59  ;;  %v4118_v16 = vld [vmem:[#allocation2 + $0x59] sm:$0xff] }
 0x1e3   : > { %5971 = vmatpush3.bf16.msra.mxu1 %v6368_v59  ;;  %v4148_v59 = vpack.c.bf16 %v4120_v44, %v4119_v18 }
 0x1e4   : > { %5972 = vmatprep.subr.bf16.mxu1 %v6369_v9 }
 0x1e5   : > { %5749 = vmatmul.mubr.msk.bf16.gmra.mrb[44].mxu0 %vm8145_vm9, %v2574_v32  ;;  %v4128_v32 = vld [vmem:[#allocation2 + $0xa9] sm:$0xff]  ;;  %vm8154_vm9 = vnez %v8040_v14  ;;  %v4143_v14 = vld [vmem:[#allocation2 + $0x121] sm:$0xff] }
 0x1e6   : > { %5752 = vmatprep.mubr.msk.bf16.mxu0 %vm8146_vm1, %v7282_v2  ;;  %5941 = vmatmul.mubr.bf16.gmra.mrb[12].mxu1 %v3846_v6  ;;  %v3830_v2 = vld [vmem:[#allocation2 + $0xe8] sm:$0xff]  ;;  %v4129_v6 = vld [vmem:[#allocation2 + $0xb1] sm:$0xff]  ;;  %vm8155_vm1 = vnez %v8042_v28 }
 0x1e7   : > { %5944 = vmatprep.mubr.bf16.mxu1 %v3847_v40  ;;  %5973 = vmatpush3.bf16.msra.mxu1 %v6369_v9  ;;  %v3850_v5 = vpack.c.bf16 %v3830_v2, %v3829_v1  ;;  %v4126_v9 = vld [vmem:[#allocation2 + $0x99] sm:$0xff]  ;;  %v4153_v27 = vpack.c.bf16 %v4130_v56, %v4129_v6  ;;  %v4144_v28 = vld [vmem:[#allocation2 + $0x129] sm:$0xff] }
 0x1e8   : > { %5974 = vmatprep.subr.bf16.mxu1 %v6370_v7  ;;  %v4151_v11 = vpack.c.bf16 %v4126_v9, %v4125_v48  ;;  %v4134_v40 = vld [vmem:[#allocation2 + $0xd9] sm:$0xff]  ;;  %v4160_v42 = vpack.c.bf16 %v4144_v28, %v4143_v14 }
 0x1e9   : > { %v4155_v61 = vpack.c.bf16 %v4134_v40, %v4133_v0 }
 0x1eb   : > { %5975 = vmatpush3.bf16.msra.mxu1 %v6370_v7  ;;  %v4132_v7 = vld [vmem:[#allocation2 + $0xc9] sm:$0xff] }
 0x1ed   : > { %5753 = vmatmul.mubr.msk.bf16.gmra.mrb[48].mxu0 %vm8130_vm12, %v7300_v30  ;;  %v3834_v30 = vld [vmem:[#allocation2 + $0x108] sm:$0xff]  ;;  %vm8153_vm12 = vnez %v8024_v24 }
 0x1ee   : > { %5756 = vmatprep.mubr.msk.bf16.mxu0 %vm8132_vm5, %v7359_v50  ;;  %5945 = vmatmul.mubr.bf16.gmra.mrb[16].mxu1 %v3848_v51  ;;  %v3836_v50 = vld [vmem:[#allocation2 + $0x118] sm:$0xff]  ;;  %v3852_v39 = vpack.c.bf16 %v3834_v30, %v3833_v34  ;;  %vm8147_vm5 = vnez %v7978_v31  ;;  %v4123_v31 = vld [vmem:[#allocation2 + $0x81] sm:$0xff] }
 0x1ef   : > { %5948 = vmatprep.mubr.bf16.mxu1 %v3849_v4  ;;  %v3853_v17 = vpack.c.bf16 %v3836_v50, %v3835_v22  ;;  %v4135_v24 = vld [vmem:[#allocation2 + $0xe1] sm:$0xff] }
 0x1f0   : > { %v4156_v51 = vpack.c.bf16 %v4136_v49, %v4135_v24 }
 0x1f5   : > { %5757 = vmatmul.mubr.msk.bf16.gmra.mrb[52].mxu0 %vm7351_vm2, %v7375_v63  ;;  %v6371_v63 = vld [vmem:[#allocation2] sm:$0xff]  ;;  %vm8149_vm2 = vnez %v7990_v53 }
 0x1f6   : > { %5760 = vmatprep.mubr.msk.bf16.mxu0 %vm7355_vm13, %v7426_v45  ;;  %5949 = vmatmul.mubr.bf16.gmra.mrb[20].mxu1 %v3850_v5  ;;  %v3854_v45 = vpack.c.bf16 %v6371_v63, %v6371_v63  ;;  %vm8148_vm13 = vnez %v7986_v41  ;;  %v4150_v41 = vpack.c.bf16 %v4124_v8, %v4123_v31  ;;  %v4127_v53 = vld [vmem:[#allocation2 + $0xa1] sm:$0xff] }
 0x1f7   : > { %5952 = vmatprep.mubr.bf16.mxu1 %v3851_v35 }
 0x1fd   : > { %5761 = vmatmul.mubr.msk.bf16.gmra.mrb[56].mxu0 %vm7422_vm4, %v7437_v54  ;;  %v4115_v54 = vld [vmem:[#allocation2 + $0x41] sm:$0xff]  ;;  %vm8150_vm4 = vnez %v8002_v20  ;;  %v4152_v20 = vpack.c.bf16 %v4128_v32, %v4127_v53 }
 0x1fe   : > { %5764 = vmatprep.mubr.msk.bf16.mxu0 %vm7428_vm6, %v7464_v21  ;;  %5953 = vmatmul.mubr.bf16.gmra.mrb[24].mxu1 %v3852_v39  ;;  %v4146_v10 = vpack.c.bf16 %v4116_v58, %v4115_v54  ;;  %v4117_v21 = vld [vmem:[#allocation2 + $0x51] sm:$0xff]  ;;  %vm8151_vm6 = vnez %v8007_v37  ;;  %v4131_v37 = vld [vmem:[#allocation2 + $0xc1] sm:$0xff] }
 0x1ff   : > { %5956 = vmatprep.mubr.bf16.mxu1 %v3853_v17  ;;  %v4147_v19 = vpack.c.bf16 %v4118_v16, %v4117_v21 }
 0x205   : > { %5765 = vmatmul.mubr.msk.bf16.gmra.mrb[60].mxu0 %vm7460_vm8, %v7608_v26  ;;  %v4122_v26 = vld [vmem:[#allocation2 + $0x79] sm:$0xff]  ;;  %vm8152_vm8 = vnez %v8021_v12  ;;  %v4154_v12 = vpack.c.bf16 %v4132_v7, %v4131_v37 }
 0x206   : > { %5957 = vmatmul.mubr.bf16.gmra.mrb[28].mxu1 %v3854_v45  ;;  %v4149_v36 = vpack.c.bf16 %v4122_v26, %v4121_v60  ;;  %v7776_v26 = vld [vmem:[%s7898_s6] ss:$0 sm:$0xff] }
 0x207   : > { %5976 = vmatprep.mubr.msk.bf16.mxu1 %vm8147_vm5, %v4145_v29 }
 0x20e   : > { %5977 = vmatmul.mubr.msk.bf16.vlgmr.msra.gmra.mrb[0].mxu1 %vm8148_vm13, %v4146_v10 }
 0x20f   : > { %5980 = vmatprep.mubr.msk.bf16.mxu1 %vm8149_vm2, %v4147_v19  ;;  %v7771_v19 = vld [vmem:[%s7897_s5] ss:$0 sm:$0xff] }
 0x216   : > { %5981 = vmatmul.mubr.msk.bf16.gmra.mrb[4].mxu1 %vm8150_vm4, %v4148_v59 }
 0x217   : > { %5984 = vmatprep.mubr.msk.bf16.mxu1 %vm8151_vm6, %v4149_v36 }
 0x21e   : > { %5985 = vmatmul.mubr.msk.bf16.gmra.mrb[8].mxu1 %vm8152_vm8, %v4150_v41 }
 0x21f   : > { %5988 = vmatprep.mubr.msk.bf16.mxu1 %vm8153_vm12, %v4151_v11 }
 0x226   : > { %5989 = vmatmul.mubr.msk.bf16.gmra.mrb[12].mxu1 %vm8154_vm9, %v4152_v20 }
 0x227   : > { %5992 = vmatprep.mubr.msk.bf16.mxu1 %vm8155_vm1, %v4153_v27 }
 0x22e   : > { %5993 = vmatmul.mubr.msk.bf16.gmra.mrb[16].mxu1 %vm8127_vm11, %v4154_v12 }
 0x22f   : > { %5996 = vmatprep.mubr.msk.bf16.mxu1 %vm8128_vm14, %v4155_v61 }
 0x236   : > { %5997 = vmatmul.mubr.msk.bf16.gmra.mrb[20].mxu1 %vm7361_vm10, %v4156_v51 }
 0x237   : > { %6000 = vmatprep.mubr.msk.bf16.mxu1 %vm7365_vm15, %v7439_v43 }
 0x23e   : > { %6001 = vmatmul.mubr.msk.bf16.gmra.mrb[24].mxu1 %vm7432_vm0, %v8139_v55 }
 0x23f   : > { %6004 = vmatprep.mubr.msk.bf16.mxu1 %vm7441_vm3, %v7473_v3 }
 0x246   : > { %6005 = vmatmul.mubr.msk.bf16.gmra.mrb[28].mxu1 %vm7469_vm7, %v4160_v42 }
 0x2a0   : > { %v5738_v13 = vpop.f32.mrb[32].mxu0 }
 0x2a1   : > { %v2698_v52 = vpop.f32.mrb[33].mxu0 }
 0x2a2   : > { %v5739_v38 = vpop.f32.mrb[34].mxu0 }
 0x2a3   : > { %v2701_v4 = vpop.f32.mrb[35].mxu0 }
 0x2a8   : > { %v5742_v46 = vpop.f32.mrb[36].mxu0 }
 0x2a9   : > { %v2714_v43 = vpop.f32.mrb[37].mxu0 }
 0x2aa   : > { %v5743_v2 = vpop.f32.mrb[38].mxu0 }
 0x2ab   : > { %v2717_v62 = vpop.f32.mrb[39].mxu0 }
 0x2b0   : > { %v7720_v23 = vpop.f32.mrb[40].mxu0 }
 0x2b1   : > { %v7722_v55 = vpop.f32.mrb[41].mxu0 }
 0x2b2   : > { %v7724_v25 = vpop.f32.mrb[42].mxu0 }
 0x2b3   : > { %v7726_v3 = vpop.f32.mrb[43].mxu0 }
 0x2b8   : > { %v7728_v1 = vpop.f32.mrb[44].mxu0 }
 0x2b9   : > { %v7730_v47 = vpop.f32.mrb[45].mxu0 }
 0x2ba   : > { %v7732_v5 = vpop.f32.mrb[46].mxu0 }
 0x2bb   : > { %v7734_v33 = vpop.f32.mrb[47].mxu0 }
 0x2c0   : > { %v7736_v35 = vpop.f32.mrb[48].mxu0 }
 0x2c1   : > { %v7738_v30 = vpop.f32.mrb[49].mxu0 }
 0x2c2   : > { %v7740_v50 = vpop.f32.mrb[50].mxu0 }
 0x2c3   : > { %v7742_v34 = vpop.f32.mrb[51].mxu0 }
 0x2c8   : > { %v7744_v39 = vpop.f32.mrb[52].mxu0 }
 0x2c9   : > { %v7746_v22 = vpop.f32.mrb[53].mxu0 }
 0x2ca   : > { %v7748_v17 = vpop.f32.mrb[54].mxu0 }
 0x2cb   : > { %v7750_v63 = vpop.f32.mrb[55].mxu0 }
 0x2d0   : > { %v7752_v45 = vpop.f32.mrb[56].mxu0 }
 0x2d1   : > { %v7754_v15 = vpop.f32.mrb[57].mxu0 }
 0x2d2   : > { %v7756_v57 = vpop.f32.mrb[58].mxu0 }
 0x2d3   : > { %v7758_v29 = vpop.f32.mrb[59].mxu0 }
 0x2d8   : > { %v7760_v54 = vpop.f32.mrb[60].mxu0 }
 0x2d9   : > { %v7762_v58 = vpop.f32.mrb[61].mxu0 }
 0x2da   : > { %v7764_v16 = vpop.f32.mrb[62].mxu0 }
 0x2db   : > { %v7766_v10 = vpop.f32.mrb[63].mxu0 }
 0x2e1   : > { %v5978_v21 = vpop.f32.mrb[0].mxu1 }
 0x2e2   : > { %v6008_v18 = vadd.f32 %v5978_v21, %v5738_v13  ;;  %v4276_v44 = vpop.f32.mrb[1].mxu1 }
 0x2e3   : > { %v6009_v59 = vadd.f32 %v4276_v44, %v2698_v52  ;;  %v5979_v60 = vpop.f32.mrb[2].mxu1 }
 0x2e4   : > { %v4444_v36 = vmul.f32 %v6008_v18, %v7771_v19  ;;  %v6010_v31 = vadd.f32 %v5979_v60, %v5739_v38  ;;  %v4279_v8 = vpop.f32.mrb[3].mxu1 }
 0x2e5   : > { %v4442_v9 = vmul.f32 %v6009_v59, %v7771_v19  ;;  %v6011_v41 = vadd.f32 %v4279_v8, %v2701_v4 }
 0x2e6   : > { %v4483_v48 = vadd.f32 %v7776_v26, %v4444_v36  ;;  %v4445_v11 = vmul.f32 %v6010_v31, %v7771_v19 }
 0x2e7   : > { %v4481_v53 = vadd.f32 %v7776_v26, %v4442_v9  ;;  %v4443_v32 = vmul.f32 %v6011_v41, %v7771_v19 }
 0x2e8   : > { %v4484_v56 = vadd.f32 %v7776_v26, %v4445_v11  ;;  %v4515_v27 = vmax.f32 %v4483_v48, 0.0 }
 0x2e9   : > { %v4482_v20 = vadd.f32 %v7776_v26, %v4443_v32  ;;  %v5982_v6 = vpop.f32.mrb[4].mxu1  ;;  %v4513_v12 = vmax.f32 %v4481_v53, 0.0 }
 0x2ea   : > { %v4516_v37 = vmax.f32 %v4484_v56, 0.0  ;;  %v6012_v7 = vadd.f32 %v5982_v6, %v5742_v46  ;;  %v4292_v40 = vpop.f32.mrb[5].mxu1 }
 0x2eb   : > { %v4514_v0 = vmax.f32 %v4482_v20, 0.0  ;;  %v6013_v61 = vadd.f32 %v4292_v40, %v2714_v43  ;;  %v5983_v24 = vpop.f32.mrb[6].mxu1 }
 0x2ec   : > { %v5201_v49 = vpack.c.bf16 %v4516_v37, %v4515_v27  ;;  %v4448_v51 = vmul.f32 %v6012_v7, %v7771_v19  ;;  %v6014_v14 = vadd.f32 %v5983_v24, %v5743_v2  ;;  %v4295_v28 = vpop.f32.mrb[7].mxu1 }
 0x2ed   : > { %v5196_v42 = vpack.c.bf16 %v4514_v0, %v4513_v12  ;;  %v4446_v13 = vmul.f32 %v6013_v61, %v7771_v19  ;;  %v6015_v52 = vadd.f32 %v4295_v28, %v2717_v62 }
 0x2ee   : > { %5273 = vst [vmem:[%s7791_s18 + $0x8] sm:$0xff] %v5201_v49   ;;  %v4487_v38 = vadd.f32 %v7776_v26, %v4448_v51  ;;  %v4449_v4 = vmul.f32 %v6014_v14, %v7771_v19 }
 0x2ef   : > { %5197 = vst [vmem:[%s7791_s18] sm:$0xff] %v5196_v42   ;;  %v4485_v46 = vadd.f32 %v7776_v26, %v4446_v13  ;;  %v4447_v43 = vmul.f32 %v6015_v52, %v7771_v19 }
 0x2f0   : > { %v4488_v21 = vadd.f32 %v7776_v26, %v4449_v4  ;;  %v4519_v44 = vmax.f32 %v4487_v38, 0.0 }
 0x2f1   : > { %v4486_v18 = vadd.f32 %v7776_v26, %v4447_v43  ;;  %v5986_v2 = vpop.f32.mrb[8].mxu1  ;;  %v4517_v36 = vmax.f32 %v4485_v46, 0.0 }
 0x2f2   : > { %v4520_v59 = vmax.f32 %v4488_v21, 0.0  ;;  %v6016_v62 = vadd.f32 %v5986_v2, %v7720_v23  ;;  %v4308_v60 = vpop.f32.mrb[9].mxu1 }
 0x2f3   : > { %v4518_v31 = vmax.f32 %v4486_v18, 0.0  ;;  %v6017_v8 = vadd.f32 %v4308_v60, %v7722_v55  ;;  %v5987_v9 = vpop.f32.mrb[10].mxu1 }
 0x2f4   : > { %v5211_v41 = vpack.c.bf16 %v4520_v59, %v4519_v44  ;;  %v4452_v48 = vmul.f32 %v6016_v62, %v7771_v19  ;;  %v6018_v11 = vadd.f32 %v5987_v9, %v7724_v25  ;;  %v4311_v53 = vpop.f32.mrb[11].mxu1 }
 0x2f5   : > { %v5206_v32 = vpack.c.bf16 %v4518_v31, %v4517_v36  ;;  %v4450_v56 = vmul.f32 %v6017_v8, %v7771_v19  ;;  %v6019_v20 = vadd.f32 %v4311_v53, %v7726_v3 }
 0x2f6   : > { %5275 = vst [vmem:[%s7791_s18 + $0x18] sm:$0xff] %v5211_v41   ;;  %v4491_v23 = vadd.f32 %v7776_v26, %v4452_v48  ;;  %v4453_v6 = vmul.f32 %v6018_v11, %v7771_v19 }
 0x2f7   : > { %5274 = vst [vmem:[%s7791_s18 + $0x10] sm:$0xff] %v5206_v32   ;;  %v4489_v55 = vadd.f32 %v7776_v26, %v4450_v56  ;;  %v4451_v27 = vmul.f32 %v6019_v20, %v7771_v19 }
 0x2f8   : > { %v4492_v37 = vadd.f32 %v7776_v26, %v4453_v6  ;;  %v4523_v40 = vmax.f32 %v4491_v23, 0.0 }
 0x2f9   : > { %v4490_v25 = vadd.f32 %v7776_v26, %v4451_v27  ;;  %v5990_v7 = vpop.f32.mrb[12].mxu1  ;;  %v4521_v61 = vmax.f32 %v4489_v55, 0.0 }
 0x2fa   : > { %v4524_v12 = vmax.f32 %v4492_v37, 0.0  ;;  %v6020_v3 = vadd.f32 %v5990_v7, %v7728_v1  ;;  %v4324_v0 = vpop.f32.mrb[13].mxu1 }
 0x2fb   : > { %v4522_v24 = vmax.f32 %v4490_v25, 0.0  ;;  %v6021_v49 = vadd.f32 %v4324_v0, %v7730_v47  ;;  %v5991_v51 = vpop.f32.mrb[14].mxu1 }
 0x2fc   : > { %v5221_v14 = vpack.c.bf16 %v4524_v12, %v4523_v40  ;;  %v4456_v28 = vmul.f32 %v6020_v3, %v7771_v19  ;;  %v6022_v42 = vadd.f32 %v5991_v51, %v7732_v5  ;;  %v4327_v13 = vpop.f32.mrb[15].mxu1 }
 0x2fd   : > { %v5216_v52 = vpack.c.bf16 %v4522_v24, %v4521_v61  ;;  %v4454_v38 = vmul.f32 %v6021_v49, %v7771_v19  ;;  %v6023_v4 = vadd.f32 %v4327_v13, %v7734_v33 }
 0x2fe   : > { %5277 = vst [vmem:[%s7791_s18 + $0x28] sm:$0xff] %v5221_v14   ;;  %v4495_v1 = vadd.f32 %v7776_v26, %v4456_v28  ;;  %v4457_v46 = vmul.f32 %v6022_v42, %v7771_v19 }
 0x2ff   : > { %5276 = vst [vmem:[%s7791_s18 + $0x20] sm:$0xff] %v5216_v52   ;;  %v4493_v47 = vadd.f32 %v7776_v26, %v4454_v38  ;;  %v4455_v43 = vmul.f32 %v6023_v4, %v7771_v19 }
 0x300   : > { %v4496_v21 = vadd.f32 %v7776_v26, %v4457_v46  ;;  %v4527_v2 = vmax.f32 %v4495_v1, 0.0 }
 0x301   : > { %v4494_v5 = vadd.f32 %v7776_v26, %v4455_v43  ;;  %v5994_v18 = vpop.f32.mrb[16].mxu1  ;;  %v4525_v62 = vmax.f32 %v4493_v47, 0.0 }
 0x302   : > { %v4528_v44 = vmax.f32 %v4496_v21, 0.0  ;;  %v6024_v33 = vadd.f32 %v5994_v18, %v7736_v35  ;;  %v4340_v59 = vpop.f32.mrb[17].mxu1 }
 0x303   : > { %v4526_v60 = vmax.f32 %v4494_v5, 0.0  ;;  %v6025_v36 = vadd.f32 %v4340_v59, %v7738_v30  ;;  %v5995_v31 = vpop.f32.mrb[18].mxu1 }
 0x304   : > { %v5231_v8 = vpack.c.bf16 %v4528_v44, %v4527_v2  ;;  %v4460_v9 = vmul.f32 %v6024_v33, %v7771_v19  ;;  %v6026_v41 = vadd.f32 %v5995_v31, %v7740_v50  ;;  %v4343_v48 = vpop.f32.mrb[19].mxu1 }
 0x305   : > { %v5226_v11 = vpack.c.bf16 %v4526_v60, %v4525_v62  ;;  %v4458_v53 = vmul.f32 %v6025_v36, %v7771_v19  ;;  %v6027_v32 = vadd.f32 %v4343_v48, %v7742_v34 }
 0x306   : > { %5279 = vst [vmem:[%s7791_s18 + $0x38] sm:$0xff] %v5231_v8   ;;  %v4499_v35 = vadd.f32 %v7776_v26, %v4460_v9  ;;  %v4461_v56 = vmul.f32 %v6026_v41, %v7771_v19 }
 0x307   : > { %5278 = vst [vmem:[%s7791_s18 + $0x30] sm:$0xff] %v5226_v11   ;;  %v4497_v30 = vadd.f32 %v7776_v26, %v4458_v53  ;;  %v4459_v20 = vmul.f32 %v6027_v32, %v7771_v19 }
 0x308   : > { %v4500_v23 = vadd.f32 %v7776_v26, %v4461_v56  ;;  %v4531_v55 = vmax.f32 %v4499_v35, 0.0 }
 0x309   : > { %v4498_v50 = vadd.f32 %v7776_v26, %v4459_v20  ;;  %v5998_v6 = vpop.f32.mrb[20].mxu1  ;;  %v4529_v25 = vmax.f32 %v4497_v30, 0.0 }
 0x30a   : > { %v4532_v27 = vmax.f32 %v4500_v23, 0.0  ;;  %v6028_v34 = vadd.f32 %v5998_v6, %v7744_v39  ;;  %v4356_v37 = vpop.f32.mrb[21].mxu1 }
 0x30b   : > { %v4530_v7 = vmax.f32 %v4498_v50, 0.0  ;;  %v6029_v40 = vadd.f32 %v4356_v37, %v7746_v22  ;;  %v5999_v12 = vpop.f32.mrb[22].mxu1 }
 0x30c   : > { %v5241_v3 = vpack.c.bf16 %v4532_v27, %v4531_v55  ;;  %v4464_v0 = vmul.f32 %v6028_v34, %v7771_v19  ;;  %v6030_v61 = vadd.f32 %v5999_v12, %v7748_v17  ;;  %v4359_v24 = vpop.f32.mrb[23].mxu1 }
 0x30d   : > { %v5236_v49 = vpack.c.bf16 %v4530_v7, %v4529_v25  ;;  %v4462_v51 = vmul.f32 %v6029_v40, %v7771_v19  ;;  %v6031_v14 = vadd.f32 %v4359_v24, %v7750_v63 }
 0x30e   : > { %5281 = vst [vmem:[%s7791_s18 + $0x48] sm:$0xff] %v5241_v3   ;;  %v4503_v39 = vadd.f32 %v7776_v26, %v4464_v0  ;;  %v4465_v28 = vmul.f32 %v6030_v61, %v7771_v19 }
 0x30f   : > { %5280 = vst [vmem:[%s7791_s18 + $0x40] sm:$0xff] %v5236_v49   ;;  %v4501_v22 = vadd.f32 %v7776_v26, %v4462_v51  ;;  %v4463_v42 = vmul.f32 %v6031_v14, %v7771_v19 }
 0x310   : > { %v4504_v13 = vadd.f32 %v7776_v26, %v4465_v28  ;;  %v4535_v38 = vmax.f32 %v4503_v39, 0.0 }
 0x311   : > { %v4502_v17 = vadd.f32 %v7776_v26, %v4463_v42  ;;  %v6002_v52 = vpop.f32.mrb[24].mxu1  ;;  %v4533_v46 = vmax.f32 %v4501_v22, 0.0 }
 0x312   : > { %v4536_v4 = vmax.f32 %v4504_v13, 0.0  ;;  %v6032_v63 = vadd.f32 %v6002_v52, %v7752_v45  ;;  %v4372_v1 = vpop.f32.mrb[25].mxu1 }
 0x313   : > { %v4534_v47 = vmax.f32 %v4502_v17, 0.0  ;;  %v6033_v43 = vadd.f32 %v4372_v1, %v7754_v15  ;;  %v6003_v21 = vpop.f32.mrb[26].mxu1 }
 0x314   : > { %v5251_v5 = vpack.c.bf16 %v4536_v4, %v4535_v38  ;;  %v4468_v18 = vmul.f32 %v6032_v63, %v7771_v19  ;;  %v6034_v2 = vadd.f32 %v6003_v21, %v7756_v57  ;;  %v4375_v44 = vpop.f32.mrb[27].mxu1 }
 0x315   : > { %v5246_v33 = vpack.c.bf16 %v4534_v47, %v4533_v46  ;;  %v4466_v59 = vmul.f32 %v6033_v43, %v7771_v19  ;;  %v6035_v62 = vadd.f32 %v4375_v44, %v7758_v29 }
 0x316   : > { %5283 = vst [vmem:[%s7791_s18 + $0x58] sm:$0xff] %v5251_v5   ;;  %v4507_v45 = vadd.f32 %v7776_v26, %v4468_v18  ;;  %v4469_v60 = vmul.f32 %v6034_v2, %v7771_v19 }
 0x317   : > { %5282 = vst [vmem:[%s7791_s18 + $0x50] sm:$0xff] %v5246_v33   ;;  %v4505_v15 = vadd.f32 %v7776_v26, %v4466_v59  ;;  %v4467_v36 = vmul.f32 %v6035_v62, %v7771_v19 }
 0x318   : > { %v4508_v31 = vadd.f32 %v7776_v26, %v4469_v60  ;;  %v4539_v9 = vmax.f32 %v4507_v45, 0.0 }
 0x319   : > { %v4506_v57 = vadd.f32 %v7776_v26, %v4467_v36  ;;  %v6006_v8 = vpop.f32.mrb[28].mxu1  ;;  %v4537_v11 = vmax.f32 %v4505_v15, 0.0 }
 0x31a   : > { %v4540_v41 = vmax.f32 %v4508_v31, 0.0  ;;  %v6036_v29 = vadd.f32 %v6006_v8, %v7760_v54  ;;  %v4388_v48 = vpop.f32.mrb[29].mxu1 }
 0x31b   : > { %v4538_v53 = vmax.f32 %v4506_v57, 0.0  ;;  %v6037_v32 = vadd.f32 %v4388_v48, %v7762_v58  ;;  %v6007_v35 = vpop.f32.mrb[30].mxu1 }
 0x31c   : > { %v5261_v56 = vpack.c.bf16 %v4540_v41, %v4539_v9  ;;  %v4472_v30 = vmul.f32 %v6036_v29, %v7771_v19  ;;  %v6038_v20 = vadd.f32 %v6007_v35, %v7764_v16  ;;  %v4391_v23 = vpop.f32.mrb[31].mxu1 }
 0x31d   : > { %v5256_v50 = vpack.c.bf16 %v4538_v53, %v4537_v11  ;;  %v4470_v6 = vmul.f32 %v6037_v32, %v7771_v19  ;;  %v6039_v55 = vadd.f32 %v4391_v23, %v7766_v10 }
 0x31e   : > { %5285 = vst [vmem:[%s7791_s18 + $0x68] sm:$0xff] %v5261_v56   ;;  %v4511_v54 = vadd.f32 %v7776_v26, %v4472_v30  ;;  %v4473_v27 = vmul.f32 %v6038_v20, %v7771_v19 }
 0x31f   : > { %5284 = vst [vmem:[%s7791_s18 + $0x60] sm:$0xff] %v5256_v50   ;;  %v4509_v58 = vadd.f32 %v7776_v26, %v4470_v6  ;;  %v4471_v34 = vmul.f32 %v6039_v55, %v7771_v19 }
 0x320   : > { %v4512_v16 = vadd.f32 %v7776_v26, %v4473_v27  ;;  %v4543_v25 = vmax.f32 %v4511_v54, 0.0 }
 0x321   : > { %v4510_v37 = vadd.f32 %v7776_v26, %v4471_v34  ;;  %v4541_v40 = vmax.f32 %v4509_v58, 0.0 }
 0x322   : > { %v4544_v7 = vmax.f32 %v4512_v16, 0.0 }
 0x323   : > { %v4542_v12 = vmax.f32 %v4510_v37, 0.0 }
 0x324   : > { %v5271_v10 = vpack.c.bf16 %v4544_v7, %v4543_v25 }
 0x325   : > { %v5266_v3 = vpack.c.bf16 %v4542_v12, %v4541_v40 }
 0x326   : > { %5287 = vst [vmem:[%s7791_s18 + $0x78] sm:$0xff] %v5271_v10  }
 0x327   : > { %5286 = vst [vmem:[%s7791_s18 + $0x70] sm:$0xff] %v5266_v3  }
 0x328 PF: > { %s17_s24 = sadd.s32 1, %s6378_s24  }
 0x329   : > { %p14_p4 = scmp.ge.s32.totalorder %s17_s24, 4  }
 0x32b   :  { %16 = sbr.rel (!%p14_p4) target bundleno = 1 (0x1), region = 86 }

</bundles_post_ra>
